<compile_context>
chip_gen: v7x
topology: tpu7x:2x2x1
jax: 0.10.0
libtpu: 0.0.40
codegen_flags: <defaults>
</compile_context>

<pallas_src>
import functools

import jax
import jax.numpy as jnp
import numpy as np
from jax.experimental import pallas as pl
from jax.experimental.pallas import tpu as pltpu


def _round_up(x, m):
    return (x + m - 1) // m * m


def decoder_kernel(V_real, chunk,
                   tf_ref,                        # scalar prefetch: (T_pad,) int32 flags
                   cell_ref, cap_ref,
                   wcat0_ref, b0_ref, wcat1_ref, b1_ref,
                   wv_ref, bv_ref, emb_ref,
                   out_ref,
                   h_s, c_s, x_s):
    i = pl.program_id(0)
    L, B, H = h_s.shape
    Vp = out_ref.shape[-1]
    col = jax.lax.broadcasted_iota(jnp.int32, (B, Vp), 1)   # hoisted, loop-invariant

    def lstm_layer(x_b, h, c, wcat_ref, b_ref):
        # x_b (B, Din) bf16, h/c (B, H) f32.  Fused [x, h] @ [W_ih; W_hh] on the
        # MXU with f32 accumulation; recurrent state stays f32.
        xin = jnp.concatenate([x_b, h.astype(jnp.bfloat16)], axis=1)
        gates = (jnp.dot(xin, wcat_ref[...], preferred_element_type=jnp.float32)
                 + b_ref[...])
        i_g = jax.nn.sigmoid(gates[:, 0:H])          # PyTorch gate order: i, f, g, o
        f_g = jax.nn.sigmoid(gates[:, H:2 * H])
        g_g = jnp.tanh(gates[:, 2 * H:3 * H])
        o_g = jax.nn.sigmoid(gates[:, 3 * H:4 * H])
        c_new = f_g * c + i_g * g_g
        h_new = o_g * jnp.tanh(c_new)
        return h_new, c_new

    # `chunk` timesteps per grid step, statically unrolled.
    for c_idx in range(chunk):
        t = i * chunk + c_idx                        # global timestep

        @pl.when(t == 0)
        def _():
            h_s[...] = cell_ref[...]                 # hidden = cell.detach().clone()
            c_s[...] = cell_ref[...]
            x_s[...] = cap_ref[0]                    # lstm_input = caption_embed[:, 0, :]
            out_ref[c_idx] = (col == 1).astype(jnp.float32)   # outputs[:, 0, 1] = 1

        @pl.when(t > 0)
        def _():
            h0, c0 = lstm_layer(x_s[...], h_s[0], c_s[0], wcat0_ref, b0_ref)
            h1, c1 = lstm_layer(h0.astype(jnp.bfloat16), h_s[1], c_s[1],
                                wcat1_ref, b1_ref)
            h_s[0] = h0
            c_s[0] = c0
            h_s[1] = h1
            c_s[1] = c1

            # linear_vocab_projection (bf16 MXU, f32 accumulate); V_pad is a
            # multiple of 128 so this store is a full, unmasked vst.
            logits = (jnp.dot(h1.astype(jnp.bfloat16), wv_ref[...],
                              preferred_element_type=jnp.float32) + bv_ref[...])
            out_ref[c_idx] = logits

            # argmax over the real vocab (padded columns masked to -inf), then
            # embedding lookup as one-hot @ embed_table (bf16 MXU).
            # TODO(synk): for production vocab sizes replace with VMEM row
            # gathers / a vocab-chunked online argmax.
            masked = jnp.where(col < V_real, logits, -jnp.inf)
            maxv = jnp.max(masked, axis=1, keepdims=True)
            idx = jnp.min(jnp.where(masked == maxv, col, Vp),
                          axis=1, keepdims=True)               # first argmax
            onehot = (col == idx).astype(jnp.float32).astype(jnp.bfloat16)
            pred_embed = jnp.dot(onehot, emb_ref[...],
                                 preferred_element_type=jnp.float32
                                 ).astype(jnp.bfloat16)

            teacher = tf_ref[t] == 1                 # deterministic teacher-force flag
            x_s[...] = jnp.where(teacher, cap_ref[c_idx], pred_embed)


def embedding_text_decoder_forward(cell, captions, params, tf_flags, *, chunk=4):
    """EmbeddingTextDecoder.forward.  Returns batch-first (B, T, vocab) f32 logits."""
    emb = params["embed"]                            # (V, E) f32
    V, E = emb.shape
    L, B, H = cell.shape
    T = captions.shape[1]

    f32, bf16 = jnp.float32, jnp.bfloat16
    B_pad = _round_up(B, 8)                          # sublane-friendly batch
    E_pad = _round_up(E, 128)                        # lane-friendly embedding dim
    V_pad = _round_up(V, 128)                        # lane-friendly vocab
    n_chunks = pl.cdiv(T, chunk)
    T_pad = n_chunks * chunk

    # Weights: pad, fuse [W_ih; W_hh] per layer, cast matmul operands to bf16.
    emb_p = jnp.zeros((V_pad, E_pad), bf16).at[:V, :E].set(emb.astype(bf16))
    wih0_p = jnp.zeros((E_pad, 4 * H), f32).at[:E].set(params["wih0"])
    wcat0 = jnp.concatenate([wih0_p, params["whh0"]], axis=0).astype(bf16)   # (E_pad+H, 4H)
    wcat1 = jnp.concatenate([params["wih1"], params["whh1"]], axis=0).astype(bf16)  # (2H, 4H)
    wv_p = jnp.zeros((H, V_pad), bf16).at[:, :V].set(params["wv"].astype(bf16))
    bv_p = jnp.zeros((1, V_pad), f32).at[:, :V].set(params["bv"].astype(f32))
    b0 = params["b0"].astype(f32)
    b1 = params["b1"].astype(f32)

    # Activations / state: pad batch & time; caption embedding lookup = XLA glue,
    # built directly in time-major layout (no big transpose of the embedded tensor).
    cell_p = jnp.zeros((L, B_pad, H), f32).at[:, :B].set(cell.astype(f32))
    cap_ids = jnp.zeros((T_pad, B_pad), jnp.int32).at[:T, :B].set(
        jnp.transpose(captions).astype(jnp.int32))
    cap_tm = emb_p[cap_ids]                          # (T_pad, B_pad, E_pad) bf16
    tf_p = jnp.ones((T_pad,), jnp.int32).at[:T].set(tf_flags.astype(jnp.int32))

    def const_spec(arr):
        nd = arr.ndim
        return pl.BlockSpec(arr.shape, lambda i, tf: (0,) * nd)

    # Explicit VMEM budget: double-buffered blocks + scratch + headroom.
    weights = (cell_p, wcat0, b0, wcat1, b1, wv_p, bv_p, emb_p)
    block_bytes = (sum(a.size * a.dtype.itemsize for a in weights)
                   + chunk * B_pad * E_pad * 2       # streamed caption block (bf16)
                   + chunk * B_pad * V_pad * 4)      # output block (f32)
    scratch_bytes = 2 * L * B_pad * H * 4 + B_pad * E_pad * 2
    vmem_limit = max(16 << 20, min(2 * block_bytes + scratch_bytes + (4 << 20), 64 << 20))

    grid_spec = pltpu.PrefetchScalarGridSpec(
        num_scalar_prefetch=1,
        grid=(n_chunks,),
        in_specs=[
            const_spec(cell_p),
            pl.BlockSpec((chunk, B_pad, E_pad), lambda i, tf: (i, 0, 0)),  # streamed caps
            const_spec(wcat0),
            const_spec(b0),
            const_spec(wcat1),
            const_spec(b1),
            const_spec(wv_p),
            const_spec(bv_p),
            const_spec(emb_p),
            # TODO(synk): for production vocab sizes hold wv/emb without double
            # buffering (pl.Buffered(1)) or tile the vocab dim with an online
            # argmax carry.
        ],
        out_specs=pl.BlockSpec((chunk, B_pad, V_pad), lambda i, tf: (i, 0, 0)),
        scratch_shapes=[
            pltpu.VMEM((L, B_pad, H), f32),          # hidden state
            pltpu.VMEM((L, B_pad, H), f32),          # cell state
            pltpu.VMEM((B_pad, E_pad), bf16),        # next lstm_input
        ],
    )

    out_padded = pl.pallas_call(
        functools.partial(decoder_kernel, V, chunk),
        out_shape=jax.ShapeDtypeStruct((T_pad, B_pad, V_pad), f32),
        grid_spec=grid_spec,
        compiler_params=pltpu.CompilerParams(
            dimension_semantics=("arbitrary",),      # time recurrence is serial
            vmem_limit_bytes=int(vmem_limit),
        ),
    )(tf_p, cell_p, cap_tm, wcat0, b0, wcat1, b1, wv_p, bv_p, emb_p)

    # Un-pad; single transpose back to PyTorch's batch_first layout (no concat —
    # the <sos> row is written in-kernel).  Time-major consumers can skip this.
    return jnp.transpose(out_padded[:T, :B, :V], (1, 0, 2))


def init_params(key, V, E, H):
    ks = jax.random.split(key, 9)
    s = 1.0 / np.sqrt(H)
    u = lambda k, shape: jax.random.uniform(k, shape, jnp.float32, -s, s)
    return dict(
        embed=(jax.random.normal(ks[0], (V, E), jnp.float32) * 0.1),
        # LSTM weights stored pre-transposed: x @ W_ih^T -> x @ wih
        wih0=u(ks[1], (E, 4 * H)),
        whh0=u(ks[2], (H, 4 * H)),
        b0=u(ks[3], (1, 4 * H)),     # b_ih0 + b_hh0 combined
        wih1=u(ks[4], (H, 4 * H)),
        whh1=u(ks[5], (H, 4 * H)),
        b1=u(ks[6], (1, 4 * H)),
        wv=u(ks[7], (H, V)),         # linear_vocab_projection (pre-transposed)
        bv=u(ks[8], (1, V)),
    )


def reference_forward(cell, captions, params, tf_flags):
    """Pure-JAX (non-Pallas) reference mirroring the kernel's bf16/f32 mix."""
    bf16, f32 = jnp.bfloat16, jnp.float32
    emb_bf = params["embed"].astype(bf16)            # (V, E)
    V, E = emb_bf.shape
    L, B, H = cell.shape
    T = captions.shape[1]

    wcat = [jnp.concatenate([params["wih0"], params["whh0"]], axis=0).astype(bf16),
            jnp.concatenate([params["wih1"], params["whh1"]], axis=0).astype(bf16)]
    bias = [params["b0"].astype(f32), params["b1"].astype(f32)]
    wv = params["wv"].astype(bf16)
    bv = params["bv"].astype(f32)

    cap_bf = emb_bf[captions]                        # (B, T, E) bf16
    h = [cell[l].astype(f32) for l in range(L)]
    c = [cell[l].astype(f32) for l in range(L)]
    outs = jnp.zeros((B, T, V), f32).at[:, 0, 1].set(1.0)
    x = cap_bf[:, 0, :]
    for t in range(1, T):
        inp = x
        for l in range(L):
            xin = jnp.concatenate([inp, h[l].astype(bf16)], axis=1)
            gates = jnp.dot(xin, wcat[l], preferred_element_type=f32) + bias[l]
            i_g = jax.nn.sigmoid(gates[:, :H])
            f_g = jax.nn.sigmoid(gates[:, H:2 * H])
            g_g = jnp.tanh(gates[:, 2 * H:3 * H])
            o_g = jax.nn.sigmoid(gates[:, 3 * H:])
            c[l] = f_g * c[l] + i_g * g_g
            h[l] = o_g * jnp.tanh(c[l])
            inp = h[l].astype(bf16)
        logits = jnp.dot(inp, wv, preferred_element_type=f32) + bv
        outs = outs.at[:, t, :].set(logits)
        pred = emb_bf[jnp.argmax(logits, axis=1)]
        x = jnp.where(tf_flags[t] == 1, cap_bf[:, t, :], pred)
    return outs


if __name__ == "__main__":
    # Small shapes consistent with the module (vocab_size=322, num_layers=2);
    # B / E / V deliberately not lane-aligned to exercise the wrapper padding,
    # T not a multiple of the time chunk to exercise time padding.
    B, T, E, H, V, L = 4, 7, 96, 128, 322, 2
    key = jax.random.PRNGKey(0)
    k_param, k_cell, k_cap, k_tf = jax.random.split(key, 4)

    params = init_params(k_param, V, E, H)
    cell = jax.random.normal(k_cell, (L, B, H), jnp.float32)     # initial cell (and hidden)
    captions = jax.random.randint(k_cap, (B, T), 0, V, dtype=jnp.int32)
    # deterministic replacement of random.random() < teacher_force_ratio
    tf_flags = (jax.random.uniform(k_tf, (T,)) < 0.5).astype(jnp.int32)

    out = embedding_text_decoder_forward(cell, captions, params, tf_flags, chunk=4)
    out = jax.block_until_ready(out)

    ref = reference_forward(cell, captions, params, tf_flags)
    np.testing.assert_allclose(np.asarray(out), np.asarray(ref), rtol=1e-2, atol=1e-2)
    print("KERNEL_OK")
</pallas_src>

<mosaic_0001>
module attributes {stable_mosaic.version = 11 : i64} {
  func.func @decoder_kernel(%arg0: i32, %arg1: memref<8xi32, #tpu.memory_space<smem>>, %arg2: memref<2x8x128xf32, #tpu.memory_space<vmem>>, %arg3: memref<4x8x128xbf16, #tpu.memory_space<vmem>>, %arg4: memref<256x512xbf16, #tpu.memory_space<vmem>>, %arg5: memref<1x512xf32, #tpu.memory_space<vmem>>, %arg6: memref<256x512xbf16, #tpu.memory_space<vmem>>, %arg7: memref<1x512xf32, #tpu.memory_space<vmem>>, %arg8: memref<128x384xbf16, #tpu.memory_space<vmem>>, %arg9: memref<1x384xf32, #tpu.memory_space<vmem>>, %arg10: memref<384x128xbf16, #tpu.memory_space<vmem>>, %arg11: memref<4x8x384xf32, #tpu.memory_space<vmem>>, %arg12: memref<2x8x128xf32, #tpu.memory_space<vmem>>, %arg13: memref<2x8x128xf32, #tpu.memory_space<vmem>>, %arg14: memref<8x128xbf16, #tpu.memory_space<vmem>>) attributes {dimension_semantics = [#tpu.dimension_semantics<arbitrary>], iteration_bounds = array<i64: 2>, scalar_prefetch = 1 : i64, scratch_operands = 3 : i64, tpu.core_type = #tpu.core_type<tc>, window_params = [{pipeline_mode = #tpu.pipeline_mode<synchronous>, transform_indices = @transform_0, window_bounds = array<i64: 2, 8, 128>}, {transform_indices = @transform_1, window_bounds = array<i64: 4, 8, 128>}, {pipeline_mode = #tpu.pipeline_mode<synchronous>, transform_indices = @transform_2, window_bounds = array<i64: 256, 512>}, {pipeline_mode = #tpu.pipeline_mode<synchronous>, transform_indices = @transform_3, window_bounds = array<i64: 1, 512>}, {pipeline_mode = #tpu.pipeline_mode<synchronous>, transform_indices = @transform_4, window_bounds = array<i64: 256, 512>}, {pipeline_mode = #tpu.pipeline_mode<synchronous>, transform_indices = @transform_5, window_bounds = array<i64: 1, 512>}, {pipeline_mode = #tpu.pipeline_mode<synchronous>, transform_indices = @transform_6, window_bounds = array<i64: 128, 384>}, {pipeline_mode = #tpu.pipeline_mode<synchronous>, transform_indices = @transform_7, window_bounds = array<i64: 1, 384>}, {pipeline_mode = #tpu.pipeline_mode<synchronous>, transform_indices = @transform_8, window_bounds = array<i64: 384, 128>}, {transform_indices = @transform_9, window_bounds = array<i64: 4, 8, 384>}]} {
    %0 = tpu.iota {dimensions = array<i32: 1>} : vector<8x384xi32>
    %c4_i32 = arith.constant 4 : i32
    %1 = arith.muli %arg0, %c4_i32 : i32
    %c0_i32 = arith.constant 0 : i32
    %2 = arith.addi %1, %c0_i32 : i32
    %c0_i32_0 = arith.constant 0 : i32
    %3 = arith.cmpi eq, %2, %c0_i32_0 : i32
    %4 = arith.extui %3 : i1 to i32
    %c0_i32_1 = arith.constant 0 : i32
    %5 = arith.cmpi ne, %4, %c0_i32_1 : i32
    scf.if %5 {
      %c0 = arith.constant 0 : index
      %c0_19 = arith.constant 0 : index
      %c0_20 = arith.constant 0 : index
      %33 = vector.load %arg2[%c0, %c0_19, %c0_20] : memref<2x8x128xf32, #tpu.memory_space<vmem>>, vector<2x8x128xf32>
      %c0_21 = arith.constant 0 : index
      %c0_22 = arith.constant 0 : index
      %c0_23 = arith.constant 0 : index
      %34 = vector.load %arg12[%c0_21, %c0_22, %c0_23] : memref<2x8x128xf32, #tpu.memory_space<vmem>>, vector<2x8x128xf32>
      tpu.vector_store %arg12[%c0_21, %c0_22, %c0_23], %33 {strides = array<i32>} : memref<2x8x128xf32, #tpu.memory_space<vmem>>, vector<2x8x128xf32>,
      %c0_24 = arith.constant 0 : index
      %c0_25 = arith.constant 0 : index
      %c0_26 = arith.constant 0 : index
      %35 = vector.load %arg2[%c0_24, %c0_25, %c0_26] : memref<2x8x128xf32, #tpu.memory_space<vmem>>, vector<2x8x128xf32>
      %c0_27 = arith.constant 0 : index
      %c0_28 = arith.constant 0 : index
      %c0_29 = arith.constant 0 : index
      %36 = vector.load %arg13[%c0_27, %c0_28, %c0_29] : memref<2x8x128xf32, #tpu.memory_space<vmem>>, vector<2x8x128xf32>
      tpu.vector_store %arg13[%c0_27, %c0_28, %c0_29], %35 {strides = array<i32>} : memref<2x8x128xf32, #tpu.memory_space<vmem>>, vector<2x8x128xf32>,
      %c0_30 = arith.constant 0 : index
      %c0_31 = arith.constant 0 : index
      %c0_32 = arith.constant 0 : index
      %37 = vector.load %arg3[%c0_30, %c0_31, %c0_32] : memref<4x8x128xbf16, #tpu.memory_space<vmem>>, vector<1x8x128xbf16>
      %38 = vector.shape_cast %37 : vector<1x8x128xbf16> to vector<8x128xbf16>
      %c0_33 = arith.constant 0 : index
      %c0_34 = arith.constant 0 : index
      %39 = vector.load %arg14[%c0_33, %c0_34] : memref<8x128xbf16, #tpu.memory_space<vmem>>, vector<8x128xbf16>
      tpu.vector_store %arg14[%c0_33, %c0_34], %38 {strides = array<i32>} : memref<8x128xbf16, #tpu.memory_space<vmem>>, vector<8x128xbf16>,
      %c1_i32_35 = arith.constant 1 : i32
      %40 = vector.broadcast %c1_i32_35 : i32 to vector<8x384xi32>
      %41 = arith.cmpi eq, %0, %40 : vector<8x384xi32>
      %42 = arith.extui %41 : vector<8x384xi1> to vector<8x384xi32>
      %43 = arith.sitofp %42 : vector<8x384xi32> to vector<8x384xf32>
      %c0_36 = arith.constant 0 : index
      %c0_37 = arith.constant 0 : index
      %c0_38 = arith.constant 0 : index
      %44 = vector.load %arg11[%c0_36, %c0_37, %c0_38] : memref<4x8x384xf32, #tpu.memory_space<vmem>>, vector<1x8x384xf32>
      %45 = vector.shape_cast %44 : vector<1x8x384xf32> to vector<8x384xf32>
      %46 = vector.shape_cast %43 : vector<8x384xf32> to vector<1x8x384xf32>
      tpu.vector_store %arg11[%c0_36, %c0_37, %c0_38], %46 {strides = array<i32>} : memref<4x8x384xf32, #tpu.memory_space<vmem>>, vector<1x8x384xf32>,
    } else {
    }
    %c0_i32_2 = arith.constant 0 : i32
    %6 = arith.cmpi sgt, %2, %c0_i32_2 : i32
    %7 = arith.extui %6 : i1 to i32
    %c0_i32_3 = arith.constant 0 : i32
    %8 = arith.cmpi ne, %7, %c0_i32_3 : i32
    scf.if %8 {
      %c0 = arith.constant 0 : index
      %c0_19 = arith.constant 0 : index
      %33 = vector.load %arg14[%c0, %c0_19] : memref<8x128xbf16, #tpu.memory_space<vmem>>, vector<8x128xbf16>
      %c0_20 = arith.constant 0 : index
      %c0_21 = arith.constant 0 : index
      %c0_22 = arith.constant 0 : index
      %34 = vector.load %arg12[%c0_20, %c0_21, %c0_22] : memref<2x8x128xf32, #tpu.memory_space<vmem>>, vector<1x8x128xf32>
      %35 = vector.shape_cast %34 : vector<1x8x128xf32> to vector<8x128xf32>
      %c0_23 = arith.constant 0 : index
      %c0_24 = arith.constant 0 : index
      %c0_25 = arith.constant 0 : index
      %36 = vector.load %arg13[%c0_23, %c0_24, %c0_25] : memref<2x8x128xf32, #tpu.memory_space<vmem>>, vector<1x8x128xf32>
      %37 = vector.shape_cast %36 : vector<1x8x128xf32> to vector<8x128xf32>
      %38 = arith.truncf %35 : vector<8x128xf32> to vector<8x128xbf16>
      %39 = tpu.concatenate %33, %38 in 1 : vector<8x128xbf16>, vector<8x128xbf16> -> vector<8x256xbf16>
      %c0_26 = arith.constant 0 : index
      %c0_27 = arith.constant 0 : index
      %40 = vector.load %arg4[%c0_26, %c0_27] : memref<256x512xbf16, #tpu.memory_space<vmem>>, vector<256x512xbf16>
      %cst = arith.constant dense<0.000000e+00> : vector<8x512xf32>
      %41 = tpu.matmul %39, %40, %cst {dimension_numbers = #tpu.dot_dimension_numbers<[1], [0], [0], [1], [0, 0, 1, 1], [], []>} : vector<8x256xbf16>, vector<256x512xbf16>, vector<8x512xf32> -> vector<8x512xf32>
      %c0_28 = arith.constant 0 : index
      %c0_29 = arith.constant 0 : index
      %42 = vector.load %arg5[%c0_28, %c0_29] : memref<1x512xf32, #tpu.memory_space<vmem>>, vector<1x512xf32>
      %43 = vector.broadcast %42 : vector<1x512xf32> to vector<8x512xf32>
      %44 = arith.addf %41, %43 : vector<8x512xf32>
      %45 = vector.extract_strided_slice %44 {offsets = [0, 0], sizes = [8, 128], strides = [1, 1]} : vector<8x512xf32> to vector<8x128xf32>
      %46 = arith.negf %45 : vector<8x128xf32>
      %47 = math.exp %46 : vector<8x128xf32>
      %cst_30 = arith.constant 1.000000e+00 : f32
      %48 = vector.broadcast %cst_30 : f32 to vector<8x128xf32>
      %49 = arith.addf %48, %47 : vector<8x128xf32>
      %50 = arith.divf %48, %49 : vector<8x128xf32>
      %51 = vector.extract_strided_slice %44 {offsets = [0, 128], sizes = [8, 128], strides = [1, 1]} : vector<8x512xf32> to vector<8x128xf32>
      %52 = arith.negf %51 : vector<8x128xf32>
      %53 = math.exp %52 : vector<8x128xf32>
      %cst_31 = arith.constant 1.000000e+00 : f32
      %54 = vector.broadcast %cst_31 : f32 to vector<8x128xf32>
      %55 = arith.addf %54, %53 : vector<8x128xf32>
      %56 = arith.divf %54, %55 : vector<8x128xf32>
      %57 = vector.extract_strided_slice %44 {offsets = [0, 256], sizes = [8, 128], strides = [1, 1]} : vector<8x512xf32> to vector<8x128xf32>
      %58 = math.tanh %57 : vector<8x128xf32>
      %59 = vector.extract_strided_slice %44 {offsets = [0, 384], sizes = [8, 128], strides = [1, 1]} : vector<8x512xf32> to vector<8x128xf32>
      %60 = arith.negf %59 : vector<8x128xf32>
      %61 = math.exp %60 : vector<8x128xf32>
      %cst_32 = arith.constant 1.000000e+00 : f32
      %62 = vector.broadcast %cst_32 : f32 to vector<8x128xf32>
      %63 = arith.addf %62, %61 : vector<8x128xf32>
      %64 = arith.divf %62, %63 : vector<8x128xf32>
      %65 = arith.mulf %56, %37 : vector<8x128xf32>
      %66 = arith.mulf %50, %58 : vector<8x128xf32>
      %67 = arith.addf %65, %66 : vector<8x128xf32>
      %68 = math.tanh %67 : vector<8x128xf32>
      %69 = arith.mulf %64, %68 : vector<8x128xf32>
      %70 = arith.truncf %69 : vector<8x128xf32> to vector<8x128xbf16>
      %c1 = arith.constant 1 : index
      %c0_33 = arith.constant 0 : index
      %c0_34 = arith.constant 0 : index
      %71 = vector.load %arg12[%c1, %c0_33, %c0_34] : memref<2x8x128xf32, #tpu.memory_space<vmem>>, vector<1x8x128xf32>
      %72 = vector.shape_cast %71 : vector<1x8x128xf32> to vector<8x128xf32>
      %c1_35 = arith.constant 1 : index
      %c0_36 = arith.constant 0 : index
      %c0_37 = arith.constant 0 : index
      %73 = vector.load %arg13[%c1_35, %c0_36, %c0_37] : memref<2x8x128xf32, #tpu.memory_space<vmem>>, vector<1x8x128xf32>
      %74 = vector.shape_cast %73 : vector<1x8x128xf32> to vector<8x128xf32>
      %75 = arith.truncf %72 : vector<8x128xf32> to vector<8x128xbf16>
      %76 = tpu.concatenate %70, %75 in 1 : vector<8x128xbf16>, vector<8x128xbf16> -> vector<8x256xbf16>
      %c0_38 = arith.constant 0 : index
      %c0_39 = arith.constant 0 : index
      %77 = vector.load %arg6[%c0_38, %c0_39] : memref<256x512xbf16, #tpu.memory_space<vmem>>, vector<256x512xbf16>
      %cst_40 = arith.constant dense<0.000000e+00> : vector<8x512xf32>
      %78 = tpu.matmul %76, %77, %cst_40 {dimension_numbers = #tpu.dot_dimension_numbers<[1], [0], [0], [1], [0, 0, 1, 1], [], []>} : vector<8x256xbf16>, vector<256x512xbf16>, vector<8x512xf32> -> vector<8x512xf32>
      %c0_41 = arith.constant 0 : index
      %c0_42 = arith.constant 0 : index
      %79 = vector.load %arg7[%c0_41, %c0_42] : memref<1x512xf32, #tpu.memory_space<vmem>>, vector<1x512xf32>
      %80 = vector.broadcast %79 : vector<1x512xf32> to vector<8x512xf32>
      %81 = arith.addf %78, %80 : vector<8x512xf32>
      %82 = vector.extract_strided_slice %81 {offsets = [0, 0], sizes = [8, 128], strides = [1, 1]} : vector<8x512xf32> to vector<8x128xf32>
      %83 = arith.negf %82 : vector<8x128xf32>
      %84 = math.exp %83 : vector<8x128xf32>
      %cst_43 = arith.constant 1.000000e+00 : f32
      %85 = vector.broadcast %cst_43 : f32 to vector<8x128xf32>
      %86 = arith.addf %85, %84 : vector<8x128xf32>
      %87 = arith.divf %85, %86 : vector<8x128xf32>
      %88 = vector.extract_strided_slice %81 {offsets = [0, 128], sizes = [8, 128], strides = [1, 1]} : vector<8x512xf32> to vector<8x128xf32>
      %89 = arith.negf %88 : vector<8x128xf32>
      %90 = math.exp %89 : vector<8x128xf32>
      %cst_44 = arith.constant 1.000000e+00 : f32
      %91 = vector.broadcast %cst_44 : f32 to vector<8x128xf32>
      %92 = arith.addf %91, %90 : vector<8x128xf32>
      %93 = arith.divf %91, %92 : vector<8x128xf32>
      %94 = vector.extract_strided_slice %81 {offsets = [0, 256], sizes = [8, 128], strides = [1, 1]} : vector<8x512xf32> to vector<8x128xf32>
      %95 = math.tanh %94 : vector<8x128xf32>
      %96 = vector.extract_strided_slice %81 {offsets = [0, 384], sizes = [8, 128], strides = [1, 1]} : vector<8x512xf32> to vector<8x128xf32>
      %97 = arith.negf %96 : vector<8x128xf32>
      %98 = math.exp %97 : vector<8x128xf32>
      %cst_45 = arith.constant 1.000000e+00 : f32
      %99 = vector.broadcast %cst_45 : f32 to vector<8x128xf32>
      %100 = arith.addf %99, %98 : vector<8x128xf32>
      %101 = arith.divf %99, %100 : vector<8x128xf32>
      %102 = arith.mulf %93, %74 : vector<8x128xf32>
      %103 = arith.mulf %87, %95 : vector<8x128xf32>
      %104 = arith.addf %102, %103 : vector<8x128xf32>
      %105 = math.tanh %104 : vector<8x128xf32>
      %106 = arith.mulf %101, %105 : vector<8x128xf32>
      %c0_46 = arith.constant 0 : index
      %c0_47 = arith.constant 0 : index
      %c0_48 = arith.constant 0 : index
      %107 = vector.load %arg12[%c0_46, %c0_47, %c0_48] : memref<2x8x128xf32, #tpu.memory_space<vmem>>, vector<1x8x128xf32>
      %108 = vector.shape_cast %107 : vector<1x8x128xf32> to vector<8x128xf32>
      %109 = vector.shape_cast %69 : vector<8x128xf32> to vector<1x8x128xf32>
      tpu.vector_store %arg12[%c0_46, %c0_47, %c0_48], %109 {strides = array<i32>} : memref<2x8x128xf32, #tpu.memory_space<vmem>>, vector<1x8x128xf32>,
      %c0_49 = arith.constant 0 : index
      %c0_50 = arith.constant 0 : index
      %c0_51 = arith.constant 0 : index
      %110 = vector.load %arg13[%c0_49, %c0_50, %c0_51] : memref<2x8x128xf32, #tpu.memory_space<vmem>>, vector<1x8x128xf32>
      %111 = vector.shape_cast %110 : vector<1x8x128xf32> to vector<8x128xf32>
      %112 = vector.shape_cast %67 : vector<8x128xf32> to vector<1x8x128xf32>
      tpu.vector_store %arg13[%c0_49, %c0_50, %c0_51], %112 {strides = array<i32>} : memref<2x8x128xf32, #tpu.memory_space<vmem>>, vector<1x8x128xf32>,
      %c1_52 = arith.constant 1 : index
      %c0_53 = arith.constant 0 : index
      %c0_54 = arith.constant 0 : index
      %113 = vector.load %arg12[%c1_52, %c0_53, %c0_54] : memref<2x8x128xf32, #tpu.memory_space<vmem>>, vector<1x8x128xf32>
      %114 = vector.shape_cast %113 : vector<1x8x128xf32> to vector<8x128xf32>
      %115 = vector.shape_cast %106 : vector<8x128xf32> to vector<1x8x128xf32>
      tpu.vector_store %arg12[%c1_52, %c0_53, %c0_54], %115 {strides = array<i32>} : memref<2x8x128xf32, #tpu.memory_space<vmem>>, vector<1x8x128xf32>,
      %c1_55 = arith.constant 1 : index
      %c0_56 = arith.constant 0 : index
      %c0_57 = arith.constant 0 : index
      %116 = vector.load %arg13[%c1_55, %c0_56, %c0_57] : memref<2x8x128xf32, #tpu.memory_space<vmem>>, vector<1x8x128xf32>
      %117 = vector.shape_cast %116 : vector<1x8x128xf32> to vector<8x128xf32>
      %118 = vector.shape_cast %104 : vector<8x128xf32> to vector<1x8x128xf32>
      tpu.vector_store %arg13[%c1_55, %c0_56, %c0_57], %118 {strides = array<i32>} : memref<2x8x128xf32, #tpu.memory_space<vmem>>, vector<1x8x128xf32>,
      %119 = arith.truncf %106 : vector<8x128xf32> to vector<8x128xbf16>
      %c0_58 = arith.constant 0 : index
      %c0_59 = arith.constant 0 : index
      %120 = vector.load %arg8[%c0_58, %c0_59] : memref<128x384xbf16, #tpu.memory_space<vmem>>, vector<128x384xbf16>
      %cst_60 = arith.constant dense<0.000000e+00> : vector<8x384xf32>
      %121 = tpu.matmul %119, %120, %cst_60 {dimension_numbers = #tpu.dot_dimension_numbers<[1], [0], [0], [1], [0, 0, 1, 1], [], []>} : vector<8x128xbf16>, vector<128x384xbf16>, vector<8x384xf32> -> vector<8x384xf32>
      %c0_61 = arith.constant 0 : index
      %c0_62 = arith.constant 0 : index
      %122 = vector.load %arg9[%c0_61, %c0_62] : memref<1x384xf32, #tpu.memory_space<vmem>>, vector<1x384xf32>
      %123 = vector.broadcast %122 : vector<1x384xf32> to vector<8x384xf32>
      %124 = arith.addf %121, %123 : vector<8x384xf32>
      %c0_63 = arith.constant 0 : index
      %c0_64 = arith.constant 0 : index
      %c0_65 = arith.constant 0 : index
      %125 = vector.load %arg11[%c0_63, %c0_64, %c0_65] : memref<4x8x384xf32, #tpu.memory_space<vmem>>, vector<1x8x384xf32>
      %126 = vector.shape_cast %125 : vector<1x8x384xf32> to vector<8x384xf32>
      %127 = vector.shape_cast %124 : vector<8x384xf32> to vector<1x8x384xf32>
      tpu.vector_store %arg11[%c0_63, %c0_64, %c0_65], %127 {strides = array<i32>} : memref<4x8x384xf32, #tpu.memory_space<vmem>>, vector<1x8x384xf32>,
      %c322_i32 = arith.constant 322 : i32
      %128 = vector.broadcast %c322_i32 : i32 to vector<8x384xi32>
      %129 = arith.cmpi slt, %0, %128 : vector<8x384xi32>
      %cst_66 = arith.constant 0xFF800000 : f32
      %130 = vector.broadcast %cst_66 : f32 to vector<8x384xf32>
      %131 = arith.select %129, %124, %130 : vector<8x384xi1>, vector<8x384xf32>
      %cst_67 = arith.constant dense<0xFF800000> : vector<8xf32>
      %132 = vector.multi_reduction <maximumf>, %131, %cst_67 [1] : vector<8x384xf32> to vector<8xf32>
      %133 = vector.shape_cast %132 : vector<8xf32> to vector<8x1xf32>
      %134 = vector.broadcast %133 : vector<8x1xf32> to vector<8x384xf32>
      %135 = arith.cmpf oeq, %131, %134 : vector<8x384xf32>
      %c384_i32 = arith.constant 384 : i32
      %136 = vector.broadcast %c384_i32 : i32 to vector<8x384xi32>
      %137 = arith.select %135, %0, %136 : vector<8x384xi1>, vector<8x384xi32>
      %cst_68 = arith.constant dense<2147483647> : vector<8xi32>
      %138 = vector.multi_reduction <minsi>, %137, %cst_68 [1] : vector<8x384xi32> to vector<8xi32>
      %139 = vector.shape_cast %138 : vector<8xi32> to vector<8x1xi32>
      %140 = vector.broadcast %139 : vector<8x1xi32> to vector<8x384xi32>
      %141 = arith.cmpi eq, %0, %140 : vector<8x384xi32>
      %142 = arith.extui %141 : vector<8x384xi1> to vector<8x384xi32>
      %143 = arith.sitofp %142 : vector<8x384xi32> to vector<8x384xf32>
      %144 = arith.truncf %143 : vector<8x384xf32> to vector<8x384xbf16>
      %c0_69 = arith.constant 0 : index
      %c0_70 = arith.constant 0 : index
      %145 = vector.load %arg10[%c0_69, %c0_70] : memref<384x128xbf16, #tpu.memory_space<vmem>>, vector<384x128xbf16>
      %cst_71 = arith.constant dense<0.000000e+00> : vector<8x128xf32>
      %146 = tpu.matmul %144, %145, %cst_71 {dimension_numbers = #tpu.dot_dimension_numbers<[1], [0], [0], [1], [0, 0, 1, 1], [], []>} : vector<8x384xbf16>, vector<384x128xbf16>, vector<8x128xf32> -> vector<8x128xf32>
      %147 = arith.truncf %146 : vector<8x128xf32> to vector<8x128xbf16>
      %148 = arith.index_cast %2 : i32 to index
      %149 = memref.load %arg1[%148] : memref<8xi32, #tpu.memory_space<smem>>
      %c1_i32_72 = arith.constant 1 : i32
      %150 = arith.cmpi eq, %149, %c1_i32_72 : i32
      %c0_73 = arith.constant 0 : index
      %c0_74 = arith.constant 0 : index
      %c0_75 = arith.constant 0 : index
      %151 = vector.load %arg3[%c0_73, %c0_74, %c0_75] : memref<4x8x128xbf16, #tpu.memory_space<vmem>>, vector<1x8x128xbf16>
      %152 = vector.shape_cast %151 : vector<1x8x128xbf16> to vector<8x128xbf16>
      %153 = arith.select %150, %152, %147 : vector<8x128xbf16>
      %c0_76 = arith.constant 0 : index
      %c0_77 = arith.constant 0 : index
      %154 = vector.load %arg14[%c0_76, %c0_77] : memref<8x128xbf16, #tpu.memory_space<vmem>>, vector<8x128xbf16>
      tpu.vector_store %arg14[%c0_76, %c0_77], %153 {strides = array<i32>} : memref<8x128xbf16, #tpu.memory_space<vmem>>, vector<8x128xbf16>,
    } else {
    }
    %c4_i32_4 = arith.constant 4 : i32
    %9 = arith.muli %arg0, %c4_i32_4 : i32
    %c1_i32 = arith.constant 1 : i32
    %10 = arith.addi %9, %c1_i32 : i32
    %c0_i32_5 = arith.constant 0 : i32
    %11 = arith.cmpi eq, %10, %c0_i32_5 : i32
    %12 = arith.extui %11 : i1 to i32
    %c0_i32_6 = arith.constant 0 : i32
    %13 = arith.cmpi ne, %12, %c0_i32_6 : i32
    scf.if %13 {
      %c0 = arith.constant 0 : index
      %c0_19 = arith.constant 0 : index
      %c0_20 = arith.constant 0 : index
      %33 = vector.load %arg2[%c0, %c0_19, %c0_20] : memref<2x8x128xf32, #tpu.memory_space<vmem>>, vector<2x8x128xf32>
      %c0_21 = arith.constant 0 : index
      %c0_22 = arith.constant 0 : index
      %c0_23 = arith.constant 0 : index
      %34 = vector.load %arg12[%c0_21, %c0_22, %c0_23] : memref<2x8x128xf32, #tpu.memory_space<vmem>>, vector<2x8x128xf32>
      tpu.vector_store %arg12[%c0_21, %c0_22, %c0_23], %33 {strides = array<i32>} : memref<2x8x128xf32, #tpu.memory_space<vmem>>, vector<2x8x128xf32>,
      %c0_24 = arith.constant 0 : index
      %c0_25 = arith.constant 0 : index
      %c0_26 = arith.constant 0 : index
      %35 = vector.load %arg2[%c0_24, %c0_25, %c0_26] : memref<2x8x128xf32, #tpu.memory_space<vmem>>, vector<2x8x128xf32>
      %c0_27 = arith.constant 0 : index
      %c0_28 = arith.constant 0 : index
      %c0_29 = arith.constant 0 : index
      %36 = vector.load %arg13[%c0_27, %c0_28, %c0_29] : memref<2x8x128xf32, #tpu.memory_space<vmem>>, vector<2x8x128xf32>
      tpu.vector_store %arg13[%c0_27, %c0_28, %c0_29], %35 {strides = array<i32>} : memref<2x8x128xf32, #tpu.memory_space<vmem>>, vector<2x8x128xf32>,
      %c0_30 = arith.constant 0 : index
      %c0_31 = arith.constant 0 : index
      %c0_32 = arith.constant 0 : index
      %37 = vector.load %arg3[%c0_30, %c0_31, %c0_32] : memref<4x8x128xbf16, #tpu.memory_space<vmem>>, vector<1x8x128xbf16>
      %38 = vector.shape_cast %37 : vector<1x8x128xbf16> to vector<8x128xbf16>
      %c0_33 = arith.constant 0 : index
      %c0_34 = arith.constant 0 : index
      %39 = vector.load %arg14[%c0_33, %c0_34] : memref<8x128xbf16, #tpu.memory_space<vmem>>, vector<8x128xbf16>
      tpu.vector_store %arg14[%c0_33, %c0_34], %38 {strides = array<i32>} : memref<8x128xbf16, #tpu.memory_space<vmem>>, vector<8x128xbf16>,
      %c1_i32_35 = arith.constant 1 : i32
      %40 = vector.broadcast %c1_i32_35 : i32 to vector<8x384xi32>
      %41 = arith.cmpi eq, %0, %40 : vector<8x384xi32>
      %42 = arith.extui %41 : vector<8x384xi1> to vector<8x384xi32>
      %43 = arith.sitofp %42 : vector<8x384xi32> to vector<8x384xf32>
      %c1 = arith.constant 1 : index
      %c0_36 = arith.constant 0 : index
      %c0_37 = arith.constant 0 : index
      %44 = vector.load %arg11[%c1, %c0_36, %c0_37] : memref<4x8x384xf32, #tpu.memory_space<vmem>>, vector<1x8x384xf32>
      %45 = vector.shape_cast %44 : vector<1x8x384xf32> to vector<8x384xf32>
      %46 = vector.shape_cast %43 : vector<8x384xf32> to vector<1x8x384xf32>
      tpu.vector_store %arg11[%c1, %c0_36, %c0_37], %46 {strides = array<i32>} : memref<4x8x384xf32, #tpu.memory_space<vmem>>, vector<1x8x384xf32>,
    } else {
    }
    %c0_i32_7 = arith.constant 0 : i32
    %14 = arith.cmpi sgt, %10, %c0_i32_7 : i32
    %15 = arith.extui %14 : i1 to i32
    %c0_i32_8 = arith.constant 0 : i32
    %16 = arith.cmpi ne, %15, %c0_i32_8 : i32
    scf.if %16 {
      %c0 = arith.constant 0 : index
      %c0_19 = arith.constant 0 : index
      %33 = vector.load %arg14[%c0, %c0_19] : memref<8x128xbf16, #tpu.memory_space<vmem>>, vector<8x128xbf16>
      %c0_20 = arith.constant 0 : index
      %c0_21 = arith.constant 0 : index
      %c0_22 = arith.constant 0 : index
      %34 = vector.load %arg12[%c0_20, %c0_21, %c0_22] : memref<2x8x128xf32, #tpu.memory_space<vmem>>, vector<1x8x128xf32>
      %35 = vector.shape_cast %34 : vector<1x8x128xf32> to vector<8x128xf32>
      %c0_23 = arith.constant 0 : index
      %c0_24 = arith.constant 0 : index
      %c0_25 = arith.constant 0 : index
      %36 = vector.load %arg13[%c0_23, %c0_24, %c0_25] : memref<2x8x128xf32, #tpu.memory_space<vmem>>, vector<1x8x128xf32>
      %37 = vector.shape_cast %36 : vector<1x8x128xf32> to vector<8x128xf32>
      %38 = arith.truncf %35 : vector<8x128xf32> to vector<8x128xbf16>
      %39 = tpu.concatenate %33, %38 in 1 : vector<8x128xbf16>, vector<8x128xbf16> -> vector<8x256xbf16>
      %c0_26 = arith.constant 0 : index
      %c0_27 = arith.constant 0 : index
      %40 = vector.load %arg4[%c0_26, %c0_27] : memref<256x512xbf16, #tpu.memory_space<vmem>>, vector<256x512xbf16>
      %cst = arith.constant dense<0.000000e+00> : vector<8x512xf32>
      %41 = tpu.matmul %39, %40, %cst {dimension_numbers = #tpu.dot_dimension_numbers<[1], [0], [0], [1], [0, 0, 1, 1], [], []>} : vector<8x256xbf16>, vector<256x512xbf16>, vector<8x512xf32> -> vector<8x512xf32>
      %c0_28 = arith.constant 0 : index
      %c0_29 = arith.constant 0 : index
      %42 = vector.load %arg5[%c0_28, %c0_29] : memref<1x512xf32, #tpu.memory_space<vmem>>, vector<1x512xf32>
      %43 = vector.broadcast %42 : vector<1x512xf32> to vector<8x512xf32>
      %44 = arith.addf %41, %43 : vector<8x512xf32>
      %45 = vector.extract_strided_slice %44 {offsets = [0, 0], sizes = [8, 128], strides = [1, 1]} : vector<8x512xf32> to vector<8x128xf32>
      %46 = arith.negf %45 : vector<8x128xf32>
      %47 = math.exp %46 : vector<8x128xf32>
      %cst_30 = arith.constant 1.000000e+00 : f32
      %48 = vector.broadcast %cst_30 : f32 to vector<8x128xf32>
      %49 = arith.addf %48, %47 : vector<8x128xf32>
      %50 = arith.divf %48, %49 : vector<8x128xf32>
      %51 = vector.extract_strided_slice %44 {offsets = [0, 128], sizes = [8, 128], strides = [1, 1]} : vector<8x512xf32> to vector<8x128xf32>
      %52 = arith.negf %51 : vector<8x128xf32>
      %53 = math.exp %52 : vector<8x128xf32>
      %cst_31 = arith.constant 1.000000e+00 : f32
      %54 = vector.broadcast %cst_31 : f32 to vector<8x128xf32>
      %55 = arith.addf %54, %53 : vector<8x128xf32>
      %56 = arith.divf %54, %55 : vector<8x128xf32>
      %57 = vector.extract_strided_slice %44 {offsets = [0, 256], sizes = [8, 128], strides = [1, 1]} : vector<8x512xf32> to vector<8x128xf32>
      %58 = math.tanh %57 : vector<8x128xf32>
      %59 = vector.extract_strided_slice %44 {offsets = [0, 384], sizes = [8, 128], strides = [1, 1]} : vector<8x512xf32> to vector<8x128xf32>
      %60 = arith.negf %59 : vector<8x128xf32>
      %61 = math.exp %60 : vector<8x128xf32>
      %cst_32 = arith.constant 1.000000e+00 : f32
      %62 = vector.broadcast %cst_32 : f32 to vector<8x128xf32>
      %63 = arith.addf %62, %61 : vector<8x128xf32>
      %64 = arith.divf %62, %63 : vector<8x128xf32>
      %65 = arith.mulf %56, %37 : vector<8x128xf32>
      %66 = arith.mulf %50, %58 : vector<8x128xf32>
      %67 = arith.addf %65, %66 : vector<8x128xf32>
      %68 = math.tanh %67 : vector<8x128xf32>
      %69 = arith.mulf %64, %68 : vector<8x128xf32>
      %70 = arith.truncf %69 : vector<8x128xf32> to vector<8x128xbf16>
      %c1 = arith.constant 1 : index
      %c0_33 = arith.constant 0 : index
      %c0_34 = arith.constant 0 : index
      %71 = vector.load %arg12[%c1, %c0_33, %c0_34] : memref<2x8x128xf32, #tpu.memory_space<vmem>>, vector<1x8x128xf32>
      %72 = vector.shape_cast %71 : vector<1x8x128xf32> to vector<8x128xf32>
      %c1_35 = arith.constant 1 : index
      %c0_36 = arith.constant 0 : index
      %c0_37 = arith.constant 0 : index
      %73 = vector.load %arg13[%c1_35, %c0_36, %c0_37] : memref<2x8x128xf32, #tpu.memory_space<vmem>>, vector<1x8x128xf32>
      %74 = vector.shape_cast %73 : vector<1x8x128xf32> to vector<8x128xf32>
      %75 = arith.truncf %72 : vector<8x128xf32> to vector<8x128xbf16>
      %76 = tpu.concatenate %70, %75 in 1 : vector<8x128xbf16>, vector<8x128xbf16> -> vector<8x256xbf16>
      %c0_38 = arith.constant 0 : index
      %c0_39 = arith.constant 0 : index
      %77 = vector.load %arg6[%c0_38, %c0_39] : memref<256x512xbf16, #tpu.memory_space<vmem>>, vector<256x512xbf16>
      %cst_40 = arith.constant dense<0.000000e+00> : vector<8x512xf32>
      %78 = tpu.matmul %76, %77, %cst_40 {dimension_numbers = #tpu.dot_dimension_numbers<[1], [0], [0], [1], [0, 0, 1, 1], [], []>} : vector<8x256xbf16>, vector<256x512xbf16>, vector<8x512xf32> -> vector<8x512xf32>
      %c0_41 = arith.constant 0 : index
      %c0_42 = arith.constant 0 : index
      %79 = vector.load %arg7[%c0_41, %c0_42] : memref<1x512xf32, #tpu.memory_space<vmem>>, vector<1x512xf32>
      %80 = vector.broadcast %79 : vector<1x512xf32> to vector<8x512xf32>
      %81 = arith.addf %78, %80 : vector<8x512xf32>
      %82 = vector.extract_strided_slice %81 {offsets = [0, 0], sizes = [8, 128], strides = [1, 1]} : vector<8x512xf32> to vector<8x128xf32>
      %83 = arith.negf %82 : vector<8x128xf32>
      %84 = math.exp %83 : vector<8x128xf32>
      %cst_43 = arith.constant 1.000000e+00 : f32
      %85 = vector.broadcast %cst_43 : f32 to vector<8x128xf32>
      %86 = arith.addf %85, %84 : vector<8x128xf32>
      %87 = arith.divf %85, %86 : vector<8x128xf32>
      %88 = vector.extract_strided_slice %81 {offsets = [0, 128], sizes = [8, 128], strides = [1, 1]} : vector<8x512xf32> to vector<8x128xf32>
      %89 = arith.negf %88 : vector<8x128xf32>
      %90 = math.exp %89 : vector<8x128xf32>
      %cst_44 = arith.constant 1.000000e+00 : f32
      %91 = vector.broadcast %cst_44 : f32 to vector<8x128xf32>
      %92 = arith.addf %91, %90 : vector<8x128xf32>
      %93 = arith.divf %91, %92 : vector<8x128xf32>
      %94 = vector.extract_strided_slice %81 {offsets = [0, 256], sizes = [8, 128], strides = [1, 1]} : vector<8x512xf32> to vector<8x128xf32>
      %95 = math.tanh %94 : vector<8x128xf32>
      %96 = vector.extract_strided_slice %81 {offsets = [0, 384], sizes = [8, 128], strides = [1, 1]} : vector<8x512xf32> to vector<8x128xf32>
      %97 = arith.negf %96 : vector<8x128xf32>
      %98 = math.exp %97 : vector<8x128xf32>
      %cst_45 = arith.constant 1.000000e+00 : f32
      %99 = vector.broadcast %cst_45 : f32 to vector<8x128xf32>
      %100 = arith.addf %99, %98 : vector<8x128xf32>
      %101 = arith.divf %99, %100 : vector<8x128xf32>
      %102 = arith.mulf %93, %74 : vector<8x128xf32>
      %103 = arith.mulf %87, %95 : vector<8x128xf32>
      %104 = arith.addf %102, %103 : vector<8x128xf32>
      %105 = math.tanh %104 : vector<8x128xf32>
      %106 = arith.mulf %101, %105 : vector<8x128xf32>
      %c0_46 = arith.constant 0 : index
      %c0_47 = arith.constant 0 : index
      %c0_48 = arith.constant 0 : index
      %107 = vector.load %arg12[%c0_46, %c0_47, %c0_48] : memref<2x8x128xf32, #tpu.memory_space<vmem>>, vector<1x8x128xf32>
      %108 = vector.shape_cast %107 : vector<1x8x128xf32> to vector<8x128xf32>
      %109 = vector.shape_cast %69 : vector<8x128xf32> to vector<1x8x128xf32>
      tpu.vector_store %arg12[%c0_46, %c0_47, %c0_48], %109 {strides = array<i32>} : memref<2x8x128xf32, #tpu.memory_space<vmem>>, vector<1x8x128xf32>,
      %c0_49 = arith.constant 0 : index
      %c0_50 = arith.constant 0 : index
      %c0_51 = arith.constant 0 : index
      %110 = vector.load %arg13[%c0_49, %c0_50, %c0_51] : memref<2x8x128xf32, #tpu.memory_space<vmem>>, vector<1x8x128xf32>
      %111 = vector.shape_cast %110 : vector<1x8x128xf32> to vector<8x128xf32>
      %112 = vector.shape_cast %67 : vector<8x128xf32> to vector<1x8x128xf32>
      tpu.vector_store %arg13[%c0_49, %c0_50, %c0_51], %112 {strides = array<i32>} : memref<2x8x128xf32, #tpu.memory_space<vmem>>, vector<1x8x128xf32>,
      %c1_52 = arith.constant 1 : index
      %c0_53 = arith.constant 0 : index
      %c0_54 = arith.constant 0 : index
      %113 = vector.load %arg12[%c1_52, %c0_53, %c0_54] : memref<2x8x128xf32, #tpu.memory_space<vmem>>, vector<1x8x128xf32>
      %114 = vector.shape_cast %113 : vector<1x8x128xf32> to vector<8x128xf32>
      %115 = vector.shape_cast %106 : vector<8x128xf32> to vector<1x8x128xf32>
      tpu.vector_store %arg12[%c1_52, %c0_53, %c0_54], %115 {strides = array<i32>} : memref<2x8x128xf32, #tpu.memory_space<vmem>>, vector<1x8x128xf32>,
      %c1_55 = arith.constant 1 : index
      %c0_56 = arith.constant 0 : index
      %c0_57 = arith.constant 0 : index
      %116 = vector.load %arg13[%c1_55, %c0_56, %c0_57] : memref<2x8x128xf32, #tpu.memory_space<vmem>>, vector<1x8x128xf32>
      %117 = vector.shape_cast %116 : vector<1x8x128xf32> to vector<8x128xf32>
      %118 = vector.shape_cast %104 : vector<8x128xf32> to vector<1x8x128xf32>
      tpu.vector_store %arg13[%c1_55, %c0_56, %c0_57], %118 {strides = array<i32>} : memref<2x8x128xf32, #tpu.memory_space<vmem>>, vector<1x8x128xf32>,
      %119 = arith.truncf %106 : vector<8x128xf32> to vector<8x128xbf16>
      %c0_58 = arith.constant 0 : index
      %c0_59 = arith.constant 0 : index
      %120 = vector.load %arg8[%c0_58, %c0_59] : memref<128x384xbf16, #tpu.memory_space<vmem>>, vector<128x384xbf16>
      %cst_60 = arith.constant dense<0.000000e+00> : vector<8x384xf32>
      %121 = tpu.matmul %119, %120, %cst_60 {dimension_numbers = #tpu.dot_dimension_numbers<[1], [0], [0], [1], [0, 0, 1, 1], [], []>} : vector<8x128xbf16>, vector<128x384xbf16>, vector<8x384xf32> -> vector<8x384xf32>
      %c0_61 = arith.constant 0 : index
      %c0_62 = arith.constant 0 : index
      %122 = vector.load %arg9[%c0_61, %c0_62] : memref<1x384xf32, #tpu.memory_space<vmem>>, vector<1x384xf32>
      %123 = vector.broadcast %122 : vector<1x384xf32> to vector<8x384xf32>
      %124 = arith.addf %121, %123 : vector<8x384xf32>
      %c1_63 = arith.constant 1 : index
      %c0_64 = arith.constant 0 : index
      %c0_65 = arith.constant 0 : index
      %125 = vector.load %arg11[%c1_63, %c0_64, %c0_65] : memref<4x8x384xf32, #tpu.memory_space<vmem>>, vector<1x8x384xf32>
      %126 = vector.shape_cast %125 : vector<1x8x384xf32> to vector<8x384xf32>
      %127 = vector.shape_cast %124 : vector<8x384xf32> to vector<1x8x384xf32>
      tpu.vector_store %arg11[%c1_63, %c0_64, %c0_65], %127 {strides = array<i32>} : memref<4x8x384xf32, #tpu.memory_space<vmem>>, vector<1x8x384xf32>,
      %c322_i32 = arith.constant 322 : i32
      %128 = vector.broadcast %c322_i32 : i32 to vector<8x384xi32>
      %129 = arith.cmpi slt, %0, %128 : vector<8x384xi32>
      %cst_66 = arith.constant 0xFF800000 : f32
      %130 = vector.broadcast %cst_66 : f32 to vector<8x384xf32>
      %131 = arith.select %129, %124, %130 : vector<8x384xi1>, vector<8x384xf32>
      %cst_67 = arith.constant dense<0xFF800000> : vector<8xf32>
      %132 = vector.multi_reduction <maximumf>, %131, %cst_67 [1] : vector<8x384xf32> to vector<8xf32>
      %133 = vector.shape_cast %132 : vector<8xf32> to vector<8x1xf32>
      %134 = vector.broadcast %133 : vector<8x1xf32> to vector<8x384xf32>
      %135 = arith.cmpf oeq, %131, %134 : vector<8x384xf32>
      %c384_i32 = arith.constant 384 : i32
      %136 = vector.broadcast %c384_i32 : i32 to vector<8x384xi32>
      %137 = arith.select %135, %0, %136 : vector<8x384xi1>, vector<8x384xi32>
      %cst_68 = arith.constant dense<2147483647> : vector<8xi32>
      %138 = vector.multi_reduction <minsi>, %137, %cst_68 [1] : vector<8x384xi32> to vector<8xi32>
      %139 = vector.shape_cast %138 : vector<8xi32> to vector<8x1xi32>
      %140 = vector.broadcast %139 : vector<8x1xi32> to vector<8x384xi32>
      %141 = arith.cmpi eq, %0, %140 : vector<8x384xi32>
      %142 = arith.extui %141 : vector<8x384xi1> to vector<8x384xi32>
      %143 = arith.sitofp %142 : vector<8x384xi32> to vector<8x384xf32>
      %144 = arith.truncf %143 : vector<8x384xf32> to vector<8x384xbf16>
      %c0_69 = arith.constant 0 : index
      %c0_70 = arith.constant 0 : index
      %145 = vector.load %arg10[%c0_69, %c0_70] : memref<384x128xbf16, #tpu.memory_space<vmem>>, vector<384x128xbf16>
      %cst_71 = arith.constant dense<0.000000e+00> : vector<8x128xf32>
      %146 = tpu.matmul %144, %145, %cst_71 {dimension_numbers = #tpu.dot_dimension_numbers<[1], [0], [0], [1], [0, 0, 1, 1], [], []>} : vector<8x384xbf16>, vector<384x128xbf16>, vector<8x128xf32> -> vector<8x128xf32>
      %147 = arith.truncf %146 : vector<8x128xf32> to vector<8x128xbf16>
      %148 = arith.index_cast %10 : i32 to index
      %149 = memref.load %arg1[%148] : memref<8xi32, #tpu.memory_space<smem>>
      %c1_i32_72 = arith.constant 1 : i32
      %150 = arith.cmpi eq, %149, %c1_i32_72 : i32
      %c1_73 = arith.constant 1 : index
      %c0_74 = arith.constant 0 : index
      %c0_75 = arith.constant 0 : index
      %151 = vector.load %arg3[%c1_73, %c0_74, %c0_75] : memref<4x8x128xbf16, #tpu.memory_space<vmem>>, vector<1x8x128xbf16>
      %152 = vector.shape_cast %151 : vector<1x8x128xbf16> to vector<8x128xbf16>
      %153 = arith.select %150, %152, %147 : vector<8x128xbf16>
      %c0_76 = arith.constant 0 : index
      %c0_77 = arith.constant 0 : index
      %154 = vector.load %arg14[%c0_76, %c0_77] : memref<8x128xbf16, #tpu.memory_space<vmem>>, vector<8x128xbf16>
      tpu.vector_store %arg14[%c0_76, %c0_77], %153 {strides = array<i32>} : memref<8x128xbf16, #tpu.memory_space<vmem>>, vector<8x128xbf16>,
    } else {
    }
    %c4_i32_9 = arith.constant 4 : i32
    %17 = arith.muli %arg0, %c4_i32_9 : i32
    %c2_i32 = arith.constant 2 : i32
    %18 = arith.addi %17, %c2_i32 : i32
    %c0_i32_10 = arith.constant 0 : i32
    %19 = arith.cmpi eq, %18, %c0_i32_10 : i32
    %20 = arith.extui %19 : i1 to i32
    %c0_i32_11 = arith.constant 0 : i32
    %21 = arith.cmpi ne, %20, %c0_i32_11 : i32
    scf.if %21 {
      %c0 = arith.constant 0 : index
      %c0_19 = arith.constant 0 : index
      %c0_20 = arith.constant 0 : index
      %33 = vector.load %arg2[%c0, %c0_19, %c0_20] : memref<2x8x128xf32, #tpu.memory_space<vmem>>, vector<2x8x128xf32>
      %c0_21 = arith.constant 0 : index
      %c0_22 = arith.constant 0 : index
      %c0_23 = arith.constant 0 : index
      %34 = vector.load %arg12[%c0_21, %c0_22, %c0_23] : memref<2x8x128xf32, #tpu.memory_space<vmem>>, vector<2x8x128xf32>
      tpu.vector_store %arg12[%c0_21, %c0_22, %c0_23], %33 {strides = array<i32>} : memref<2x8x128xf32, #tpu.memory_space<vmem>>, vector<2x8x128xf32>,
      %c0_24 = arith.constant 0 : index
      %c0_25 = arith.constant 0 : index
      %c0_26 = arith.constant 0 : index
      %35 = vector.load %arg2[%c0_24, %c0_25, %c0_26] : memref<2x8x128xf32, #tpu.memory_space<vmem>>, vector<2x8x128xf32>
      %c0_27 = arith.constant 0 : index
      %c0_28 = arith.constant 0 : index
      %c0_29 = arith.constant 0 : index
      %36 = vector.load %arg13[%c0_27, %c0_28, %c0_29] : memref<2x8x128xf32, #tpu.memory_space<vmem>>, vector<2x8x128xf32>
      tpu.vector_store %arg13[%c0_27, %c0_28, %c0_29], %35 {strides = array<i32>} : memref<2x8x128xf32, #tpu.memory_space<vmem>>, vector<2x8x128xf32>,
      %c0_30 = arith.constant 0 : index
      %c0_31 = arith.constant 0 : index
      %c0_32 = arith.constant 0 : index
      %37 = vector.load %arg3[%c0_30, %c0_31, %c0_32] : memref<4x8x128xbf16, #tpu.memory_space<vmem>>, vector<1x8x128xbf16>
      %38 = vector.shape_cast %37 : vector<1x8x128xbf16> to vector<8x128xbf16>
      %c0_33 = arith.constant 0 : index
      %c0_34 = arith.constant 0 : index
      %39 = vector.load %arg14[%c0_33, %c0_34] : memref<8x128xbf16, #tpu.memory_space<vmem>>, vector<8x128xbf16>
      tpu.vector_store %arg14[%c0_33, %c0_34], %38 {strides = array<i32>} : memref<8x128xbf16, #tpu.memory_space<vmem>>, vector<8x128xbf16>,
      %c1_i32_35 = arith.constant 1 : i32
      %40 = vector.broadcast %c1_i32_35 : i32 to vector<8x384xi32>
      %41 = arith.cmpi eq, %0, %40 : vector<8x384xi32>
      %42 = arith.extui %41 : vector<8x384xi1> to vector<8x384xi32>
      %43 = arith.sitofp %42 : vector<8x384xi32> to vector<8x384xf32>
      %c2 = arith.constant 2 : index
      %c0_36 = arith.constant 0 : index
      %c0_37 = arith.constant 0 : index
      %44 = vector.load %arg11[%c2, %c0_36, %c0_37] : memref<4x8x384xf32, #tpu.memory_space<vmem>>, vector<1x8x384xf32>
      %45 = vector.shape_cast %44 : vector<1x8x384xf32> to vector<8x384xf32>
      %46 = vector.shape_cast %43 : vector<8x384xf32> to vector<1x8x384xf32>
      tpu.vector_store %arg11[%c2, %c0_36, %c0_37], %46 {strides = array<i32>} : memref<4x8x384xf32, #tpu.memory_space<vmem>>, vector<1x8x384xf32>,
    } else {
    }
    %c0_i32_12 = arith.constant 0 : i32
    %22 = arith.cmpi sgt, %18, %c0_i32_12 : i32
    %23 = arith.extui %22 : i1 to i32
    %c0_i32_13 = arith.constant 0 : i32
    %24 = arith.cmpi ne, %23, %c0_i32_13 : i32
    scf.if %24 {
      %c0 = arith.constant 0 : index
      %c0_19 = arith.constant 0 : index
      %33 = vector.load %arg14[%c0, %c0_19] : memref<8x128xbf16, #tpu.memory_space<vmem>>, vector<8x128xbf16>
      %c0_20 = arith.constant 0 : index
      %c0_21 = arith.constant 0 : index
      %c0_22 = arith.constant 0 : index
      %34 = vector.load %arg12[%c0_20, %c0_21, %c0_22] : memref<2x8x128xf32, #tpu.memory_space<vmem>>, vector<1x8x128xf32>
      %35 = vector.shape_cast %34 : vector<1x8x128xf32> to vector<8x128xf32>
      %c0_23 = arith.constant 0 : index
      %c0_24 = arith.constant 0 : index
      %c0_25 = arith.constant 0 : index
      %36 = vector.load %arg13[%c0_23, %c0_24, %c0_25] : memref<2x8x128xf32, #tpu.memory_space<vmem>>, vector<1x8x128xf32>
      %37 = vector.shape_cast %36 : vector<1x8x128xf32> to vector<8x128xf32>
      %38 = arith.truncf %35 : vector<8x128xf32> to vector<8x128xbf16>
      %39 = tpu.concatenate %33, %38 in 1 : vector<8x128xbf16>, vector<8x128xbf16> -> vector<8x256xbf16>
      %c0_26 = arith.constant 0 : index
      %c0_27 = arith.constant 0 : index
      %40 = vector.load %arg4[%c0_26, %c0_27] : memref<256x512xbf16, #tpu.memory_space<vmem>>, vector<256x512xbf16>
      %cst = arith.constant dense<0.000000e+00> : vector<8x512xf32>
      %41 = tpu.matmul %39, %40, %cst {dimension_numbers = #tpu.dot_dimension_numbers<[1], [0], [0], [1], [0, 0, 1, 1], [], []>} : vector<8x256xbf16>, vector<256x512xbf16>, vector<8x512xf32> -> vector<8x512xf32>
      %c0_28 = arith.constant 0 : index
      %c0_29 = arith.constant 0 : index
      %42 = vector.load %arg5[%c0_28, %c0_29] : memref<1x512xf32, #tpu.memory_space<vmem>>, vector<1x512xf32>
      %43 = vector.broadcast %42 : vector<1x512xf32> to vector<8x512xf32>
      %44 = arith.addf %41, %43 : vector<8x512xf32>
      %45 = vector.extract_strided_slice %44 {offsets = [0, 0], sizes = [8, 128], strides = [1, 1]} : vector<8x512xf32> to vector<8x128xf32>
      %46 = arith.negf %45 : vector<8x128xf32>
      %47 = math.exp %46 : vector<8x128xf32>
      %cst_30 = arith.constant 1.000000e+00 : f32
      %48 = vector.broadcast %cst_30 : f32 to vector<8x128xf32>
      %49 = arith.addf %48, %47 : vector<8x128xf32>
      %50 = arith.divf %48, %49 : vector<8x128xf32>
      %51 = vector.extract_strided_slice %44 {offsets = [0, 128], sizes = [8, 128], strides = [1, 1]} : vector<8x512xf32> to vector<8x128xf32>
      %52 = arith.negf %51 : vector<8x128xf32>
      %53 = math.exp %52 : vector<8x128xf32>
      %cst_31 = arith.constant 1.000000e+00 : f32
      %54 = vector.broadcast %cst_31 : f32 to vector<8x128xf32>
      %55 = arith.addf %54, %53 : vector<8x128xf32>
      %56 = arith.divf %54, %55 : vector<8x128xf32>
      %57 = vector.extract_strided_slice %44 {offsets = [0, 256], sizes = [8, 128], strides = [1, 1]} : vector<8x512xf32> to vector<8x128xf32>
      %58 = math.tanh %57 : vector<8x128xf32>
      %59 = vector.extract_strided_slice %44 {offsets = [0, 384], sizes = [8, 128], strides = [1, 1]} : vector<8x512xf32> to vector<8x128xf32>
      %60 = arith.negf %59 : vector<8x128xf32>
      %61 = math.exp %60 : vector<8x128xf32>
      %cst_32 = arith.constant 1.000000e+00 : f32
      %62 = vector.broadcast %cst_32 : f32 to vector<8x128xf32>
      %63 = arith.addf %62, %61 : vector<8x128xf32>
      %64 = arith.divf %62, %63 : vector<8x128xf32>
      %65 = arith.mulf %56, %37 : vector<8x128xf32>
      %66 = arith.mulf %50, %58 : vector<8x128xf32>
      %67 = arith.addf %65, %66 : vector<8x128xf32>
      %68 = math.tanh %67 : vector<8x128xf32>
      %69 = arith.mulf %64, %68 : vector<8x128xf32>
      %70 = arith.truncf %69 : vector<8x128xf32> to vector<8x128xbf16>
      %c1 = arith.constant 1 : index
      %c0_33 = arith.constant 0 : index
      %c0_34 = arith.constant 0 : index
      %71 = vector.load %arg12[%c1, %c0_33, %c0_34] : memref<2x8x128xf32, #tpu.memory_space<vmem>>, vector<1x8x128xf32>
      %72 = vector.shape_cast %71 : vector<1x8x128xf32> to vector<8x128xf32>
      %c1_35 = arith.constant 1 : index
      %c0_36 = arith.constant 0 : index
      %c0_37 = arith.constant 0 : index
      %73 = vector.load %arg13[%c1_35, %c0_36, %c0_37] : memref<2x8x128xf32, #tpu.memory_space<vmem>>, vector<1x8x128xf32>
      %74 = vector.shape_cast %73 : vector<1x8x128xf32> to vector<8x128xf32>
      %75 = arith.truncf %72 : vector<8x128xf32> to vector<8x128xbf16>
      %76 = tpu.concatenate %70, %75 in 1 : vector<8x128xbf16>, vector<8x128xbf16> -> vector<8x256xbf16>
      %c0_38 = arith.constant 0 : index
      %c0_39 = arith.constant 0 : index
      %77 = vector.load %arg6[%c0_38, %c0_39] : memref<256x512xbf16, #tpu.memory_space<vmem>>, vector<256x512xbf16>
      %cst_40 = arith.constant dense<0.000000e+00> : vector<8x512xf32>
      %78 = tpu.matmul %76, %77, %cst_40 {dimension_numbers = #tpu.dot_dimension_numbers<[1], [0], [0], [1], [0, 0, 1, 1], [], []>} : vector<8x256xbf16>, vector<256x512xbf16>, vector<8x512xf32> -> vector<8x512xf32>
      %c0_41 = arith.constant 0 : index
      %c0_42 = arith.constant 0 : index
      %79 = vector.load %arg7[%c0_41, %c0_42] : memref<1x512xf32, #tpu.memory_space<vmem>>, vector<1x512xf32>
      %80 = vector.broadcast %79 : vector<1x512xf32> to vector<8x512xf32>
      %81 = arith.addf %78, %80 : vector<8x512xf32>
      %82 = vector.extract_strided_slice %81 {offsets = [0, 0], sizes = [8, 128], strides = [1, 1]} : vector<8x512xf32> to vector<8x128xf32>
      %83 = arith.negf %82 : vector<8x128xf32>
      %84 = math.exp %83 : vector<8x128xf32>
      %cst_43 = arith.constant 1.000000e+00 : f32
      %85 = vector.broadcast %cst_43 : f32 to vector<8x128xf32>
      %86 = arith.addf %85, %84 : vector<8x128xf32>
      %87 = arith.divf %85, %86 : vector<8x128xf32>
      %88 = vector.extract_strided_slice %81 {offsets = [0, 128], sizes = [8, 128], strides = [1, 1]} : vector<8x512xf32> to vector<8x128xf32>
      %89 = arith.negf %88 : vector<8x128xf32>
      %90 = math.exp %89 : vector<8x128xf32>
      %cst_44 = arith.constant 1.000000e+00 : f32
      %91 = vector.broadcast %cst_44 : f32 to vector<8x128xf32>
      %92 = arith.addf %91, %90 : vector<8x128xf32>
      %93 = arith.divf %91, %92 : vector<8x128xf32>
      %94 = vector.extract_strided_slice %81 {offsets = [0, 256], sizes = [8, 128], strides = [1, 1]} : vector<8x512xf32> to vector<8x128xf32>
      %95 = math.tanh %94 : vector<8x128xf32>
      %96 = vector.extract_strided_slice %81 {offsets = [0, 384], sizes = [8, 128], strides = [1, 1]} : vector<8x512xf32> to vector<8x128xf32>
      %97 = arith.negf %96 : vector<8x128xf32>
      %98 = math.exp %97 : vector<8x128xf32>
      %cst_45 = arith.constant 1.000000e+00 : f32
      %99 = vector.broadcast %cst_45 : f32 to vector<8x128xf32>
      %100 = arith.addf %99, %98 : vector<8x128xf32>
      %101 = arith.divf %99, %100 : vector<8x128xf32>
      %102 = arith.mulf %93, %74 : vector<8x128xf32>
      %103 = arith.mulf %87, %95 : vector<8x128xf32>
      %104 = arith.addf %102, %103 : vector<8x128xf32>
      %105 = math.tanh %104 : vector<8x128xf32>
      %106 = arith.mulf %101, %105 : vector<8x128xf32>
      %c0_46 = arith.constant 0 : index
      %c0_47 = arith.constant 0 : index
      %c0_48 = arith.constant 0 : index
      %107 = vector.load %arg12[%c0_46, %c0_47, %c0_48] : memref<2x8x128xf32, #tpu.memory_space<vmem>>, vector<1x8x128xf32>
      %108 = vector.shape_cast %107 : vector<1x8x128xf32> to vector<8x128xf32>
      %109 = vector.shape_cast %69 : vector<8x128xf32> to vector<1x8x128xf32>
      tpu.vector_store %arg12[%c0_46, %c0_47, %c0_48], %109 {strides = array<i32>} : memref<2x8x128xf32, #tpu.memory_space<vmem>>, vector<1x8x128xf32>,
      %c0_49 = arith.constant 0 : index
      %c0_50 = arith.constant 0 : index
      %c0_51 = arith.constant 0 : index
      %110 = vector.load %arg13[%c0_49, %c0_50, %c0_51] : memref<2x8x128xf32, #tpu.memory_space<vmem>>, vector<1x8x128xf32>
      %111 = vector.shape_cast %110 : vector<1x8x128xf32> to vector<8x128xf32>
      %112 = vector.shape_cast %67 : vector<8x128xf32> to vector<1x8x128xf32>
      tpu.vector_store %arg13[%c0_49, %c0_50, %c0_51], %112 {strides = array<i32>} : memref<2x8x128xf32, #tpu.memory_space<vmem>>, vector<1x8x128xf32>,
      %c1_52 = arith.constant 1 : index
      %c0_53 = arith.constant 0 : index
      %c0_54 = arith.constant 0 : index
      %113 = vector.load %arg12[%c1_52, %c0_53, %c0_54] : memref<2x8x128xf32, #tpu.memory_space<vmem>>, vector<1x8x128xf32>
      %114 = vector.shape_cast %113 : vector<1x8x128xf32> to vector<8x128xf32>
      %115 = vector.shape_cast %106 : vector<8x128xf32> to vector<1x8x128xf32>
      tpu.vector_store %arg12[%c1_52, %c0_53, %c0_54], %115 {strides = array<i32>} : memref<2x8x128xf32, #tpu.memory_space<vmem>>, vector<1x8x128xf32>,
      %c1_55 = arith.constant 1 : index
      %c0_56 = arith.constant 0 : index
      %c0_57 = arith.constant 0 : index
      %116 = vector.load %arg13[%c1_55, %c0_56, %c0_57] : memref<2x8x128xf32, #tpu.memory_space<vmem>>, vector<1x8x128xf32>
      %117 = vector.shape_cast %116 : vector<1x8x128xf32> to vector<8x128xf32>
      %118 = vector.shape_cast %104 : vector<8x128xf32> to vector<1x8x128xf32>
      tpu.vector_store %arg13[%c1_55, %c0_56, %c0_57], %118 {strides = array<i32>} : memref<2x8x128xf32, #tpu.memory_space<vmem>>, vector<1x8x128xf32>,
      %119 = arith.truncf %106 : vector<8x128xf32> to vector<8x128xbf16>
      %c0_58 = arith.constant 0 : index
      %c0_59 = arith.constant 0 : index
      %120 = vector.load %arg8[%c0_58, %c0_59] : memref<128x384xbf16, #tpu.memory_space<vmem>>, vector<128x384xbf16>
      %cst_60 = arith.constant dense<0.000000e+00> : vector<8x384xf32>
      %121 = tpu.matmul %119, %120, %cst_60 {dimension_numbers = #tpu.dot_dimension_numbers<[1], [0], [0], [1], [0, 0, 1, 1], [], []>} : vector<8x128xbf16>, vector<128x384xbf16>, vector<8x384xf32> -> vector<8x384xf32>
      %c0_61 = arith.constant 0 : index
      %c0_62 = arith.constant 0 : index
      %122 = vector.load %arg9[%c0_61, %c0_62] : memref<1x384xf32, #tpu.memory_space<vmem>>, vector<1x384xf32>
      %123 = vector.broadcast %122 : vector<1x384xf32> to vector<8x384xf32>
      %124 = arith.addf %121, %123 : vector<8x384xf32>
      %c2 = arith.constant 2 : index
      %c0_63 = arith.constant 0 : index
      %c0_64 = arith.constant 0 : index
      %125 = vector.load %arg11[%c2, %c0_63, %c0_64] : memref<4x8x384xf32, #tpu.memory_space<vmem>>, vector<1x8x384xf32>
      %126 = vector.shape_cast %125 : vector<1x8x384xf32> to vector<8x384xf32>
      %127 = vector.shape_cast %124 : vector<8x384xf32> to vector<1x8x384xf32>
      tpu.vector_store %arg11[%c2, %c0_63, %c0_64], %127 {strides = array<i32>} : memref<4x8x384xf32, #tpu.memory_space<vmem>>, vector<1x8x384xf32>,
      %c322_i32 = arith.constant 322 : i32
      %128 = vector.broadcast %c322_i32 : i32 to vector<8x384xi32>
      %129 = arith.cmpi slt, %0, %128 : vector<8x384xi32>
      %cst_65 = arith.constant 0xFF800000 : f32
      %130 = vector.broadcast %cst_65 : f32 to vector<8x384xf32>
      %131 = arith.select %129, %124, %130 : vector<8x384xi1>, vector<8x384xf32>
      %cst_66 = arith.constant dense<0xFF800000> : vector<8xf32>
      %132 = vector.multi_reduction <maximumf>, %131, %cst_66 [1] : vector<8x384xf32> to vector<8xf32>
      %133 = vector.shape_cast %132 : vector<8xf32> to vector<8x1xf32>
      %134 = vector.broadcast %133 : vector<8x1xf32> to vector<8x384xf32>
      %135 = arith.cmpf oeq, %131, %134 : vector<8x384xf32>
      %c384_i32 = arith.constant 384 : i32
      %136 = vector.broadcast %c384_i32 : i32 to vector<8x384xi32>
      %137 = arith.select %135, %0, %136 : vector<8x384xi1>, vector<8x384xi32>
      %cst_67 = arith.constant dense<2147483647> : vector<8xi32>
      %138 = vector.multi_reduction <minsi>, %137, %cst_67 [1] : vector<8x384xi32> to vector<8xi32>
      %139 = vector.shape_cast %138 : vector<8xi32> to vector<8x1xi32>
      %140 = vector.broadcast %139 : vector<8x1xi32> to vector<8x384xi32>
      %141 = arith.cmpi eq, %0, %140 : vector<8x384xi32>
      %142 = arith.extui %141 : vector<8x384xi1> to vector<8x384xi32>
      %143 = arith.sitofp %142 : vector<8x384xi32> to vector<8x384xf32>
      %144 = arith.truncf %143 : vector<8x384xf32> to vector<8x384xbf16>
      %c0_68 = arith.constant 0 : index
      %c0_69 = arith.constant 0 : index
      %145 = vector.load %arg10[%c0_68, %c0_69] : memref<384x128xbf16, #tpu.memory_space<vmem>>, vector<384x128xbf16>
      %cst_70 = arith.constant dense<0.000000e+00> : vector<8x128xf32>
      %146 = tpu.matmul %144, %145, %cst_70 {dimension_numbers = #tpu.dot_dimension_numbers<[1], [0], [0], [1], [0, 0, 1, 1], [], []>} : vector<8x384xbf16>, vector<384x128xbf16>, vector<8x128xf32> -> vector<8x128xf32>
      %147 = arith.truncf %146 : vector<8x128xf32> to vector<8x128xbf16>
      %148 = arith.index_cast %18 : i32 to index
      %149 = memref.load %arg1[%148] : memref<8xi32, #tpu.memory_space<smem>>
      %c1_i32_71 = arith.constant 1 : i32
      %150 = arith.cmpi eq, %149, %c1_i32_71 : i32
      %c2_72 = arith.constant 2 : index
      %c0_73 = arith.constant 0 : index
      %c0_74 = arith.constant 0 : index
      %151 = vector.load %arg3[%c2_72, %c0_73, %c0_74] : memref<4x8x128xbf16, #tpu.memory_space<vmem>>, vector<1x8x128xbf16>
      %152 = vector.shape_cast %151 : vector<1x8x128xbf16> to vector<8x128xbf16>
      %153 = arith.select %150, %152, %147 : vector<8x128xbf16>
      %c0_75 = arith.constant 0 : index
      %c0_76 = arith.constant 0 : index
      %154 = vector.load %arg14[%c0_75, %c0_76] : memref<8x128xbf16, #tpu.memory_space<vmem>>, vector<8x128xbf16>
      tpu.vector_store %arg14[%c0_75, %c0_76], %153 {strides = array<i32>} : memref<8x128xbf16, #tpu.memory_space<vmem>>, vector<8x128xbf16>,
    } else {
    }
    %c4_i32_14 = arith.constant 4 : i32
    %25 = arith.muli %arg0, %c4_i32_14 : i32
    %c3_i32 = arith.constant 3 : i32
    %26 = arith.addi %25, %c3_i32 : i32
    %c0_i32_15 = arith.constant 0 : i32
    %27 = arith.cmpi eq, %26, %c0_i32_15 : i32
    %28 = arith.extui %27 : i1 to i32
    %c0_i32_16 = arith.constant 0 : i32
    %29 = arith.cmpi ne, %28, %c0_i32_16 : i32
    scf.if %29 {
      %c0 = arith.constant 0 : index
      %c0_19 = arith.constant 0 : index
      %c0_20 = arith.constant 0 : index
      %33 = vector.load %arg2[%c0, %c0_19, %c0_20] : memref<2x8x128xf32, #tpu.memory_space<vmem>>, vector<2x8x128xf32>
      %c0_21 = arith.constant 0 : index
      %c0_22 = arith.constant 0 : index
      %c0_23 = arith.constant 0 : index
      %34 = vector.load %arg12[%c0_21, %c0_22, %c0_23] : memref<2x8x128xf32, #tpu.memory_space<vmem>>, vector<2x8x128xf32>
      tpu.vector_store %arg12[%c0_21, %c0_22, %c0_23], %33 {strides = array<i32>} : memref<2x8x128xf32, #tpu.memory_space<vmem>>, vector<2x8x128xf32>,
      %c0_24 = arith.constant 0 : index
      %c0_25 = arith.constant 0 : index
      %c0_26 = arith.constant 0 : index
      %35 = vector.load %arg2[%c0_24, %c0_25, %c0_26] : memref<2x8x128xf32, #tpu.memory_space<vmem>>, vector<2x8x128xf32>
      %c0_27 = arith.constant 0 : index
      %c0_28 = arith.constant 0 : index
      %c0_29 = arith.constant 0 : index
      %36 = vector.load %arg13[%c0_27, %c0_28, %c0_29] : memref<2x8x128xf32, #tpu.memory_space<vmem>>, vector<2x8x128xf32>
      tpu.vector_store %arg13[%c0_27, %c0_28, %c0_29], %35 {strides = array<i32>} : memref<2x8x128xf32, #tpu.memory_space<vmem>>, vector<2x8x128xf32>,
      %c0_30 = arith.constant 0 : index
      %c0_31 = arith.constant 0 : index
      %c0_32 = arith.constant 0 : index
      %37 = vector.load %arg3[%c0_30, %c0_31, %c0_32] : memref<4x8x128xbf16, #tpu.memory_space<vmem>>, vector<1x8x128xbf16>
      %38 = vector.shape_cast %37 : vector<1x8x128xbf16> to vector<8x128xbf16>
      %c0_33 = arith.constant 0 : index
      %c0_34 = arith.constant 0 : index
      %39 = vector.load %arg14[%c0_33, %c0_34] : memref<8x128xbf16, #tpu.memory_space<vmem>>, vector<8x128xbf16>
      tpu.vector_store %arg14[%c0_33, %c0_34], %38 {strides = array<i32>} : memref<8x128xbf16, #tpu.memory_space<vmem>>, vector<8x128xbf16>,
      %c1_i32_35 = arith.constant 1 : i32
      %40 = vector.broadcast %c1_i32_35 : i32 to vector<8x384xi32>
      %41 = arith.cmpi eq, %0, %40 : vector<8x384xi32>
      %42 = arith.extui %41 : vector<8x384xi1> to vector<8x384xi32>
      %43 = arith.sitofp %42 : vector<8x384xi32> to vector<8x384xf32>
      %c3 = arith.constant 3 : index
      %c0_36 = arith.constant 0 : index
      %c0_37 = arith.constant 0 : index
      %44 = vector.load %arg11[%c3, %c0_36, %c0_37] : memref<4x8x384xf32, #tpu.memory_space<vmem>>, vector<1x8x384xf32>
      %45 = vector.shape_cast %44 : vector<1x8x384xf32> to vector<8x384xf32>
      %46 = vector.shape_cast %43 : vector<8x384xf32> to vector<1x8x384xf32>
      tpu.vector_store %arg11[%c3, %c0_36, %c0_37], %46 {strides = array<i32>} : memref<4x8x384xf32, #tpu.memory_space<vmem>>, vector<1x8x384xf32>,
    } else {
    }
    %c0_i32_17 = arith.constant 0 : i32
    %30 = arith.cmpi sgt, %26, %c0_i32_17 : i32
    %31 = arith.extui %30 : i1 to i32
    %c0_i32_18 = arith.constant 0 : i32
    %32 = arith.cmpi ne, %31, %c0_i32_18 : i32
    scf.if %32 {
      %c0 = arith.constant 0 : index
      %c0_19 = arith.constant 0 : index
      %33 = vector.load %arg14[%c0, %c0_19] : memref<8x128xbf16, #tpu.memory_space<vmem>>, vector<8x128xbf16>
      %c0_20 = arith.constant 0 : index
      %c0_21 = arith.constant 0 : index
      %c0_22 = arith.constant 0 : index
      %34 = vector.load %arg12[%c0_20, %c0_21, %c0_22] : memref<2x8x128xf32, #tpu.memory_space<vmem>>, vector<1x8x128xf32>
      %35 = vector.shape_cast %34 : vector<1x8x128xf32> to vector<8x128xf32>
      %c0_23 = arith.constant 0 : index
      %c0_24 = arith.constant 0 : index
      %c0_25 = arith.constant 0 : index
      %36 = vector.load %arg13[%c0_23, %c0_24, %c0_25] : memref<2x8x128xf32, #tpu.memory_space<vmem>>, vector<1x8x128xf32>
      %37 = vector.shape_cast %36 : vector<1x8x128xf32> to vector<8x128xf32>
      %38 = arith.truncf %35 : vector<8x128xf32> to vector<8x128xbf16>
      %39 = tpu.concatenate %33, %38 in 1 : vector<8x128xbf16>, vector<8x128xbf16> -> vector<8x256xbf16>
      %c0_26 = arith.constant 0 : index
      %c0_27 = arith.constant 0 : index
      %40 = vector.load %arg4[%c0_26, %c0_27] : memref<256x512xbf16, #tpu.memory_space<vmem>>, vector<256x512xbf16>
      %cst = arith.constant dense<0.000000e+00> : vector<8x512xf32>
      %41 = tpu.matmul %39, %40, %cst {dimension_numbers = #tpu.dot_dimension_numbers<[1], [0], [0], [1], [0, 0, 1, 1], [], []>} : vector<8x256xbf16>, vector<256x512xbf16>, vector<8x512xf32> -> vector<8x512xf32>
      %c0_28 = arith.constant 0 : index
      %c0_29 = arith.constant 0 : index
      %42 = vector.load %arg5[%c0_28, %c0_29] : memref<1x512xf32, #tpu.memory_space<vmem>>, vector<1x512xf32>
      %43 = vector.broadcast %42 : vector<1x512xf32> to vector<8x512xf32>
      %44 = arith.addf %41, %43 : vector<8x512xf32>
      %45 = vector.extract_strided_slice %44 {offsets = [0, 0], sizes = [8, 128], strides = [1, 1]} : vector<8x512xf32> to vector<8x128xf32>
      %46 = arith.negf %45 : vector<8x128xf32>
      %47 = math.exp %46 : vector<8x128xf32>
      %cst_30 = arith.constant 1.000000e+00 : f32
      %48 = vector.broadcast %cst_30 : f32 to vector<8x128xf32>
      %49 = arith.addf %48, %47 : vector<8x128xf32>
      %50 = arith.divf %48, %49 : vector<8x128xf32>
      %51 = vector.extract_strided_slice %44 {offsets = [0, 128], sizes = [8, 128], strides = [1, 1]} : vector<8x512xf32> to vector<8x128xf32>
      %52 = arith.negf %51 : vector<8x128xf32>
      %53 = math.exp %52 : vector<8x128xf32>
      %cst_31 = arith.constant 1.000000e+00 : f32
      %54 = vector.broadcast %cst_31 : f32 to vector<8x128xf32>
      %55 = arith.addf %54, %53 : vector<8x128xf32>
      %56 = arith.divf %54, %55 : vector<8x128xf32>
      %57 = vector.extract_strided_slice %44 {offsets = [0, 256], sizes = [8, 128], strides = [1, 1]} : vector<8x512xf32> to vector<8x128xf32>
      %58 = math.tanh %57 : vector<8x128xf32>
      %59 = vector.extract_strided_slice %44 {offsets = [0, 384], sizes = [8, 128], strides = [1, 1]} : vector<8x512xf32> to vector<8x128xf32>
      %60 = arith.negf %59 : vector<8x128xf32>
      %61 = math.exp %60 : vector<8x128xf32>
      %cst_32 = arith.constant 1.000000e+00 : f32
      %62 = vector.broadcast %cst_32 : f32 to vector<8x128xf32>
      %63 = arith.addf %62, %61 : vector<8x128xf32>
      %64 = arith.divf %62, %63 : vector<8x128xf32>
      %65 = arith.mulf %56, %37 : vector<8x128xf32>
      %66 = arith.mulf %50, %58 : vector<8x128xf32>
      %67 = arith.addf %65, %66 : vector<8x128xf32>
      %68 = math.tanh %67 : vector<8x128xf32>
      %69 = arith.mulf %64, %68 : vector<8x128xf32>
      %70 = arith.truncf %69 : vector<8x128xf32> to vector<8x128xbf16>
      %c1 = arith.constant 1 : index
      %c0_33 = arith.constant 0 : index
      %c0_34 = arith.constant 0 : index
      %71 = vector.load %arg12[%c1, %c0_33, %c0_34] : memref<2x8x128xf32, #tpu.memory_space<vmem>>, vector<1x8x128xf32>
      %72 = vector.shape_cast %71 : vector<1x8x128xf32> to vector<8x128xf32>
      %c1_35 = arith.constant 1 : index
      %c0_36 = arith.constant 0 : index
      %c0_37 = arith.constant 0 : index
      %73 = vector.load %arg13[%c1_35, %c0_36, %c0_37] : memref<2x8x128xf32, #tpu.memory_space<vmem>>, vector<1x8x128xf32>
      %74 = vector.shape_cast %73 : vector<1x8x128xf32> to vector<8x128xf32>
      %75 = arith.truncf %72 : vector<8x128xf32> to vector<8x128xbf16>
      %76 = tpu.concatenate %70, %75 in 1 : vector<8x128xbf16>, vector<8x128xbf16> -> vector<8x256xbf16>
      %c0_38 = arith.constant 0 : index
      %c0_39 = arith.constant 0 : index
      %77 = vector.load %arg6[%c0_38, %c0_39] : memref<256x512xbf16, #tpu.memory_space<vmem>>, vector<256x512xbf16>
      %cst_40 = arith.constant dense<0.000000e+00> : vector<8x512xf32>
      %78 = tpu.matmul %76, %77, %cst_40 {dimension_numbers = #tpu.dot_dimension_numbers<[1], [0], [0], [1], [0, 0, 1, 1], [], []>} : vector<8x256xbf16>, vector<256x512xbf16>, vector<8x512xf32> -> vector<8x512xf32>
      %c0_41 = arith.constant 0 : index
      %c0_42 = arith.constant 0 : index
      %79 = vector.load %arg7[%c0_41, %c0_42] : memref<1x512xf32, #tpu.memory_space<vmem>>, vector<1x512xf32>
      %80 = vector.broadcast %79 : vector<1x512xf32> to vector<8x512xf32>
      %81 = arith.addf %78, %80 : vector<8x512xf32>
      %82 = vector.extract_strided_slice %81 {offsets = [0, 0], sizes = [8, 128], strides = [1, 1]} : vector<8x512xf32> to vector<8x128xf32>
      %83 = arith.negf %82 : vector<8x128xf32>
      %84 = math.exp %83 : vector<8x128xf32>
      %cst_43 = arith.constant 1.000000e+00 : f32
      %85 = vector.broadcast %cst_43 : f32 to vector<8x128xf32>
      %86 = arith.addf %85, %84 : vector<8x128xf32>
      %87 = arith.divf %85, %86 : vector<8x128xf32>
      %88 = vector.extract_strided_slice %81 {offsets = [0, 128], sizes = [8, 128], strides = [1, 1]} : vector<8x512xf32> to vector<8x128xf32>
      %89 = arith.negf %88 : vector<8x128xf32>
      %90 = math.exp %89 : vector<8x128xf32>
      %cst_44 = arith.constant 1.000000e+00 : f32
      %91 = vector.broadcast %cst_44 : f32 to vector<8x128xf32>
      %92 = arith.addf %91, %90 : vector<8x128xf32>
      %93 = arith.divf %91, %92 : vector<8x128xf32>
      %94 = vector.extract_strided_slice %81 {offsets = [0, 256], sizes = [8, 128], strides = [1, 1]} : vector<8x512xf32> to vector<8x128xf32>
      %95 = math.tanh %94 : vector<8x128xf32>
      %96 = vector.extract_strided_slice %81 {offsets = [0, 384], sizes = [8, 128], strides = [1, 1]} : vector<8x512xf32> to vector<8x128xf32>
      %97 = arith.negf %96 : vector<8x128xf32>
      %98 = math.exp %97 : vector<8x128xf32>
      %cst_45 = arith.constant 1.000000e+00 : f32
      %99 = vector.broadcast %cst_45 : f32 to vector<8x128xf32>
      %100 = arith.addf %99, %98 : vector<8x128xf32>
      %101 = arith.divf %99, %100 : vector<8x128xf32>
      %102 = arith.mulf %93, %74 : vector<8x128xf32>
      %103 = arith.mulf %87, %95 : vector<8x128xf32>
      %104 = arith.addf %102, %103 : vector<8x128xf32>
      %105 = math.tanh %104 : vector<8x128xf32>
      %106 = arith.mulf %101, %105 : vector<8x128xf32>
      %c0_46 = arith.constant 0 : index
      %c0_47 = arith.constant 0 : index
      %c0_48 = arith.constant 0 : index
      %107 = vector.load %arg12[%c0_46, %c0_47, %c0_48] : memref<2x8x128xf32, #tpu.memory_space<vmem>>, vector<1x8x128xf32>
      %108 = vector.shape_cast %107 : vector<1x8x128xf32> to vector<8x128xf32>
      %109 = vector.shape_cast %69 : vector<8x128xf32> to vector<1x8x128xf32>
      tpu.vector_store %arg12[%c0_46, %c0_47, %c0_48], %109 {strides = array<i32>} : memref<2x8x128xf32, #tpu.memory_space<vmem>>, vector<1x8x128xf32>,
      %c0_49 = arith.constant 0 : index
      %c0_50 = arith.constant 0 : index
      %c0_51 = arith.constant 0 : index
      %110 = vector.load %arg13[%c0_49, %c0_50, %c0_51] : memref<2x8x128xf32, #tpu.memory_space<vmem>>, vector<1x8x128xf32>
      %111 = vector.shape_cast %110 : vector<1x8x128xf32> to vector<8x128xf32>
      %112 = vector.shape_cast %67 : vector<8x128xf32> to vector<1x8x128xf32>
      tpu.vector_store %arg13[%c0_49, %c0_50, %c0_51], %112 {strides = array<i32>} : memref<2x8x128xf32, #tpu.memory_space<vmem>>, vector<1x8x128xf32>,
      %c1_52 = arith.constant 1 : index
      %c0_53 = arith.constant 0 : index
      %c0_54 = arith.constant 0 : index
      %113 = vector.load %arg12[%c1_52, %c0_53, %c0_54] : memref<2x8x128xf32, #tpu.memory_space<vmem>>, vector<1x8x128xf32>
      %114 = vector.shape_cast %113 : vector<1x8x128xf32> to vector<8x128xf32>
      %115 = vector.shape_cast %106 : vector<8x128xf32> to vector<1x8x128xf32>
      tpu.vector_store %arg12[%c1_52, %c0_53, %c0_54], %115 {strides = array<i32>} : memref<2x8x128xf32, #tpu.memory_space<vmem>>, vector<1x8x128xf32>,
      %c1_55 = arith.constant 1 : index
      %c0_56 = arith.constant 0 : index
      %c0_57 = arith.constant 0 : index
      %116 = vector.load %arg13[%c1_55, %c0_56, %c0_57] : memref<2x8x128xf32, #tpu.memory_space<vmem>>, vector<1x8x128xf32>
      %117 = vector.shape_cast %116 : vector<1x8x128xf32> to vector<8x128xf32>
      %118 = vector.shape_cast %104 : vector<8x128xf32> to vector<1x8x128xf32>
      tpu.vector_store %arg13[%c1_55, %c0_56, %c0_57], %118 {strides = array<i32>} : memref<2x8x128xf32, #tpu.memory_space<vmem>>, vector<1x8x128xf32>,
      %119 = arith.truncf %106 : vector<8x128xf32> to vector<8x128xbf16>
      %c0_58 = arith.constant 0 : index
      %c0_59 = arith.constant 0 : index
      %120 = vector.load %arg8[%c0_58, %c0_59] : memref<128x384xbf16, #tpu.memory_space<vmem>>, vector<128x384xbf16>
      %cst_60 = arith.constant dense<0.000000e+00> : vector<8x384xf32>
      %121 = tpu.matmul %119, %120, %cst_60 {dimension_numbers = #tpu.dot_dimension_numbers<[1], [0], [0], [1], [0, 0, 1, 1], [], []>} : vector<8x128xbf16>, vector<128x384xbf16>, vector<8x384xf32> -> vector<8x384xf32>
      %c0_61 = arith.constant 0 : index
      %c0_62 = arith.constant 0 : index
      %122 = vector.load %arg9[%c0_61, %c0_62] : memref<1x384xf32, #tpu.memory_space<vmem>>, vector<1x384xf32>
      %123 = vector.broadcast %122 : vector<1x384xf32> to vector<8x384xf32>
      %124 = arith.addf %121, %123 : vector<8x384xf32>
      %c3 = arith.constant 3 : index
      %c0_63 = arith.constant 0 : index
      %c0_64 = arith.constant 0 : index
      %125 = vector.load %arg11[%c3, %c0_63, %c0_64] : memref<4x8x384xf32, #tpu.memory_space<vmem>>, vector<1x8x384xf32>
      %126 = vector.shape_cast %125 : vector<1x8x384xf32> to vector<8x384xf32>
      %127 = vector.shape_cast %124 : vector<8x384xf32> to vector<1x8x384xf32>
      tpu.vector_store %arg11[%c3, %c0_63, %c0_64], %127 {strides = array<i32>} : memref<4x8x384xf32, #tpu.memory_space<vmem>>, vector<1x8x384xf32>,
      %c322_i32 = arith.constant 322 : i32
      %128 = vector.broadcast %c322_i32 : i32 to vector<8x384xi32>
      %129 = arith.cmpi slt, %0, %128 : vector<8x384xi32>
      %cst_65 = arith.constant 0xFF800000 : f32
      %130 = vector.broadcast %cst_65 : f32 to vector<8x384xf32>
      %131 = arith.select %129, %124, %130 : vector<8x384xi1>, vector<8x384xf32>
      %cst_66 = arith.constant dense<0xFF800000> : vector<8xf32>
      %132 = vector.multi_reduction <maximumf>, %131, %cst_66 [1] : vector<8x384xf32> to vector<8xf32>
      %133 = vector.shape_cast %132 : vector<8xf32> to vector<8x1xf32>
      %134 = vector.broadcast %133 : vector<8x1xf32> to vector<8x384xf32>
      %135 = arith.cmpf oeq, %131, %134 : vector<8x384xf32>
      %c384_i32 = arith.constant 384 : i32
      %136 = vector.broadcast %c384_i32 : i32 to vector<8x384xi32>
      %137 = arith.select %135, %0, %136 : vector<8x384xi1>, vector<8x384xi32>
      %cst_67 = arith.constant dense<2147483647> : vector<8xi32>
      %138 = vector.multi_reduction <minsi>, %137, %cst_67 [1] : vector<8x384xi32> to vector<8xi32>
      %139 = vector.shape_cast %138 : vector<8xi32> to vector<8x1xi32>
      %140 = vector.broadcast %139 : vector<8x1xi32> to vector<8x384xi32>
      %141 = arith.cmpi eq, %0, %140 : vector<8x384xi32>
      %142 = arith.extui %141 : vector<8x384xi1> to vector<8x384xi32>
      %143 = arith.sitofp %142 : vector<8x384xi32> to vector<8x384xf32>
      %144 = arith.truncf %143 : vector<8x384xf32> to vector<8x384xbf16>
      %c0_68 = arith.constant 0 : index
      %c0_69 = arith.constant 0 : index
      %145 = vector.load %arg10[%c0_68, %c0_69] : memref<384x128xbf16, #tpu.memory_space<vmem>>, vector<384x128xbf16>
      %cst_70 = arith.constant dense<0.000000e+00> : vector<8x128xf32>
      %146 = tpu.matmul %144, %145, %cst_70 {dimension_numbers = #tpu.dot_dimension_numbers<[1], [0], [0], [1], [0, 0, 1, 1], [], []>} : vector<8x384xbf16>, vector<384x128xbf16>, vector<8x128xf32> -> vector<8x128xf32>
      %147 = arith.truncf %146 : vector<8x128xf32> to vector<8x128xbf16>
      %148 = arith.index_cast %26 : i32 to index
      %149 = memref.load %arg1[%148] : memref<8xi32, #tpu.memory_space<smem>>
      %c1_i32_71 = arith.constant 1 : i32
      %150 = arith.cmpi eq, %149, %c1_i32_71 : i32
      %c3_72 = arith.constant 3 : index
      %c0_73 = arith.constant 0 : index
      %c0_74 = arith.constant 0 : index
      %151 = vector.load %arg3[%c3_72, %c0_73, %c0_74] : memref<4x8x128xbf16, #tpu.memory_space<vmem>>, vector<1x8x128xbf16>
      %152 = vector.shape_cast %151 : vector<1x8x128xbf16> to vector<8x128xbf16>
      %153 = arith.select %150, %152, %147 : vector<8x128xbf16>
      %c0_75 = arith.constant 0 : index
      %c0_76 = arith.constant 0 : index
      %154 = vector.load %arg14[%c0_75, %c0_76] : memref<8x128xbf16, #tpu.memory_space<vmem>>, vector<8x128xbf16>
      tpu.vector_store %arg14[%c0_75, %c0_76], %153 {strides = array<i32>} : memref<8x128xbf16, #tpu.memory_space<vmem>>, vector<8x128xbf16>,
    } else {
    }
    return
  }
  func.func @transform_0(%arg0: i32, %arg1: memref<8xi32, #tpu.memory_space<smem>>) -> (i32, i32, i32) {
    %c0_i32 = arith.constant 0 : i32
    %c0_i32_0 = arith.constant 0 : i32
    %c0_i32_1 = arith.constant 0 : i32
    %c0_i32_2 = arith.constant 0 : i32
    return %c0_i32, %c0_i32_0, %c0_i32_1 : i32, i32, i32
  }
  func.func @transform_1(%arg0: i32, %arg1: memref<8xi32, #tpu.memory_space<smem>>) -> (i32, i32, i32) {
    %c0_i32 = arith.constant 0 : i32
    %c0_i32_0 = arith.constant 0 : i32
    %c0_i32_1 = arith.constant 0 : i32
    return %arg0, %c0_i32, %c0_i32_0 : i32, i32, i32
  }
  func.func @transform_2(%arg0: i32, %arg1: memref<8xi32, #tpu.memory_space<smem>>) -> (i32, i32) {
    %c0_i32 = arith.constant 0 : i32
    %c0_i32_0 = arith.constant 0 : i32
    %c0_i32_1 = arith.constant 0 : i32
    return %c0_i32, %c0_i32_0 : i32, i32
  }
  func.func @transform_3(%arg0: i32, %arg1: memref<8xi32, #tpu.memory_space<smem>>) -> (i32, i32) {
    %c0_i32 = arith.constant 0 : i32
    %c0_i32_0 = arith.constant 0 : i32
    %c0_i32_1 = arith.constant 0 : i32
    return %c0_i32, %c0_i32_0 : i32, i32
  }
  func.func @transform_4(%arg0: i32, %arg1: memref<8xi32, #tpu.memory_space<smem>>) -> (i32, i32) {
    %c0_i32 = arith.constant 0 : i32
    %c0_i32_0 = arith.constant 0 : i32
    %c0_i32_1 = arith.constant 0 : i32
    return %c0_i32, %c0_i32_0 : i32, i32
  }
  func.func @transform_5(%arg0: i32, %arg1: memref<8xi32, #tpu.memory_space<smem>>) -> (i32, i32) {
    %c0_i32 = arith.constant 0 : i32
    %c0_i32_0 = arith.constant 0 : i32
    %c0_i32_1 = arith.constant 0 : i32
    return %c0_i32, %c0_i32_0 : i32, i32
  }
  func.func @transform_6(%arg0: i32, %arg1: memref<8xi32, #tpu.memory_space<smem>>) -> (i32, i32) {
    %c0_i32 = arith.constant 0 : i32
    %c0_i32_0 = arith.constant 0 : i32
    %c0_i32_1 = arith.constant 0 : i32
    return %c0_i32, %c0_i32_0 : i32, i32
  }
  func.func @transform_7(%arg0: i32, %arg1: memref<8xi32, #tpu.memory_space<smem>>) -> (i32, i32) {
    %c0_i32 = arith.constant 0 : i32
    %c0_i32_0 = arith.constant 0 : i32
    %c0_i32_1 = arith.constant 0 : i32
    return %c0_i32, %c0_i32_0 : i32, i32
  }
  func.func @transform_8(%arg0: i32, %arg1: memref<8xi32, #tpu.memory_space<smem>>) -> (i32, i32) {
    %c0_i32 = arith.constant 0 : i32
    %c0_i32_0 = arith.constant 0 : i32
    %c0_i32_1 = arith.constant 0 : i32
    return %c0_i32, %c0_i32_0 : i32, i32
  }
  func.func @transform_9(%arg0: i32, %arg1: memref<8xi32, #tpu.memory_space<smem>>) -> (i32, i32, i32) {
    %c0_i32 = arith.constant 0 : i32
    %c0_i32_0 = arith.constant 0 : i32
    %c0_i32_1 = arith.constant 0 : i32
    return %arg0, %c0_i32, %c0_i32_0 : i32, i32, i32
  }
}

</mosaic_0001>

<bundles_post_ra>
// kernel: tpu_custom_call.1
= control target key start
LH: loop header
LB: loop body
LE: loop exit
PB: predicated region body
PF: predicated region fallthrough
CT: control target
= control target key end

     0   :  { %s10611_s0 = inlined_call_operand.hbm [shape: s32[8], index: 0, kind: input, shape index: {}]   ;;  %s10612_s1 = inlined_call_operand.hbm [shape: f32[2,8,128], index: 1, kind: input, shape index: {}]   ;;  %s10613_s2 = inlined_call_operand.hbm [shape: bf16[8,8,128], index: 2, kind: input, shape index: {}]   ;;  %s10614_s3 = inlined_call_operand.hbm [shape: bf16[256,512], index: 3, kind: input, shape index: {}]   ;;  %s10615_s4 = inlined_call_operand.vmem [shape: f32[1,512], index: 4, kind: input, shape index: {}]   ;;  %s10616_s5 = inlined_call_operand.hbm [shape: bf16[256,512], index: 5, kind: input, shape index: {}]   ;;  %s10617_s6 = inlined_call_operand.vmem [shape: f32[1,512], index: 6, kind: input, shape index: {}]   ;;  %s10618_s7 = inlined_call_operand.hbm [shape: bf16[128,384], index: 7, kind: input, shape index: {}]   ;;  %s10619_s8 = inlined_call_operand.vmem [shape: f32[1,384], index: 8, kind: input, shape index: {}]   ;;  %s10620_s9 = inlined_call_operand.hbm [shape: bf16[384,128], index: 9, kind: input, shape index: {}]   ;;  %s10621_s10 = inlined_call_operand.hbm [shape: f32[8,8,384], index: 10, kind: output, shape index: {}]  }
   0x1   :  { %10628 = sst [smem:[#allocation28_spill]] %s10621_s10  ;;  %s9607_s15 = scalar_lea.hbm %s10611_s0, 16 }
   0x2   :  { %p9608_p0 = scmp.ne.s32.totalorder %s10611_s0, %s9607_s15  ;;  %p9611_p1 = scmp.lt.u32.totalorder %s9607_s15, %s10611_s0 }
   0x4   :  { %p9613_p2 = pnand %p9611_p1, %p9608_p0 }
   0x6   :  { %9616 = shalt.err (!%p9613_p2)  }
   0x7   :  { %s9873_s20 = smov [#allocation6]  }
   0x8   :  { %16 = dma.hbm_to_smem %s10611_s0, 16, %s9873_s20, [#allocation5] }
   0x9   :  { %9831 = dma.done.wait [#allocation5], 16 }
   0xa   :  { %9832 = vsyncadd [#allocation5], 4294967280 }
   0xb   :  { %18 = sfence }
   0xc   :  { %19 = vsyncpa [#allocation8], 0 }
   0xd   :  { %20 = vsyncpa [#allocation11], 0 }
   0xe   :  { %22 = vsyncpa [#allocation11 + $0x1], 0 }
   0xf   :  { %23 = vsyncpa [#allocation14], 0 }
  0x10   :  { %24 = vsyncpa [#allocation17], 0 }
  0x11   :  { %25 = vsyncpa [#allocation9], 0 }
  0x12   :  { %27 = vsyncpa [#allocation9 + $0x1], 0  ;;  %s9978_s23 = smov 0   ;;  %s9980_s24 = smov 0  }
  0x13   :  { %s9982_s25 = smov 0   ;;  %s9984_s26 = smov 0  }
  0x14 LB: > { %10629 = sst [smem:[#allocation26_spill]] %s9859_s23  ;;  %s9999_s0 = sadd.s32 4294967295, %s9871_s26   ;;  %s9871_s26 = sphi %s9984_s26, %s10657_s26   ;;  %s9867_s25 = sphi %s9982_s25, %s10656_s25   ;;  %s9863_s24 = sphi %s9980_s24, %s10655_s24   ;;  %s9859_s23 = sphi %s9978_s23, %s10654_s23  }
  0x15   : > { %s7215_s27 = sadd.s32 4294967294, %s9871_s26   ;;  %p74_p3 = scmp.ne.s32.totalorder %s9863_s24, %s9859_s23 }
  0x16   : > { %p10622_p4 = scmp.eq.s32.totalorder %s9999_s0, 0  ;;  %p251_p6 = scmp.eq.s32.totalorder %s7215_s27, 1 }
  0x17   : > { %p7216_p8 = scmp.ge.s32.totalorder %s9871_s26, 1  ;;  %p258_p10 = scmp.lt.s32.totalorder %s9871_s26, 3 }
  0x18   : > { %p10008_p7 = por %p10622_p4, %p74_p3  ;;  %p10013_p9 = por %p251_p6, %p74_p3 }
  0x19   : > { %p10018_p11 = pnand %p7216_p8, %p258_p10  ;;  %s9874_s11 = smov [#allocation12]  }
  0x1a   : > { %s10630_s28 = scalar_select %p10008_p7, 1, 0 }
  0x1b   : > { %s10631_s29 = scalar_select %p10013_p9, 1, 0 }
  0x1c   : > { %s10633_s30 = scalar_select %p10018_p11, 1, 0 }
  0x1d   : > { %10632 = sst [smem:[#allocation27_spill]] %s10631_s29  ;;  %s283_s12 = sshll.u32 %s9874_s11, 4  ;;  %s10022_s12 = int_to_ptr.vmem [resolvable:$true] %s283_s12 }
  0x1e   : > { %p8383_p12 = pneg %p10018_p11  ;;  %s9875_s14 = smov [#allocation13]  }
  0x1f   : > { %s299_s15 = sshll.u32 %s9875_s14, 4  ;;  %s9876_s16 = smov [#allocation7]   ;;  %s10033_s15 = int_to_ptr.vmem [resolvable:$true] %s299_s15 }
  0x20   : > { %p10029_p0 = pnand %p8383_p12, %p10622_p4  ;;  %s10035_s17 = sshll.u32 %s9876_s16, 4  ;;  %s271_s17 = int_to_ptr.vmem [resolvable:$true] %s10035_s17 }
  0x21   : > { %s9617_s20 = scalar_lea.hbm %s10614_s3, 8192 }
  0x22   : > { %p9618_p1 = scmp.ne.s32.totalorder %s10614_s3, %s9617_s20  ;;  %p10045_p2 = pneg %p10029_p0 }
  0x23   : > { %p9624_p8 = scmp.lt.u32.totalorder %s9617_s20, %s10614_s3 }
  0x24   : > { %p9620_p3 = pnand %p10045_p2, %p9618_p1 }
  0x26   : > { %p9621_p6 = pneg %p9620_p3 }
  0x28   : > { %p9626_p10 = pnand %p9624_p8, %p9621_p6 }
  0x2a   : > { %9629 = shalt.err (!%p9626_p10)
}
  0x2b   : > { %s9630_s16 = scalar_lea.vmem %s10022_s12, 8192  ;;  %p9638_p5 = scmp.lt.s32.totalorder %s10022_s12, %s10022_s12 }
  0x2c   : > { %p9631_p12 = scmp.ne.s32.totalorder %s10022_s12, %s9630_s16  ;;  %p9639_p9 = scmp.lt.s32.totalorder %s9630_s16, %s9630_s16 }
  0x2e   : > { %p9633_p13 = pnand %p9631_p12, %p10045_p2  ;;  %p9640_p1 = por %p9639_p9, %p9638_p5 }
  0x30   : > { %p9634_p4 = pneg %p9633_p13 }
  0x32   : > { %p9641_p3 = pnand %p9640_p1, %p9634_p4 }
  0x34   : > { %9644 = shalt.err (!%p9641_p3)
}
  0x35   : > { %s9877_s18 = smov 256   ;;  %s9878_s19 = smov 16  }
  0x36   : > { %8389 = dma.hbm_to_vmem [thread:$0]  (!%p10029_p0), %s10614_s3, 8192, %s10022_s12, [#allocation11], %s9877_s18, %s9877_s18, %s9878_s19  }
  0x37   : > { %s9645_s14 = scalar_lea.hbm %s10616_s5, 8192 }
  0x38   : > { %p9646_p5 = scmp.ne.s32.totalorder %s10616_s5, %s9645_s14  ;;  %p9652_p13 = scmp.lt.u32.totalorder %s9645_s14, %s10616_s5 }
  0x3a   : > { %p9648_p4 = pnand %p9646_p5, %p10045_p2 }
  0x3c   : > { %p9649_p9 = pneg %p9648_p4 }
  0x3e   : > { %p9654_p6 = pnand %p9652_p13, %p9649_p9 }
  0x40   : > { %9657 = shalt.err (!%p9654_p6)
}
  0x41   : > { %s9658_s12 = scalar_lea.vmem %s10033_s15, 8192  ;;  %p9666_p1 = scmp.lt.s32.totalorder %s10033_s15, %s10033_s15 }
  0x42   : > { %p9659_p8 = scmp.ne.s32.totalorder %s10033_s15, %s9658_s12  ;;  %p9667_p3 = scmp.lt.s32.totalorder %s9658_s12, %s9658_s12 }
  0x44   : > { %p9661_p10 = pnand %p9659_p8, %p10045_p2  ;;  %p9668_p5 = por %p9667_p3, %p9666_p1 }
  0x46   : > { %p9662_p12 = pneg %p9661_p10 }
  0x48   : > { %p9669_p4 = pnand %p9668_p5, %p9662_p12 }
  0x4a   : > { %9672 = shalt.err (!%p9669_p4)
}
  0x4b   : > { %8392 = dma.hbm_to_vmem [thread:$0]  (!%p10029_p0), %s10616_s5, 8192, %s10033_s15, [#allocation14], %s9877_s18, %s9877_s18, %s9878_s19  }
  0x4c   : > { %s9673_s21 = scalar_lea.hbm %s10612_s1, 256 }
  0x4d   : > { %p9674_p9 = scmp.ne.s32.totalorder %s10612_s1, %s9673_s21  ;;  %p9680_p8 = scmp.lt.u32.totalorder %s9673_s21, %s10612_s1 }
  0x4f   : > { %p9676_p13 = pnand %p9674_p9, %p10045_p2 }
  0x51   : > { %p9677_p6 = pneg %p9676_p13 }
  0x53   : > { %p9682_p10 = pnand %p9680_p8, %p9677_p6 }
  0x55   : > { %9685 = shalt.err (!%p9682_p10)
}
  0x56   : > { %s9686_s12 = scalar_lea.vmem %s271_s17, 256  ;;  %p9694_p5 = scmp.lt.s32.totalorder %s271_s17, %s271_s17 }
  0x57   : > { %p9687_p12 = scmp.ne.s32.totalorder %s271_s17, %s9686_s12  ;;  %p9695_p4 = scmp.lt.s32.totalorder %s9686_s12, %s9686_s12 }
  0x59   : > { %p9689_p1 = pnand %p9687_p12, %p10045_p2  ;;  %p9696_p7 = por %p9695_p4, %p9694_p5 }
  0x5b   : > { %p9690_p3 = pneg %p9689_p1 }
  0x5d   : > { %p9697_p11 = pnand %p9696_p7, %p9690_p3 }
  0x5f   : > { %9700 = shalt.err (!%p9697_p11)
}
  0x60   : > { %s9879_s15 = smov 128   ;;  %s9880_s18 = smov 8  }
  0x61   : > { %8386 = dma.hbm_to_vmem [thread:$0]  (!%p10029_p0), %s10612_s1, 256, %s271_s17, [#allocation8], %s9879_s15, %s9879_s15, %s9880_s18  }
  0x62   : > { %s9881_s23 = smov [#allocation15]   ;;  %s9701_s22 = scalar_lea.hbm %s10618_s7, 3072 }
  0x63   : > { %s315_s29 = sshll.u32 %s9881_s23, 4  ;;  %p9702_p7 = scmp.ne.s32.totalorder %s10618_s7, %s9701_s22  ;;  %s316_s29 = int_to_ptr.vmem [resolvable:$true] %s315_s29 }
  0x64   : > { %p9708_p13 = scmp.lt.u32.totalorder %s9701_s22, %s10618_s7 }
  0x65   : > { %p9704_p11 = pnand %p9702_p7, %p10045_p2 }
  0x67   : > { %p9705_p9 = pneg %p9704_p11 }
  0x69   : > { %p9710_p6 = pnand %p9708_p13, %p9705_p9 }
  0x6b   : > { %9713 = shalt.err (!%p9710_p6)
}
  0x6c   : > { %s9714_s17 = scalar_lea.vmem %s316_s29, 3072  ;;  %p9722_p1 = scmp.lt.s32.totalorder %s316_s29, %s316_s29 }
  0x6d   : > { %p9715_p8 = scmp.ne.s32.totalorder %s316_s29, %s9714_s17  ;;  %p9723_p3 = scmp.lt.s32.totalorder %s9714_s17, %s9714_s17 }
  0x6f   : > { %p9717_p10 = pnand %p9715_p8, %p10045_p2  ;;  %p9724_p5 = por %p9723_p3, %p9722_p1 }
  0x71   : > { %p9718_p12 = pneg %p9717_p10 }
  0x73   : > { %p9725_p4 = pnand %p9724_p5, %p9718_p12 }
  0x75   : > { %9728 = shalt.err (!%p9725_p4)
}
  0x76   : > { %s9882_s15 = smov 192   ;;  %s9883_s18 = smov 12  }
  0x77   : > { %8395 = dma.hbm_to_vmem [thread:$0]  (!%p10029_p0), %s10618_s7, 3072, %s316_s29, [#allocation14], %s9882_s15, %s9882_s15, %s9883_s18  }
  0x78   : > { %s9884_s23 = smov [#allocation16]   ;;  %s9729_s11 = scalar_lea.hbm %s10620_s9, 3072 }
  0x79   : > { %s331_s20 = sshll.u32 %s9884_s23, 4  ;;  %p9730_p7 = scmp.ne.s32.totalorder %s10620_s9, %s9729_s11  ;;  %s332_s20 = int_to_ptr.vmem [resolvable:$true] %s331_s20 }
  0x7a   : > { %p9736_p13 = scmp.lt.u32.totalorder %s9729_s11, %s10620_s9 }
  0x7b   : > { %p9732_p11 = pnand %p9730_p7, %p10045_p2 }
  0x7d   : > { %p9733_p9 = pneg %p9732_p11 }
  0x7f   : > { %p9738_p6 = pnand %p9736_p13, %p9733_p9 }
  0x81   : > { %9741 = shalt.err (!%p9738_p6)
}
  0x82   : > { %s9742_s29 = scalar_lea.vmem %s332_s20, 3072  ;;  %p9750_p1 = scmp.lt.s32.totalorder %s332_s20, %s332_s20 }
  0x83   : > { %p9743_p8 = scmp.ne.s32.totalorder %s332_s20, %s9742_s29  ;;  %p9751_p3 = scmp.lt.s32.totalorder %s9742_s29, %s9742_s29 }
  0x85   : > { %p9745_p10 = pnand %p9743_p8, %p10045_p2  ;;  %p9752_p5 = por %p9751_p3, %p9750_p1 }
  0x87   : > { %p9746_p12 = pneg %p9745_p10 }
  0x89   : > { %p9753_p4 = pnand %p9752_p5, %p9746_p12 }
  0x8b   : > { %9756 = shalt.err (!%p9753_p4)
}
  0x8c   : > { %s9885_s15 = smov 64   ;;  %s9886_s27 = smov 4  }
  0x8d   : > { %8398 = dma.hbm_to_vmem [thread:$0]  (!%p10029_p0), %s10620_s9, 3072, %s332_s20, [#allocation17], %s9885_s15, %s9885_s15, %s9886_s27  }
  0x8e   : > { %s10148_s10 = sadd.s32 1, %s9871_s26   ;;  %s61_s21 = sadd.s32 1, %s9867_s25 }
  0x8f   : > { %s58_s23 = ssub.s32 %s9871_s26, %s10148_s10  ;;  %p68_p7 = scmp.ne.s32.totalorder %s9867_s25, %s9863_s24 }
  0x90   : > { %p59_p2 = scmp.eq.s32.totalorder %s58_s23, 0  ;;  %p69_p11 = scmp.eq.s32.totalorder %s9871_s26, 0 }
  0x91   : > { %p8412_p9 = scmp.lt.s32.totalorder %s9871_s26, 2  ;;  %p10636_p6 = scmp.eq.s32.totalorder %s9999_s0, 1 }
  0x92   : > { %s10158_s22 = scalar_select %p59_p2, %s9867_s25, %s61_s21  }
  0x93   : > { %p70_p13 = por %p69_p11, %p68_p7  ;;  %p10162_p8 = por %p10636_p6, %p68_p7 }
  0x94   : > { %s345_s11 = sand.u32 1, %s9871_s26   ;;  %s347_s14 = sand.u32 1, %s9867_s25  }
  0x95   : > { %s7223_s20 = sshll.u32 %s347_s14, 4  ;;  %s8036_s16 = sshll.u32 %s9871_s26, 8 }
  0x96   : > { %s10172_s29 = scalar_lea.hbm %s10613_s2, %s8036_s16  ;;  %s349_s18 = scalar_lea.vmem [#allocation10], %s7223_s20 }
  0x97   : > { %s356_s19 = sshll.u32 %s349_s18, 4  ;;  %p10176_p0 = pnand %p8412_p9, %p70_p13  ;;  %s10174_s19 = int_to_ptr.vmem [resolvable:$true] %s356_s19 }
  0x98   : > { %s10180_s21 = scalar_lea.sflag [#allocation11], %s345_s11  ;;  %s9757_s14 = scalar_lea.hbm %s10172_s29, 256 }
  0x99   : > { %p9758_p10 = scmp.ne.s32.totalorder %s10172_s29, %s9757_s14  ;;  %p9759_p12 = pneg %p10176_p0 }
  0x9a   : > { %s9762_s12 = scalar_lea.hbm %s10613_s2, 512  ;;  %p9763_p5 = scmp.lt.u32.totalorder %s10172_s29, %s10613_s2 }
  0x9b   : > { %p9760_p1 = pnand %p9759_p12, %p9758_p10  ;;  %p9764_p4 = scmp.lt.u32.totalorder %s9762_s12, %s9757_s14 }
  0x9c   : > { %p9766_p7 = scmp.lt.u32.totalorder %s9757_s14, %s10172_s29 }
  0x9d   : > { %p9761_p3 = pneg %p9760_p1  ;;  %p9765_p2 = por %p9764_p4, %p9763_p5 }
  0x9f   : > { %p9767_p11 = por %p9766_p7, %p9765_p2 }
  0xa1   : > { %p9768_p9 = pnand %p9767_p11, %p9761_p3 }
  0xa3   : > { %9771 = shalt.err (!%p9768_p9)
}
  0xa4   : > { %s9772_s11 = scalar_lea.vmem %s10174_s19, 256  ;;  %s9887_s20 = smov [#allocation10]  }
  0xa5   : > { %p9773_p13 = scmp.ne.s32.totalorder %s10174_s19, %s9772_s11  ;;  %s9777_s16 = sshll.u32 %s9887_s20, 4  ;;  %s9778_s16 = int_to_ptr.vmem [resolvable:$false] %s9777_s16 }
  0xa6   : > { %s9779_s17 = scalar_lea.vmem %s9778_s16, 512  ;;  %p9780_p1 = scmp.lt.s32.totalorder %s10174_s19, %s9778_s16 }
  0xa7   : > { %p9775_p6 = pnand %p9773_p13, %p9759_p12  ;;  %p9781_p5 = scmp.lt.s32.totalorder %s9779_s17, %s9772_s11 }
  0xa9   : > { %p9776_p10 = pneg %p9775_p6  ;;  %p9782_p4 = por %p9781_p5, %p9780_p1 }
  0xab   : > { %p9783_p2 = pnand %p9782_p4, %p9776_p10 }
  0xad   : > { %9786 = shalt.err (!%p9783_p2)
}
  0xae   : > { %8402 = dma.hbm_to_vmem [thread:$0]  (!%p10176_p0), %s10172_s29, 256, %s10174_s19, %s10180_s21, %s9885_s15, %s9885_s15, %s9886_s27  }
  0xaf   : > { %p10639_p12 = scmp.ne.s32.totalorder %s10633_s30, 0 }
  0xb0   : > { %p10640_p3 = scmp.eq.s32.totalorder (!%p10639_p12), %s9999_s0, 0 }
  0xb1   : > { %368 = sbr.rel (%p10639_p12) target bundleno = 6153 (0x1809), region = 56 }
  0xb8   : > { %9834 = dma.done.wait (%p10640_p3), [#allocation8], 256   ;;  %p10641_p7 = pmov %p10640_p3 }
  0xb9   : > { %s374_s23 = sand.u32 1, %s9999_s0   ;;  %s10219_s14 = sand.u32 1, %s9863_s24  }
  0xba   : > { %9836 = vsyncadd (%p10641_p7), [#allocation8], 4294967040  ;;  %s7228_s12 = sshll.u32 %s10219_s14, 4  ;;  %s375_s18 = scalar_lea.sflag [#allocation11], %s374_s23 }
  0xbb   : > { %s10222_s11 = scalar_lea.vmem [#allocation10], %s7228_s12  ;;  %p10642_p0 = scmp.ne.s32.totalorder %s10630_s28, 0 }
  0xbd   : > { %9838 = dma.done.wait (%p10642_p0), %s375_s18, 256  }
  0xbe   : > { %9840 = vsyncadd (%p10642_p0), %s375_s18, 4294967040  ;;  %p10643_p11 = pmov %p10640_p3 }
  0xbf   : > { %p10644_p9 = pmov %p10640_p3 }
  0xc0   : > { %9842 = dma.done.wait (%p10643_p11), [#allocation11], 8192  }
  0xc1   : > { %9844 = vsyncadd (%p10644_p9), [#allocation11], 4294959104  ;;  %p10645_p13 = pmov %p10640_p3 }
  0xc2   : > { %p10646_p6 = pmov %p10640_p3 }
  0xc3   : > { %9846 = dma.done.wait (%p10645_p13), [#allocation14], 11264  }
  0xc4   : > { %9848 = vsyncadd (%p10646_p6), [#allocation14], 4294956032  ;;  %p10647_p10 = pmov %p10640_p3 }
  0xc5   : > { %p10648_p1 = pmov %p10640_p3 }
  0xc6   : > { %9850 = dma.done.wait (%p10647_p10), [#allocation17], 3072  }
  0xc7   : > { %9852 = vsyncadd (%p10648_p1), [#allocation17], 4294964224  ;;  %s8357_s28 = smul.u32 96, %s10219_s14  ;;  %v432_v0 = vlaneseq  ;;  %s10242_s30 = sshll.u32 %s9999_s0, 2 }
  0xc8   : > { %p7234_p5 = scmp.ne.s32.totalorder %s10242_s30, 0 }
  0xc9   : > { %v10245_v1 = vand.u32 127, %v432_v0  ;;  %s10253_s15 = scalar_lea.vmem [#allocation18], %s8357_s28  ;;  %v441_v4 = vld [vmem:[#allocation7] sm:$0xff] (!%p7234_p5)  ;;  %v442_v5 = vld [vmem:[#allocation7 + $0x8] sm:$0xff] (!%p7234_p5)  ;;  %v9888_v7 = vmov (!%p7234_p5), 0.0  }
  0xca   : > { %440 = sbr.rel (%p7234_p5) target bundleno = 209 (0xd1), region = 84  ;;  %v449_v6 = vld [vmem:[%s10222_s11] sm:$0xf] (!%p7234_p5)  ;;  %443 = vst [vmem:[#allocation2] sm:$0xff] (!%p7234_p5), %v441_v4  ;;  %444 = vst [vmem:[#allocation2 + $0x8] sm:$0xff] (!%p7234_p5), %v442_v5 }
  0xcb   : > { %v10248_v2 = vadd.s32 128, %v10245_v1  ;;  %v10251_v3 = vadd.s32 256, %v10245_v1  ;;  %vm451_vm0 = vcmp.eq.s32.totalorder (!%p7234_p5), %v10245_v1, 1  ;;  %447 = vst [vmem:[#allocation3] sm:$0xff] (!%p7234_p5), %v441_v4  ;;  %448 = vst [vmem:[#allocation3 + $0x8] sm:$0xff] (!%p7234_p5), %v442_v5 }
  0xcc   : > { %450 = vst [vmem:[#allocation4] sm:$0xf] (!%p7234_p5), %v449_v6  ;;  %v7235_v8 = vsel (!%p7234_p5), %vm451_vm0, 1.0, %v9888_v7  ;;  %461 = vst [vmem:[%s10253_s15 + $0x8] sm:$0xff] (!%p7234_p5), %v9888_v7 }
  0xcd   : > { %462 = vst [vmem:[%s10253_s15 + $0x10] sm:$0xff] (!%p7234_p5), %v9888_v7  ;;  %460 = vst [vmem:[%s10253_s15] sm:$0xff] (!%p7234_p5), %v7235_v8 }
  0xd1 PF: > { %p7236_p4 = scmp.le.s32.totalorder %s10242_s30, 0 }
  0xd2   : > { %v8487_v9 = vld [vmem:[#allocation12 + $0x4] ss:$16 sps:$4 sm:$0xff] (!%p7236_p4)   ;;  %v8489_v10 = vld [vmem:[#allocation12] ss:$16 sps:$4 sm:$0xff] (!%p7236_p4)   ;;  %v8498_v14 = vld [vmem:[#allocation12 + $0xc] ss:$16 sps:$4 sm:$0xff] (!%p7236_p4)  }
  0xd3   : > { %466 = sbr.rel (%p7236_p4) target bundleno = 1681 (0x691), region = 88  ;;  %877 = vmatprep.subr.bf16.mxu0 (!%p7236_p4), %v8487_v9  ;;  %v8490_v11 = vld [vmem:[#allocation12 + $0x24] ss:$16 sps:$4 sm:$0xff] (!%p7236_p4)   ;;  %v8492_v12 = vld [vmem:[#allocation12 + $0x20] ss:$16 sps:$4 sm:$0xff] (!%p7236_p4)   ;;  %918 = vmatprep.subr.bf16.mxu1 (!%p7236_p4), %v8498_v14  ;;  %vm9891_vm1 = vmmov (!%p7236_p4), 0  }
  0xd4   : > { %878 = vmatpush1.bf16.msra.mxu0 (!%p7236_p4), %v8489_v10  ;;  %v8493_v13 = vld [vmem:[#allocation12 + $0x44] ss:$16 sps:$4 sm:$0xff] (!%p7236_p4)   ;;  %v8501_v15 = vld [vmem:[#allocation12 + $0x8] ss:$16 sps:$4 sm:$0xff] (!%p7236_p4)   ;;  %v8495_v16 = vld [vmem:[#allocation12 + $0x40] ss:$16 sps:$4 sm:$0xff] (!%p7236_p4)  }
  0xd5   : > { %879 = vmatprep.subr.bf16.mxu0 (!%p7236_p4), %v8490_v11  ;;  %v8496_v17 = vld [vmem:[#allocation12 + $0x64] ss:$16 sps:$4 sm:$0xff] (!%p7236_p4)   ;;  %919 = vmatpush1.bf16.msra.mxu1 (!%p7236_p4), %v8501_v15  ;;  %v8504_v18 = vld [vmem:[#allocation12 + $0x2c] ss:$16 sps:$4 sm:$0xff] (!%p7236_p4)   ;;  %v8507_v19 = vld [vmem:[#allocation12 + $0x28] ss:$16 sps:$4 sm:$0xff] (!%p7236_p4)  }
  0xd6   : > { %920 = vmatprep.subr.bf16.mxu1 (!%p7236_p4), %v8504_v18  ;;  %v8500_v20 = vld [vmem:[#allocation12 + $0x60] ss:$16 sps:$4 sm:$0xff] (!%p7236_p4)   ;;  %v8502_v21 = vld [vmem:[#allocation12 + $0x84] ss:$16 sps:$4 sm:$0xff] (!%p7236_p4)   ;;  %v8510_v22 = vld [vmem:[#allocation12 + $0x4c] ss:$16 sps:$4 sm:$0xff] (!%p7236_p4)  }
  0xd7   : > { %v8513_v23 = vld [vmem:[#allocation12 + $0x48] ss:$16 sps:$4 sm:$0xff] (!%p7236_p4)   ;;  %v8516_v24 = vld [vmem:[#allocation12 + $0x6c] ss:$16 sps:$4 sm:$0xff] (!%p7236_p4)   ;;  %v8506_v25 = vld [vmem:[#allocation12 + $0x80] ss:$16 sps:$4 sm:$0xff] (!%p7236_p4)  }
  0xd8   : > { %880 = vmatpush1.bf16.msra.mxu0 (!%p7236_p4), %v8492_v12  ;;  %v8508_v26 = vld [vmem:[#allocation12 + $0xa4] ss:$16 sps:$4 sm:$0xff] (!%p7236_p4)   ;;  %v8519_v27 = vld [vmem:[#allocation12 + $0x68] ss:$16 sps:$4 sm:$0xff] (!%p7236_p4)   ;;  %v8522_v28 = vld [vmem:[#allocation12 + $0x8c] ss:$16 sps:$4 sm:$0xff] (!%p7236_p4)  }
  0xd9   : > { %881 = vmatprep.subr.bf16.mxu0 (!%p7236_p4), %v8493_v13  ;;  %921 = vmatpush1.bf16.msra.mxu1 (!%p7236_p4), %v8507_v19  ;;  %v8512_v29 = vld [vmem:[#allocation12 + $0xa0] ss:$16 sps:$4 sm:$0xff] (!%p7236_p4)   ;;  %v8514_v30 = vld [vmem:[#allocation12 + $0xc4] ss:$16 sps:$4 sm:$0xff] (!%p7236_p4)   ;;  %v8525_v31 = vld [vmem:[#allocation12 + $0x88] ss:$16 sps:$4 sm:$0xff] (!%p7236_p4)  }
  0xda   : > { %922 = vmatprep.subr.bf16.mxu1 %v8510_v22  ;;  %v8528_v32 = vld [vmem:[#allocation12 + $0xac] ss:$16 sps:$4 sm:$0xff]   ;;  %v8518_v33 = vld [vmem:[#allocation12 + $0xc0] ss:$16 sps:$4 sm:$0xff]   ;;  %v8520_v34 = vld [vmem:[#allocation12 + $0xe4] ss:$16 sps:$4 sm:$0xff]  }
  0xdb   : > { %v8531_v35 = vld [vmem:[#allocation12 + $0xa8] ss:$16 sps:$4 sm:$0xff]   ;;  %v8534_v36 = vld [vmem:[#allocation12 + $0xcc] ss:$16 sps:$4 sm:$0xff]   ;;  %v8524_v37 = vld [vmem:[#allocation12 + $0xe0] ss:$16 sps:$4 sm:$0xff]  }
  0xdc   : > { %882 = vmatpush1.bf16.msra.mxu0 %v8495_v16  ;;  %v8526_v38 = vld [vmem:[#allocation12 + $0x104] ss:$16 sps:$4 sm:$0xff]   ;;  %v8537_v39 = vld [vmem:[#allocation12 + $0xc8] ss:$16 sps:$4 sm:$0xff]   ;;  %v8540_v40 = vld [vmem:[#allocation12 + $0xec] ss:$16 sps:$4 sm:$0xff]  }
  0xdd   : > { %883 = vmatprep.subr.bf16.mxu0 %v8496_v17  ;;  %923 = vmatpush1.bf16.msra.mxu1 %v8513_v23  ;;  %v8530_v41 = vld [vmem:[#allocation12 + $0x100] ss:$16 sps:$4 sm:$0xff]   ;;  %v8532_v42 = vld [vmem:[#allocation12 + $0x124] ss:$16 sps:$4 sm:$0xff]   ;;  %v8543_v43 = vld [vmem:[#allocation12 + $0xe8] ss:$16 sps:$4 sm:$0xff]  }
  0xde   : > { %924 = vmatprep.subr.bf16.mxu1 %v8516_v24  ;;  %v8546_v44 = vld [vmem:[#allocation12 + $0x10c] ss:$16 sps:$4 sm:$0xff]   ;;  %v8536_v45 = vld [vmem:[#allocation12 + $0x120] ss:$16 sps:$4 sm:$0xff]   ;;  %v8538_v46 = vld [vmem:[#allocation12 + $0x144] ss:$16 sps:$4 sm:$0xff]  }
  0xdf   : > { %v8549_v47 = vld [vmem:[#allocation12 + $0x108] ss:$16 sps:$4 sm:$0xff]   ;;  %v8552_v48 = vld [vmem:[#allocation12 + $0x12c] ss:$16 sps:$4 sm:$0xff]   ;;  %v8542_v50 = vld [vmem:[#allocation12 + $0x140] ss:$16 sps:$4 sm:$0xff]  }
  0xe0   : > { %884 = vmatpush1.bf16.msra.mxu0 %v8500_v20  ;;  %v468_v49 = vld [vmem:[#allocation2] sm:$0xff]  ;;  %v8544_v52 = vld [vmem:[#allocation12 + $0x164] ss:$16 sps:$4 sm:$0xff]   ;;  %v8555_v53 = vld [vmem:[#allocation12 + $0x128] ss:$16 sps:$4 sm:$0xff]   ;;  %vm1769_vm2 = vcmp.lt.s32.totalorder %v10251_v3, 322 }
  0xe1   : > { %885 = vmatprep.subr.bf16.mxu0 %v8502_v21  ;;  %925 = vmatpush1.bf16.msra.mxu1 %v8519_v27  ;;  %v470_v51 = vpack.c.bf16 %v468_v49, %v468_v49  ;;  %v8558_v54 = vld [vmem:[#allocation12 + $0x14c] ss:$16 sps:$4 sm:$0xff]   ;;  %v8548_v55 = vld [vmem:[#allocation12 + $0x160] ss:$16 sps:$4 sm:$0xff]   ;;  %v8550_v56 = vld [vmem:[#allocation12 + $0x184] ss:$16 sps:$4 sm:$0xff]  }
  0xe2   : > { %926 = vmatprep.subr.bf16.mxu1 %v8522_v28  ;;  %v8561_v57 = vld [vmem:[#allocation12 + $0x148] ss:$16 sps:$4 sm:$0xff]   ;;  %v8564_v58 = vld [vmem:[#allocation12 + $0x16c] ss:$16 sps:$4 sm:$0xff]   ;;  %v8554_v59 = vld [vmem:[#allocation12 + $0x180] ss:$16 sps:$4 sm:$0xff]  }
  0xe3   : > { %909 = vmatprep.mubr.bf16.mxu0 %v470_v51  ;;  %950 = vmatprep.mubr.bf16.mxu1 %v470_v51  ;;  %v8556_v60 = vld [vmem:[#allocation12 + $0x1a4] ss:$16 sps:$4 sm:$0xff]   ;;  %v8567_v61 = vld [vmem:[#allocation12 + $0x168] ss:$16 sps:$4 sm:$0xff]   ;;  %v8570_v62 = vld [vmem:[#allocation12 + $0x18c] ss:$16 sps:$4 sm:$0xff]  }
  0xe4   : > { %886 = vmatpush1.bf16.msra.mxu0 %v8506_v25  ;;  %v8560_v63 = vld [vmem:[#allocation12 + $0x1a0] ss:$16 sps:$4 sm:$0xff]   ;;  %v8562_v4 = vld [vmem:[#allocation12 + $0x1c4] ss:$16 sps:$4 sm:$0xff]   ;;  %v8573_v5 = vld [vmem:[#allocation12 + $0x188] ss:$16 sps:$4 sm:$0xff]  }
  0xe5   : > { %887 = vmatprep.subr.bf16.mxu0 %v8508_v26  ;;  %927 = vmatpush1.bf16.msra.mxu1 %v8525_v31  ;;  %v8566_v6 = vld [vmem:[#allocation12 + $0x1c0] ss:$16 sps:$4 sm:$0xff]   ;;  %v8574_v7 = vld [vmem:[#allocation12 + $0x1ac] ss:$16 sps:$4 sm:$0xff]   ;;  %v8568_v8 = vld [vmem:[#allocation12 + $0x1e4] ss:$16 sps:$4 sm:$0xff]  }
  0xe6   : > { %928 = vmatprep.subr.bf16.mxu1 %v8528_v32  ;;  %v8576_v9 = vld [vmem:[#allocation12 + $0x1a8] ss:$16 sps:$4 sm:$0xff]   ;;  %v8577_v10 = vld [vmem:[#allocation12 + $0x1cc] ss:$16 sps:$4 sm:$0xff]   ;;  %v8572_v11 = vld [vmem:[#allocation12 + $0x1e0] ss:$16 sps:$4 sm:$0xff]  }
  0xe7   : > { %v8579_v12 = vld [vmem:[#allocation12 + $0x1c8] ss:$16 sps:$4 sm:$0xff]   ;;  %v8585_v13 = vld [vmem:[#allocation13 + $0x4] ss:$16 sps:$4 sm:$0xff]   ;;  %v8580_v14 = vld [vmem:[#allocation12 + $0x1ec] ss:$16 sps:$4 sm:$0xff]  }
  0xe8   : > { %888 = vmatpush1.bf16.msra.mxu0 %v8512_v29  ;;  %v467_v15 = vld [vmem:[#allocation4] sm:$0xf]  ;;  %v8583_v16 = vld [vmem:[#allocation13] ss:$16 sps:$4 sm:$0xff]   ;;  %v8582_v17 = vld [vmem:[#allocation12 + $0x1e8] ss:$16 sps:$4 sm:$0xff]  }
  0xe9   : > { %889 = vmatprep.subr.bf16.mxu0 %v8514_v30  ;;  %929 = vmatpush1.bf16.msra.mxu1 %v8531_v35  ;;  %v8591_v18 = vld [vmem:[#allocation13 + $0x24] ss:$16 sps:$4 sm:$0xff]   ;;  %v8588_v19 = vld [vmem:[#allocation13 + $0xc] ss:$16 sps:$4 sm:$0xff]   ;;  %v8589_v20 = vld [vmem:[#allocation13 + $0x20] ss:$16 sps:$4 sm:$0xff]  }
  0xea   : > { %930 = vmatprep.subr.bf16.mxu1 %v8534_v36  ;;  %v8586_v21 = vld [vmem:[#allocation13 + $0x8] ss:$16 sps:$4 sm:$0xff]   ;;  %v8597_v22 = vld [vmem:[#allocation13 + $0x44] ss:$16 sps:$4 sm:$0xff]   ;;  %v8594_v23 = vld [vmem:[#allocation13 + $0x2c] ss:$16 sps:$4 sm:$0xff]  }
  0xeb   : > { %v8595_v24 = vld [vmem:[#allocation13 + $0x40] ss:$16 sps:$4 sm:$0xff]   ;;  %v8592_v25 = vld [vmem:[#allocation13 + $0x28] ss:$16 sps:$4 sm:$0xff]   ;;  %v8603_v26 = vld [vmem:[#allocation13 + $0x64] ss:$16 sps:$4 sm:$0xff]  }
  0xec   : > { %890 = vmatpush1.bf16.msra.mxu0 %v8518_v33  ;;  %v8600_v27 = vld [vmem:[#allocation13 + $0x4c] ss:$16 sps:$4 sm:$0xff]   ;;  %v8601_v28 = vld [vmem:[#allocation13 + $0x60] ss:$16 sps:$4 sm:$0xff]   ;;  %v8598_v29 = vld [vmem:[#allocation13 + $0x48] ss:$16 sps:$4 sm:$0xff]  }
  0xed   : > { %891 = vmatprep.subr.bf16.mxu0 %v8520_v34  ;;  %931 = vmatpush1.bf16.msra.mxu1 %v8537_v39  ;;  %v8606_v30 = vld [vmem:[#allocation13 + $0x6c] ss:$16 sps:$4 sm:$0xff]   ;;  %v8604_v31 = vld [vmem:[#allocation13 + $0x68] ss:$16 sps:$4 sm:$0xff]   ;;  %v8609_v32 = vld [vmem:[#allocation13 + $0x84] ss:$16 sps:$4 sm:$0xff]  }
  0xee   : > { %932 = vmatprep.subr.bf16.mxu1 %v8540_v40  ;;  %v8612_v33 = vld [vmem:[#allocation13 + $0x8c] ss:$16 sps:$4 sm:$0xff]   ;;  %v8607_v34 = vld [vmem:[#allocation13 + $0x80] ss:$16 sps:$4 sm:$0xff]   ;;  %v8610_v35 = vld [vmem:[#allocation13 + $0x88] ss:$16 sps:$4 sm:$0xff]  }
  0xef   : > { %v8615_v36 = vld [vmem:[#allocation13 + $0xa4] ss:$16 sps:$4 sm:$0xff]   ;;  %v8616_v39 = vld [vmem:[#allocation13 + $0xa8] ss:$16 sps:$4 sm:$0xff]   ;;  %v8636_v49 = vld [vmem:[#allocation13 + $0x10c] ss:$16 sps:$4 sm:$0xff]  }
  0xf0   : > { %892 = vmatpush1.bf16.msra.mxu0 %v8524_v37  ;;  %v8618_v37 = vld [vmem:[#allocation13 + $0xac] ss:$16 sps:$4 sm:$0xff]   ;;  %v8621_v40 = vld [vmem:[#allocation13 + $0xc4] ss:$16 sps:$4 sm:$0xff]   ;;  %v8634_v51 = vld [vmem:[#allocation13 + $0x108] ss:$16 sps:$4 sm:$0xff]  }
  0xf1   : > { %893 = vmatprep.subr.bf16.mxu0 %v8526_v38  ;;  %933 = vmatpush1.bf16.msra.mxu1 %v8543_v43  ;;  %v8613_v38 = vld [vmem:[#allocation13 + $0xa0] ss:$16 sps:$4 sm:$0xff]   ;;  %v8622_v43 = vld [vmem:[#allocation13 + $0xc8] ss:$16 sps:$4 sm:$0xff]   ;;  %s2086_s17 = sld [smem:[#allocation6 + %s10242_s30]] }
  0xf2   : > { %934 = vmatprep.subr.bf16.mxu1 %v8546_v44  ;;  %v8627_v44 = vld [vmem:[#allocation13 + $0xe4] ss:$16 sps:$4 sm:$0xff]  }
  0xf4   : > { %894 = vmatpush1.bf16.msra.mxu0 %v8530_v41  ;;  %v8624_v41 = vld [vmem:[#allocation13 + $0xcc] ss:$16 sps:$4 sm:$0xff]  }
  0xf5   : > { %895 = vmatprep.subr.bf16.mxu0 %v8532_v42  ;;  %935 = vmatpush1.bf16.msra.mxu1 %v8549_v47  ;;  %v8619_v42 = vld [vmem:[#allocation13 + $0xc0] ss:$16 sps:$4 sm:$0xff]   ;;  %v8628_v47 = vld [vmem:[#allocation13 + $0xe8] ss:$16 sps:$4 sm:$0xff]  }
  0xf6   : > { %936 = vmatprep.subr.bf16.mxu1 %v8552_v48  ;;  %v8633_v48 = vld [vmem:[#allocation13 + $0x104] ss:$16 sps:$4 sm:$0xff]  }
  0xf7   : > { %p2087_p2 = scmp.eq.s32.totalorder %s2086_s17, 1 }
  0xf8   : > { %896 = vmatpush1.bf16.msra.mxu0 %v8536_v45  ;;  %v8630_v45 = vld [vmem:[#allocation13 + $0xec] ss:$16 sps:$4 sm:$0xff]  }
  0xf9   : > { %897 = vmatprep.subr.bf16.mxu0 %v8538_v46  ;;  %937 = vmatpush1.bf16.msra.mxu1 %v8555_v53  ;;  %v8625_v46 = vld [vmem:[#allocation13 + $0xe0] ss:$16 sps:$4 sm:$0xff]   ;;  %v8642_v53 = vld [vmem:[#allocation13 + $0x12c] ss:$16 sps:$4 sm:$0xff]   ;;  %s2089_s23 = scalar_select %p2087_p2, 1, 0 }
  0xfa   : > { %938 = vmatprep.subr.bf16.mxu1 %v8558_v54  ;;  %v8637_v54 = vld [vmem:[#allocation13 + $0x120] ss:$16 sps:$4 sm:$0xff]  }
  0xfc   : > { %898 = vmatpush1.bf16.msra.mxu0 %v8542_v50  ;;  %v8631_v50 = vld [vmem:[#allocation13 + $0x100] ss:$16 sps:$4 sm:$0xff]  }
  0xfd   : > { %899 = vmatprep.subr.bf16.mxu0 %v8544_v52  ;;  %939 = vmatpush1.bf16.msra.mxu1 %v8561_v57  ;;  %v8639_v52 = vld [vmem:[#allocation13 + $0x124] ss:$16 sps:$4 sm:$0xff]   ;;  %v8648_v57 = vld [vmem:[#allocation13 + $0x14c] ss:$16 sps:$4 sm:$0xff]  }
  0xfe   : > { %940 = vmatprep.subr.bf16.mxu1 %v8564_v58  ;;  %v8643_v58 = vld [vmem:[#allocation13 + $0x140] ss:$16 sps:$4 sm:$0xff]  }
 0x100   : > { %900 = vmatpush1.bf16.msra.mxu0 %v8548_v55  ;;  %v8640_v55 = vld [vmem:[#allocation13 + $0x128] ss:$16 sps:$4 sm:$0xff]  }
 0x101   : > { %901 = vmatprep.subr.bf16.mxu0 %v8550_v56  ;;  %941 = vmatpush1.bf16.msra.mxu1 %v8567_v61  ;;  %v8645_v56 = vld [vmem:[#allocation13 + $0x144] ss:$16 sps:$4 sm:$0xff]   ;;  %v8654_v61 = vld [vmem:[#allocation13 + $0x16c] ss:$16 sps:$4 sm:$0xff]  }
 0x102   : > { %942 = vmatprep.subr.bf16.mxu1 %v8570_v62  ;;  %v8649_v62 = vld [vmem:[#allocation13 + $0x160] ss:$16 sps:$4 sm:$0xff]  }
 0x104   : > { %902 = vmatpush1.bf16.msra.mxu0 %v8554_v59  ;;  %v8646_v59 = vld [vmem:[#allocation13 + $0x148] ss:$16 sps:$4 sm:$0xff]  }
 0x105   : > { %903 = vmatprep.subr.bf16.mxu0 %v8556_v60  ;;  %943 = vmatpush1.bf16.msra.mxu1 %v8573_v5  ;;  %v8651_v60 = vld [vmem:[#allocation13 + $0x164] ss:$16 sps:$4 sm:$0xff]   ;;  %v8660_v5 = vld [vmem:[#allocation13 + $0x18c] ss:$16 sps:$4 sm:$0xff]  }
 0x106   : > { %944 = vmatprep.subr.bf16.mxu1 %v8574_v7  ;;  %v8658_v7 = vld [vmem:[#allocation13 + $0x188] ss:$16 sps:$4 sm:$0xff]  }
 0x108   : > { %904 = vmatpush1.bf16.msra.mxu0 %v8560_v63  ;;  %v8652_v63 = vld [vmem:[#allocation13 + $0x168] ss:$16 sps:$4 sm:$0xff]  }
 0x109   : > { %905 = vmatprep.subr.bf16.mxu0 %v8562_v4  ;;  %945 = vmatpush1.bf16.msra.mxu1 %v8576_v9  ;;  %v8657_v4 = vld [vmem:[#allocation13 + $0x184] ss:$16 sps:$4 sm:$0xff]  }
 0x10a   : > { %946 = vmatprep.subr.bf16.mxu1 %v8577_v10  ;;  %v8663_v9 = vld [vmem:[#allocation13 + $0x1a4] ss:$16 sps:$4 sm:$0xff]   ;;  %v8664_v10 = vld [vmem:[#allocation13 + $0x1a8] ss:$16 sps:$4 sm:$0xff]  }
 0x10c   : > { %906 = vmatpush1.bf16.msra.mxu0 %v8566_v6  ;;  %v8655_v6 = vld [vmem:[#allocation13 + $0x180] ss:$16 sps:$4 sm:$0xff]  }
 0x10d   : > { %907 = vmatprep.subr.bf16.mxu0 %v8568_v8  ;;  %947 = vmatpush1.bf16.msra.mxu1 %v8579_v12  ;;  %v8661_v8 = vld [vmem:[#allocation13 + $0x1a0] ss:$16 sps:$4 sm:$0xff]   ;;  %v8669_v12 = vld [vmem:[#allocation13 + $0x1c4] ss:$16 sps:$4 sm:$0xff]  }
 0x10e   : > { %948 = vmatprep.subr.bf16.mxu1 %v8580_v14  ;;  %v8667_v14 = vld [vmem:[#allocation13 + $0x1c0] ss:$16 sps:$4 sm:$0xff]  }
 0x110   : > { %908 = vmatpush1.bf16.msra.mxu0 %v8572_v11  ;;  %v8666_v11 = vld [vmem:[#allocation13 + $0x1ac] ss:$16 sps:$4 sm:$0xff]  }
 0x111   : > { %1395 = vmatprep.subr.bf16.mxu0 %v8585_v13  ;;  %949 = vmatpush1.bf16.msra.mxu1 %v8582_v17  ;;  %v8672_v13 = vld [vmem:[#allocation13 + $0x1cc] ss:$16 sps:$4 sm:$0xff]   ;;  %v8675_v17 = vld [vmem:[#allocation13 + $0x1e4] ss:$16 sps:$4 sm:$0xff]  }
 0x112   : > { %1436 = vmatprep.subr.bf16.mxu1 %v8588_v19 }
 0x113   : > { %910 = vmatmul.mubr.bf16.vlgmr.msra.gmra.mrb[0].mxu0 %v467_v15 }
 0x114   : > { %1396 = vmatpush1.bf16.msra.mxu0 %v8583_v16  ;;  %951 = vmatmul.mubr.bf16.vlgmr.msra.gmra.mrb[0].mxu1 %v467_v15  ;;  %v8670_v15 = vld [vmem:[#allocation13 + $0x1c8] ss:$16 sps:$4 sm:$0xff]  }
 0x115   : > { %1397 = vmatprep.subr.bf16.mxu0 %v8591_v18  ;;  %1437 = vmatpush1.bf16.msra.mxu1 %v8586_v21  ;;  %v985_v16 = vld [vmem:[#allocation2 + $0x8] sm:$0xff]  ;;  %v8678_v18 = vld [vmem:[#allocation13 + $0x1ec] ss:$16 sps:$4 sm:$0xff]  }
 0x116   : > { %1438 = vmatprep.subr.bf16.mxu1 %v8594_v23  ;;  %v988_v19 = vpack.c.bf16 %v985_v16, %v985_v16  ;;  %v8676_v21 = vld [vmem:[#allocation13 + $0x1e8] ss:$16 sps:$4 sm:$0xff]   ;;  %v8694_v16 = vld [vmem:[#allocation15 + $0x50] ss:$12 sps:$4 sm:$0xff]  }
 0x118   : > { %1398 = vmatpush1.bf16.msra.mxu0 %v8589_v20  ;;  %1427 = vmatprep.mubr.bf16.mxu0 %v988_v19  ;;  %v8673_v20 = vld [vmem:[#allocation13 + $0x1e0] ss:$16 sps:$4 sm:$0xff]  }
 0x119   : > { %1399 = vmatprep.subr.bf16.mxu0 %v8597_v22  ;;  %1439 = vmatpush1.bf16.msra.mxu1 %v8592_v25  ;;  %v10263_v22 = vshrl.u32 %v432_v0, 7 }
 0x11a   : > { %1440 = vmatprep.subr.bf16.mxu1 %v8600_v27  ;;  %1468 = vmatprep.mubr.bf16.mxu1 %v988_v19  ;;  %v8698_v19 = vld [vmem:[#allocation15 + $0x68] ss:$12 sps:$4 sm:$0xff]  }
 0x11b   : > { %v10266_v23 = vsub.s32 0, %v10263_v22  ;;  %v10272_v25 = vsub.s32 1, %v10263_v22 }
 0x11c   : > { %1400 = vmatpush1.bf16.msra.mxu0 %v8595_v24  ;;  %v535_v24 = vld [vmem:[%s10615_s4] sm:$0xf] }
 0x11d   : > { %1401 = vmatprep.subr.bf16.mxu0 %v8603_v26  ;;  %1441 = vmatpush1.bf16.msra.mxu1 %v8598_v29  ;;  %v540_v26 = vrot.slane %v535_v24, %v10266_v23  ;;  %v544_v27 = vrot.slane %v535_v24, %v10272_v25 }
 0x11e   : > { %1442 = vmatprep.subr.bf16.mxu1 %v8606_v30 }
 0x120   : > { %1402 = vmatpush1.bf16.msra.mxu0 %v8601_v28  ;;  %v551_v28 = vsub.s32 3, %v10263_v22 }
 0x121   : > { %1443 = vmatpush1.bf16.msra.mxu1 %v8604_v31  ;;  %1403 = vmatprep.subr.bf16.mxu0 %v8609_v32 }
 0x122   : > { %1444 = vmatprep.subr.bf16.mxu1 %v8612_v33 }
 0x124   : > { %1404 = vmatpush1.bf16.msra.mxu0 %v8607_v34 }
 0x125   : > { %1445 = vmatpush1.bf16.msra.mxu1 %v8610_v35  ;;  %1405 = vmatprep.subr.bf16.mxu0 %v8615_v36  ;;  %v552_v36 = vrot.slane %v535_v24, %v551_v28 }
 0x126   : > { %1446 = vmatprep.subr.bf16.mxu1 %v8618_v37 }
 0x128   : > { %1406 = vmatpush1.bf16.msra.mxu0 %v8613_v38  ;;  %v10280_v38 = vsub.s32 2, %v10263_v22 }
 0x129   : > { %1447 = vmatpush1.bf16.msra.mxu1 %v8616_v39  ;;  %1407 = vmatprep.subr.bf16.mxu0 %v8621_v40 }
 0x12a   : > { %1448 = vmatprep.subr.bf16.mxu1 %v8624_v41 }
 0x12c   : > { %1408 = vmatpush1.bf16.msra.mxu0 %v8619_v42 }
 0x12d   : > { %1449 = vmatpush1.bf16.msra.mxu1 %v8622_v43  ;;  %1409 = vmatprep.subr.bf16.mxu0 %v8627_v44  ;;  %v548_v43 = vrot.slane %v535_v24, %v10280_v38  ;;  %v8702_v24 = vld [vmem:[#allocation15 + $0x80] ss:$12 sps:$4 sm:$0xff]  }
 0x12e   : > { %1450 = vmatprep.subr.bf16.mxu1 %v8630_v45 }
 0x130   : > { %1410 = vmatpush1.bf16.msra.mxu0 %v8625_v46 }
 0x131   : > { %1451 = vmatpush1.bf16.msra.mxu1 %v8628_v47  ;;  %1411 = vmatprep.subr.bf16.mxu0 %v8633_v48 }
 0x132   : > { %1452 = vmatprep.subr.bf16.mxu1 %v8636_v49 }
 0x134   : > { %1412 = vmatpush1.bf16.msra.mxu0 %v8631_v50 }
 0x135   : > { %1453 = vmatpush1.bf16.msra.mxu1 %v8634_v51  ;;  %1413 = vmatprep.subr.bf16.mxu0 %v8639_v52 }
 0x136   : > { %1454 = vmatprep.subr.bf16.mxu1 %v8642_v53  ;;  %v469_v53 = vld [vmem:[#allocation3] sm:$0xff] }
 0x138   : > { %1414 = vmatpush1.bf16.msra.mxu0 %v8637_v54 }
 0x139   : > { %1455 = vmatpush1.bf16.msra.mxu1 %v8640_v55  ;;  %1415 = vmatprep.subr.bf16.mxu0 %v8645_v56 }
 0x13a   : > { %1456 = vmatprep.subr.bf16.mxu1 %v8648_v57 }
 0x13c   : > { %1416 = vmatpush1.bf16.msra.mxu0 %v8643_v58 }
 0x13d   : > { %1457 = vmatpush1.bf16.msra.mxu1 %v8646_v59  ;;  %1417 = vmatprep.subr.bf16.mxu0 %v8651_v60 }
 0x13e   : > { %1458 = vmatprep.subr.bf16.mxu1 %v8654_v61 }
 0x140   : > { %1418 = vmatpush1.bf16.msra.mxu0 %v8649_v62 }
 0x141   : > { %1459 = vmatpush1.bf16.msra.mxu1 %v8652_v63  ;;  %1419 = vmatprep.subr.bf16.mxu0 %v8657_v4  ;;  %v8681_v4 = vld [vmem:[#allocation15 + $0x4] ss:$12 sps:$4 sm:$0xff]  }
 0x142   : > { %1460 = vmatprep.subr.bf16.mxu1 %v8660_v5  ;;  %v8679_v5 = vld [vmem:[#allocation15] ss:$12 sps:$4 sm:$0xff]  }
 0x144   : > { %1420 = vmatpush1.bf16.msra.mxu0 %v8655_v6  ;;  %v8682_v6 = vld [vmem:[#allocation15 + $0x8] ss:$12 sps:$4 sm:$0xff]  }
 0x145   : > { %1461 = vmatpush1.bf16.msra.mxu1 %v8658_v7  ;;  %1421 = vmatprep.subr.bf16.mxu0 %v8663_v9  ;;  %v9889_v7 = vmov 0.0   ;;  %v8683_v9 = vld [vmem:[#allocation15 + $0x18] ss:$12 sps:$4 sm:$0xff]  }
 0x146   : > { %1462 = vmatprep.subr.bf16.mxu1 %v8666_v11  ;;  %v8689_v11 = vld [vmem:[#allocation15 + $0x34] ss:$12 sps:$4 sm:$0xff]  }
 0x148   : > { %1422 = vmatpush1.bf16.msra.mxu0 %v8661_v8  ;;  %v8685_v8 = vld [vmem:[#allocation15 + $0x1c] ss:$12 sps:$4 sm:$0xff]  }
 0x149   : > { %1463 = vmatpush1.bf16.msra.mxu1 %v8664_v10  ;;  %1423 = vmatprep.subr.bf16.mxu0 %v8669_v12  ;;  %v8686_v10 = vld [vmem:[#allocation15 + $0x20] ss:$12 sps:$4 sm:$0xff]   ;;  %v8687_v12 = vld [vmem:[#allocation15 + $0x30] ss:$12 sps:$4 sm:$0xff]  }
 0x14a   : > { %1464 = vmatprep.subr.bf16.mxu1 %v8672_v13  ;;  %v8690_v13 = vld [vmem:[#allocation15 + $0x38] ss:$12 sps:$4 sm:$0xff]  }
 0x14c   : > { %1424 = vmatpush1.bf16.msra.mxu0 %v8667_v14  ;;  %v8693_v14 = vld [vmem:[#allocation15 + $0x4c] ss:$12 sps:$4 sm:$0xff]  }
 0x14d   : > { %1465 = vmatpush1.bf16.msra.mxu1 %v8670_v15  ;;  %1425 = vmatprep.subr.bf16.mxu0 %v8675_v17  ;;  %v8691_v15 = vld [vmem:[#allocation15 + $0x48] ss:$12 sps:$4 sm:$0xff]   ;;  %v8697_v17 = vld [vmem:[#allocation15 + $0x64] ss:$12 sps:$4 sm:$0xff]  }
 0x14e   : > { %1466 = vmatprep.subr.bf16.mxu1 %v8678_v18  ;;  %v8695_v18 = vld [vmem:[#allocation15 + $0x60] ss:$12 sps:$4 sm:$0xff]  }
 0x150   : > { %1426 = vmatpush1.bf16.msra.mxu0 %v8673_v20  ;;  %v8701_v20 = vld [vmem:[#allocation15 + $0x7c] ss:$12 sps:$4 sm:$0xff]  }
 0x151   : > { %1467 = vmatpush1.bf16.msra.mxu1 %v8676_v21  ;;  %1683 = vmatprep.subr.bf16.mxu0 %v8681_v4  ;;  %v8699_v21 = vld [vmem:[#allocation15 + $0x78] ss:$12 sps:$4 sm:$0xff]  }
 0x152   : > { %8197 = vmatprep.subr.bf16.mxu1 %v9889_v7 }
 0x1e6   : > { %v911_v29 = vpop.f32.mrb[0].mxu0 }
 0x1e7   : > { %v912_v30 = vadd.f32 %v911_v29, %v540_v26  ;;  %v913_v31 = vpop.f32.mrb[1].mxu0  ;;  %v952_v39 = vpop.f32.mrb[0].mxu1  ;;  %v8705_v26 = vld [vmem:[#allocation15 + $0x94] ss:$12 sps:$4 sm:$0xff]   ;;  %v8703_v29 = vld [vmem:[#allocation15 + $0x90] ss:$12 sps:$4 sm:$0xff]  }
 0x1e8   : > { %v914_v32 = vadd.f32 %v913_v31, %v544_v27  ;;  %v915_v33 = vpop.f32.mrb[2].mxu0  ;;  %v954_v40 = vpop.f32.mrb[1].mxu1  ;;  %v953_v46 = vadd.f32 %v952_v39, %v548_v43  ;;  %v9890_v27 = vmov 0   ;;  %v8709_v31 = vld [vmem:[#allocation15 + $0xac] ss:$12 sps:$4 sm:$0xff]  }
 0x1e9   : > { %v7301_v34 = vmul.f32 -1.442695, %v912_v30  ;;  %v916_v35 = vpop.f32.mrb[3].mxu0  ;;  %v955_v41 = vadd.f32 %v954_v40, %v552_v36  ;;  %v956_v42 = vpop.f32.mrb[2].mxu1  ;;  %v8706_v30 = vld [vmem:[#allocation15 + $0x98] ss:$12 sps:$4 sm:$0xff]  }
 0x1ea   : > { %v7302_v37 = vmul.f32 -1.442695, %v914_v32  ;;  %v957_v44 = vpop.f32.mrb[3].mxu1  ;;  %v8707_v32 = vld [vmem:[#allocation15 + $0xa8] ss:$12 sps:$4 sm:$0xff]  }
 0x1eb   : > { %8735 = vpow2.f32 %v7301_v34  ;;  %v7303_v45 = vmul.f32 -1.442695, %v955_v41  ;;  %v8710_v33 = vld [vmem:[#allocation15 + $0xb0] ss:$12 sps:$4 sm:$0xff]   ;;  %v1053_v34 = vld [vmem:[%s10617_s6] sm:$0xf] }
 0x1ec   : > { %8737 = vpow2.f32 %v7302_v37  ;;  %v1058_v35 = vrot.slane %v1053_v34, %v10266_v23  ;;  %v1062_v36 = vrot.slane %v1053_v34, %v10272_v25 }
 0x1ed   : > { %8739 = vpow2.f32 %v7303_v45 }
 0x1ee   : > { %8741 = vtanh.f32 %v953_v46 }
 0x1f5   : > { %v8736_v47 = vpop.eup %8735 }
 0x1f6   : > { %v8738_v48 = vpop.eup %8737  ;;  %v962_v49 = vadd.f32 1.0, %v8736_v47 }
 0x1f7   : > { %v968_v50 = vadd.f32 1.0, %v8738_v48  ;;  %v8740_v51 = vpop.eup %8739 }
 0x1f8   : > { %8743 = vrcp.f32 %v962_v49  ;;  %v8742_v52 = vpop.eup %8741  ;;  %v975_v55 = vadd.f32 1.0, %v8740_v51 }
 0x1f9   : > { %8745 = vrcp.f32 %v968_v50  ;;  %v1070_v50 = vrot.slane %v1053_v34, %v551_v28 }
 0x1fa   : > { %8747 = vrcp.f32 %v975_v55 }
 0x202   : > { %v8744_v54 = vpop.eup %8743 }
 0x203   : > { %v8746_v56 = vpop.eup %8745  ;;  %v979_v57 = vmul.f32 %v8744_v54, %v8742_v52  ;;  %v1066_v52 = vrot.slane %v1053_v34, %v10280_v38 }
 0x204   : > { %v978_v58 = vmul.f32 %v8746_v56, %v469_v53  ;;  %v8748_v60 = vpop.eup %8747 }
 0x206   : > { %v980_v59 = vadd.f32 %v979_v57, %v978_v58 }
 0x208   : > { %8749 = vtanh.f32 %v980_v59  ;;  %1502 = vst [vmem:[#allocation3] sm:$0xff] %v980_v59 }
 0x212   : > { %v8750_v61 = vpop.eup %8749 }
 0x213   : > { %v982_v62 = vmul.f32 %v8750_v61, %v8748_v60  ;;  %v987_v61 = vld [vmem:[#allocation3 + $0x8] sm:$0xff] }
 0x215   : > { %v983_v63 = vpack.c.bf16 %v982_v62, %v982_v62  ;;  %1501 = vst [vmem:[#allocation2] sm:$0xff] %v982_v62 }
 0x217   : > { %1428 = vmatmul.mubr.bf16.vlgmr.msra.gmra.mrb[4].mxu0 %v983_v63  ;;  %1469 = vmatmul.mubr.bf16.vlgmr.msra.gmra.mrb[4].mxu1 %v983_v63 }
 0x218   : > { %1684 = vmatpush1.bf16.msra.mxu0 %v8679_v5  ;;  %8198 = vmatpush3.bf16.msra.mxu1 %v8682_v6 }
 0x219   : > { %8199 = vmatprep.subr.bf16.mxu1 %v9889_v7  ;;  %1685 = vmatprep.subr.bf16.mxu0 %v8685_v8 }
 0x21a   : > { %1715 = vmatprep.mubr.bf16.mxu0 %v9890_v27  ;;  %8213 = vmatprep.mubr.msk.bf16.mxu1 %vm9891_vm1, %v9889_v7 }
 0x21c   : > { %1686 = vmatpush1.bf16.msra.mxu0 %v8683_v9  ;;  %8200 = vmatpush3.bf16.msra.mxu1 %v8686_v10 }
 0x21d   : > { %8201 = vmatprep.subr.bf16.mxu1 %v9889_v7  ;;  %1687 = vmatprep.subr.bf16.mxu0 %v8689_v11  ;;  %v1538_v11 = vld [vmem:[%s10619_s8] sm:$0x7] }
 0x220   : > { %1688 = vmatpush1.bf16.msra.mxu0 %v8687_v12  ;;  %8202 = vmatpush3.bf16.msra.mxu1 %v8690_v13  ;;  %v1543_v12 = vrot.slane %v1538_v11, %v10266_v23  ;;  %v1551_v13 = vrot.slane %v1538_v11, %v10280_v38 }
 0x221   : > { %8203 = vmatprep.subr.bf16.mxu1 %v9889_v7  ;;  %1689 = vmatprep.subr.bf16.mxu0 %v8693_v14  ;;  %v1547_v14 = vrot.slane %v1538_v11, %v10272_v25 }
 0x224   : > { %1690 = vmatpush1.bf16.msra.mxu0 %v8691_v15  ;;  %8204 = vmatpush3.bf16.msra.mxu1 %v8694_v16 }
 0x225   : > { %8205 = vmatprep.subr.bf16.mxu1 %v9889_v7  ;;  %1691 = vmatprep.subr.bf16.mxu0 %v8697_v17 }
 0x228   : > { %1692 = vmatpush1.bf16.msra.mxu0 %v8695_v18  ;;  %8206 = vmatpush3.bf16.msra.mxu1 %v8698_v19 }
 0x229   : > { %1693 = vmatprep.subr.bf16.mxu0 %v8701_v20  ;;  %8207 = vmatprep.subr.bf16.mxu1 %v9889_v7 }
 0x22c   : > { %1694 = vmatpush1.bf16.msra.mxu0 %v8699_v21  ;;  %8208 = vmatpush3.bf16.msra.mxu1 %v8702_v24 }
 0x22d   : > { %1695 = vmatprep.subr.bf16.mxu0 %v8705_v26  ;;  %8209 = vmatprep.subr.bf16.mxu1 %v9889_v7 }
 0x230   : > { %1696 = vmatpush1.bf16.msra.mxu0 %v8703_v29  ;;  %8210 = vmatpush3.bf16.msra.mxu1 %v8706_v30 }
 0x231   : > { %1697 = vmatprep.subr.bf16.mxu0 %v8709_v31  ;;  %8211 = vmatprep.subr.bf16.mxu1 %v9889_v7 }
 0x234   : > { %1698 = vmatpush1.bf16.msra.mxu0 %v8707_v32  ;;  %8212 = vmatpush3.bf16.msra.mxu1 %v8710_v33 }
 0x235   : > { %8217 = vmatprep.subr.bf16.mxu1 %v9889_v7 }
 0x2ea   : > { %v1429_v37 = vpop.f32.mrb[4].mxu0  ;;  %v1470_v39 = vpop.f32.mrb[4].mxu1 }
 0x2eb   : > { %v1430_v40 = vadd.f32 %v1429_v37, %v1058_v35  ;;  %v1431_v41 = vpop.f32.mrb[5].mxu0  ;;  %v1472_v42 = vpop.f32.mrb[5].mxu1  ;;  %v1471_v54 = vadd.f32 %v1470_v39, %v1066_v52  ;;  %v8711_v39 = vld [vmem:[#allocation16 + $0x40] sm:$0xff]  }
 0x2ec   : > { %v1432_v43 = vadd.f32 %v1431_v41, %v1062_v36  ;;  %v1433_v44 = vpop.f32.mrb[6].mxu0  ;;  %v1474_v45 = vpop.f32.mrb[6].mxu1  ;;  %v1473_v51 = vadd.f32 %v1472_v42, %v1070_v50  ;;  %v8713_v41 = vld [vmem:[#allocation16] sm:$0xff]   ;;  %v8714_v42 = vld [vmem:[#allocation16 + $0x48] sm:$0xff]   ;;  %8046 = vmatprep.subr.bf16.mxu0 %v8711_v39  ;;  %v8722_v50 = vld [vmem:[#allocation16 + $0x18] sm:$0xff]  }
 0x2ed   : > { %v7368_v46 = vmul.f32 -1.442695, %v1430_v40  ;;  %v1434_v47 = vpop.f32.mrb[7].mxu0  ;;  %v1475_v48 = vpop.f32.mrb[7].mxu1  ;;  %v8712_v40 = vld [vmem:[#allocation16 + $0x80] sm:$0xff]   ;;  %v8716_v44 = vld [vmem:[#allocation16 + $0x8] sm:$0xff]  }
 0x2ee   : > { %v7369_v49 = vmul.f32 -1.442695, %v1432_v43  ;;  %v7370_v53 = vmul.f32 -1.442695, %v1473_v51  ;;  %v8715_v43 = vld [vmem:[#allocation16 + $0x88] sm:$0xff]   ;;  %v8717_v45 = vld [vmem:[#allocation16 + $0x50] sm:$0xff]  }
 0x2ef   : > { %8751 = vpow2.f32 %v7368_v46  ;;  %v8718_v46 = vld [vmem:[#allocation16 + $0x90] sm:$0xff]   ;;  %v8720_v48 = vld [vmem:[#allocation16 + $0x58] sm:$0xff]   ;;  %v8723_v51 = vld [vmem:[#allocation16 + $0x60] sm:$0xff]  }
 0x2f0   : > { %8753 = vpow2.f32 %v7369_v49  ;;  %v8719_v47 = vld [vmem:[#allocation16 + $0x10] sm:$0xff]   ;;  %v8721_v49 = vld [vmem:[#allocation16 + $0x98] sm:$0xff]   ;;  %v8724_v52 = vld [vmem:[#allocation16 + $0xa0] sm:$0xff]  }
 0x2f1   : > { %8755 = vpow2.f32 %v7370_v53  ;;  %v8725_v53 = vld [vmem:[#allocation16 + $0x20] sm:$0xff]  }
 0x2f2   : > { %8757 = vtanh.f32 %v1471_v54  ;;  %v8726_v54 = vld [vmem:[#allocation16 + $0x68] sm:$0xff]  }
 0x2f9   : > { %v8752_v55 = vpop.eup %8751 }
 0x2fa   : > { %v8754_v56 = vpop.eup %8753  ;;  %v1480_v57 = vadd.f32 1.0, %v8752_v55  ;;  %v8727_v55 = vld [vmem:[#allocation16 + $0xa8] sm:$0xff]  }
 0x2fb   : > { %v1486_v58 = vadd.f32 1.0, %v8754_v56  ;;  %v8756_v59 = vpop.eup %8755  ;;  %v8728_v56 = vld [vmem:[#allocation16 + $0x28] sm:$0xff]  }
 0x2fc   : > { %8759 = vrcp.f32 %v1480_v57  ;;  %v8758_v60 = vpop.eup %8757  ;;  %v1493_v63 = vadd.f32 1.0, %v8756_v59  ;;  %v8729_v57 = vld [vmem:[#allocation16 + $0x70] sm:$0xff]  }
 0x2fd   : > { %8761 = vrcp.f32 %v1486_v58  ;;  %v8730_v58 = vld [vmem:[#allocation16 + $0xb0] sm:$0xff]  }
 0x2fe   : > { %8763 = vrcp.f32 %v1493_v63  ;;  %v8733_v63 = vld [vmem:[#allocation16 + $0xb8] sm:$0xff]  }
 0x306   : > { %v8760_v22 = vpop.eup %8759 }
 0x307   : > { %v8762_v28 = vpop.eup %8761  ;;  %v1497_v62 = vmul.f32 %v8760_v22, %v8758_v60 }
 0x308   : > { %v1496_v4 = vmul.f32 %v8762_v28, %v987_v61  ;;  %v8764_v6 = vpop.eup %8763  ;;  %v8731_v28 = vld [vmem:[#allocation16 + $0x30] sm:$0xff]  }
 0x30a   : > { %v1498_v5 = vadd.f32 %v1497_v62, %v1496_v4  ;;  %v8732_v62 = vld [vmem:[#allocation16 + $0x78] sm:$0xff]  }
 0x30b   : > { %v8734_v4 = vld [vmem:[#allocation16 + $0x38] sm:$0xff]  }
 0x30c   : > { %8765 = vtanh.f32 %v1498_v5  ;;  %1504 = vst [vmem:[#allocation3 + $0x8] sm:$0xff] %v1498_v5 }
 0x316   : > { %v8766_v8 = vpop.eup %8765 }
 0x317   : > { %v1500_v9 = vmul.f32 %v8766_v8, %v8764_v6 }
 0x319   : > { %1503 = vst [vmem:[#allocation2 + $0x8] sm:$0xff] %v1500_v9  ;;  %v1505_v10 = vpack.c.bf16 %v1500_v9, %v1500_v9 }
 0x31b   : > { %1716 = vmatmul.mubr.bf16.vlgmr.msra.gmra.mrb[8].mxu0 %v1505_v10  ;;  %8214 = vmatmul.mubr.bf16.vlgmr.msra.gmra.mrb[8].mxu1 %v1505_v10  ;;  %v9892_v10 = vmov 1.0|1.0  }
 0x31c   : > { %8233 = vmatprep.mubr.msk.bf16.mxu1 %vm9891_vm1, %v9889_v7  ;;  %8218 = vmatpush3.bf16.msra.mxu1 %v8712_v40 }
 0x31d   : > { %8047 = vmatpush3.bf16.msra.mxu0 %v8713_v41  ;;  %8219 = vmatprep.subr.bf16.mxu1 %v9889_v7 }
 0x31e   : > { %8048 = vmatprep.subr.bf16.mxu0 %v8714_v42 }
 0x320   : > { %8220 = vmatpush3.bf16.msra.mxu1 %v8715_v43 }
 0x321   : > { %8049 = vmatpush3.bf16.msra.mxu0 %v8716_v44  ;;  %8221 = vmatprep.subr.bf16.mxu1 %v9889_v7 }
 0x322   : > { %8050 = vmatprep.subr.bf16.mxu0 %v8717_v45 }
 0x324   : > { %8222 = vmatpush3.bf16.msra.mxu1 %v8718_v46 }
 0x325   : > { %8051 = vmatpush3.bf16.msra.mxu0 %v8719_v47  ;;  %8223 = vmatprep.subr.bf16.mxu1 %v9889_v7 }
 0x326   : > { %8052 = vmatprep.subr.bf16.mxu0 %v8720_v48 }
 0x328   : > { %8224 = vmatpush3.bf16.msra.mxu1 %v8721_v49 }
 0x329   : > { %8053 = vmatpush3.bf16.msra.mxu0 %v8722_v50  ;;  %8225 = vmatprep.subr.bf16.mxu1 %v9889_v7 }
 0x32a   : > { %8054 = vmatprep.subr.bf16.mxu0 %v8723_v51 }
 0x32c   : > { %8226 = vmatpush3.bf16.msra.mxu1 %v8724_v52 }
 0x32d   : > { %8055 = vmatpush3.bf16.msra.mxu0 %v8725_v53  ;;  %8227 = vmatprep.subr.bf16.mxu1 %v9889_v7 }
 0x32e   : > { %8056 = vmatprep.subr.bf16.mxu0 %v8726_v54 }
 0x330   : > { %8228 = vmatpush3.bf16.msra.mxu1 %v8727_v55 }
 0x331   : > { %8057 = vmatpush3.bf16.msra.mxu0 %v8728_v56  ;;  %8229 = vmatprep.subr.bf16.mxu1 %v9889_v7 }
 0x332   : > { %8058 = vmatprep.subr.bf16.mxu0 %v8729_v57 }
 0x334   : > { %8230 = vmatpush3.bf16.msra.mxu1 %v8730_v58 }
 0x335   : > { %8231 = vmatprep.subr.bf16.mxu1 %v9889_v7  ;;  %8059 = vmatpush3.bf16.msra.mxu0 %v8731_v28 }
 0x336   : > { %8060 = vmatprep.subr.bf16.mxu0 %v8732_v62 }
 0x338   : > { %8232 = vmatpush3.bf16.msra.mxu1 %v8733_v63 }
 0x339   : > { %8061 = vmatpush3.bf16.msra.mxu0 %v8734_v4 }
 0x3ee   : > { %v1717_v15 = vpop.f32.mrb[8].mxu0  ;;  %v1758_v16 = vpop.f32.mrb[8].mxu1 }
 0x3ef   : > { %v1718_v17 = vadd.f32 %v1717_v15, %v1543_v12  ;;  %v1759_v18 = vadd.f32 %v1758_v16, %v1551_v13  ;;  %v1719_v19 = vpop.f32.mrb[9].mxu0  ;;  %v8215_v20 = vpop.f32.mrb[9].mxu1 }
 0x3f0   : > { %v1720_v21 = vadd.f32 %v1719_v19, %v1547_v14  ;;  %v1721_v24 = vpop.f32.mrb[10].mxu0  ;;  %v1761_v26 = vpop.f32.mrb[10].mxu1 }
 0x3f1   : > { %1764 = vst [vmem:[%s10253_s15] sm:$0xff] %v1718_v17  ;;  %1766 = vst [vmem:[%s10253_s15 + $0x10] sm:$0xff] %v1759_v18  ;;  %v1722_v27 = vpop.f32.mrb[11].mxu0  ;;  %v8216_v23 = vpop.f32.mrb[11].mxu1  ;;  %v1772_v29 = vsel %vm1769_vm2, %v1759_v18, -inf  ;;  %v2088_v24 = vld [vmem:[%s10222_s11] sm:$0xf] }
 0x3f2   : > { %1765 = vst [vmem:[%s10253_s15 + $0x8] sm:$0xff] %v1720_v21  ;;  %v1773_v38 = vmax.f32 %v1718_v17, %v1720_v21 }
 0x3f4   : > { %v1774_v30 = vmax.f32 %v1773_v38, %v1772_v29 }
 0x3f6   : > { %1775 = vmax.xlane.f32.xlu0 %v1774_v30 }
 0x483   : > { %v1776_v25 = vpop.xlane.xlu0 %1775 }
 0x484   : > { %vm1777_vm3 = vcmp.eq.f32.partialorder %v1718_v17, %v1776_v25  ;;  %vm1778_vm4 = vcmp.eq.f32.partialorder %v1720_v21, %v1776_v25  ;;  %vm1779_vm5 = vcmp.eq.f32.partialorder %v1772_v29, %v1776_v25  ;;  %v2090_v17 = vstv %s2089_s23 }
 0x485   : > { %v1780_v31 = vsel %vm1777_vm3, %v10245_v1, 384  ;;  %v1781_v32 = vsel %vm1778_vm4, %v10248_v2, 384  ;;  %v1782_v33 = vsel %vm1779_vm5, %v10251_v3, 384  ;;  %vm2091_vm15 = vcmp.eq.s32.totalorder %v2090_v17, 1 }
 0x486   : > { %vm1783_vm6 = vcmp.lt.s32.totalorder %v1780_v31, %v1781_v32 }
 0x487   : > { %v1784_v34 = vsel %vm1783_vm6, %v1780_v31, %v1781_v32 }
 0x488   : > { %vm1785_vm7 = vcmp.lt.s32.totalorder %v1784_v34, %v1782_v33 }
 0x489   : > { %v1786_v35 = vsel %vm1785_vm7, %v1784_v34, %v1782_v33 }
 0x48a   : > { %v1788_v36 = vshra.s32 %v1786_v35, 16  ;;  %v1787_v59 = vand.u32 65535, %v1786_v35 }
 0x48c   : > { %v1790_v37 = vcvt.s32.f32 %v1788_v36  ;;  %v1789_v61 = vcvt.s32.f32 %v1787_v59 }
 0x48e   : > { %1791 = vmin.xlane.f32.xlu0 %v1790_v37 }
 0x51b   : > { %v1792_v60 = vpop.xlane.xlu0 %1791 }
 0x51c   : > { %vm1793_vm8 = vcmp.eq.f32.partialorder %v1790_v37, %v1792_v60  ;;  %v1798_v5 = vcvt.f32.s32 %v1792_v60 }
 0x51d   : > { %v1794_v22 = vsel %vm1793_vm8, %v1789_v61, inf }
 0x51e   : > { %1795 = vmin.xlane.f32.xlu1 %v1794_v22  ;;  %v1799_v8 = vshll.u32 %v1798_v5, 16 }
 0x5ab   : > { %v1796_v6 = vpop.xlane.xlu1 %1795 }
 0x5ac   : > { %v1797_v9 = vcvt.f32.s32 %v1796_v6 }
 0x5ae   : > { %v1800_v7 = vadd.s32 %v1799_v8, %v1797_v9 }
 0x5b0   : > { %vm1802_vm9 = vcmp.eq.s32.totalorder %v10248_v2, %v1800_v7  ;;  %vm1803_vm10 = vcmp.eq.s32.totalorder %v10251_v3, %v1800_v7  ;;  %vm1801_vm11 = vcmp.eq.s32.totalorder %v10245_v1, %v1800_v7 }
 0x5b1   : > { %vm7422_vm12 = vmpackc.low %vm1802_vm9, %vm1802_vm9 }
 0x5b2   : > { %7423 = vmatprep.mubr.msk.bf16.mxu0 %vm7422_vm12, %v9892_v10  ;;  %vm7426_vm13 = vmpackc.low %vm1803_vm10, %vm1803_vm10 }
 0x5b3   : > { %8234 = vmatmul.mubr.msk.bf16.vlgmr.msra.gmra.mrb[12].mxu1 %vm7426_vm13, %v9892_v10  ;;  %vm7424_vm14 = vmpackc.low %vm1801_vm11, %vm1801_vm11 }
 0x5b4   : > { %7425 = vmatmul.mubr.msk.bf16.vlgmr.msra.gmra.mrb[12].mxu0 %vm7424_vm14, %v9892_v10 }
 0x686   : > { %v2079_v11 = vpop.f32.mrb[12].mxu1 }
 0x687   : > { %v8062_v12 = vpop.f32.mrb[12].mxu0  ;;  %v8235_v13 = vpop.f32.mrb[13].mxu1 }
 0x688   : > { %v8063_v14 = vpop.f32.mrb[13].mxu0  ;;  %v2082_v15 = vpop.f32.mrb[14].mxu1 }
 0x689   : > { %v8064_v16 = vadd.f32 %v8063_v14, %v8062_v12  ;;  %v8065_v18 = vpop.f32.mrb[14].mxu0  ;;  %v8236_v19 = vpop.f32.mrb[15].mxu1 }
 0x68a   : > { %v8066_v20 = vpop.f32.mrb[15].mxu0 }
 0x68b   : > { %v2080_v21 = vadd.f32 %v8064_v16, %v2079_v11 }
 0x68d   : > { %v2085_v26 = vpack.c.bf16 %v2080_v21, %v2080_v21 }
 0x68f   : > { %v2092_v27 = vsel %vm2091_vm15, %v2088_v24, %v2085_v26 }
 0x690   : > { %2093 = vst [vmem:[#allocation4] sm:$0xf] %v2092_v27 }
 0x691 PF: > { %s10330_s12 = sadd.s32 1, %s10242_s30 }
 0x692   : > { %p7428_p12 = scmp.ne.s32.totalorder %s10330_s12, 0 }
 0x693   : > { %v2099_v23 = vld [vmem:[#allocation7] sm:$0xff] (!%p7428_p12)  ;;  %v2100_v38 = vld [vmem:[#allocation7 + $0x8] sm:$0xff] (!%p7428_p12)  ;;  %vm2109_vm0 = vcmp.eq.s32.totalorder (!%p7428_p12), %v10245_v1, 1  ;;  %v9893_v30 = vmov (!%p7428_p12), 0.0  }
 0x694   : > { %2098 = sbr.rel (%p7428_p12) target bundleno = 1691 (0x69b), region = 92  ;;  %v2107_v29 = vld [vmem:[%s10222_s11] sm:$0xf] (!%p7428_p12)  ;;  %2101 = vst [vmem:[#allocation2] sm:$0xff] (!%p7428_p12), %v2099_v23  ;;  %2102 = vst [vmem:[#allocation2 + $0x8] sm:$0xff] (!%p7428_p12), %v2100_v38  ;;  %v7429_v25 = vsel (!%p7428_p12), %vm2109_vm0, 1.0, %v9893_v30 }
 0x695   : > { %2105 = vst [vmem:[#allocation3] sm:$0xff] (!%p7428_p12), %v2099_v23  ;;  %2106 = vst [vmem:[#allocation3 + $0x8] sm:$0xff] (!%p7428_p12), %v2100_v38 }
 0x696   : > { %2108 = vst [vmem:[#allocation4] sm:$0xf] (!%p7428_p12), %v2107_v29  ;;  %7431 = vst [vmem:[%s10253_s15 + $0x20] sm:$0xff] (!%p7428_p12), %v9893_v30 }
 0x697   : > { %7432 = vst [vmem:[%s10253_s15 + $0x28] sm:$0xff] (!%p7428_p12), %v9893_v30  ;;  %7430 = vst [vmem:[%s10253_s15 + $0x18] sm:$0xff] (!%p7428_p12), %v7429_v25 }
 0x69b PF: > { %p7433_p3 = scmp.le.s32.totalorder %s10330_s12, 0 }
 0x69c   : > { %v8767_v31 = vld [vmem:[#allocation12 + $0x4] ss:$16 sps:$4 sm:$0xff] (!%p7433_p3)   ;;  %v8769_v32 = vld [vmem:[#allocation12] ss:$16 sps:$4 sm:$0xff] (!%p7433_p3)   ;;  %v8778_v36 = vld [vmem:[#allocation12 + $0xc] ss:$16 sps:$4 sm:$0xff] (!%p7433_p3)  }
 0x69d   : > { %2125 = sbr.rel (%p7433_p3) target bundleno = 3163 (0xc5b), region = 96  ;;  %2536 = vmatprep.subr.bf16.mxu0 (!%p7433_p3), %v8767_v31  ;;  %v8770_v33 = vld [vmem:[#allocation12 + $0x24] ss:$16 sps:$4 sm:$0xff] (!%p7433_p3)   ;;  %v8772_v34 = vld [vmem:[#allocation12 + $0x20] ss:$16 sps:$4 sm:$0xff] (!%p7433_p3)   ;;  %2577 = vmatprep.subr.bf16.mxu1 (!%p7433_p3), %v8778_v36  ;;  %vm9896_vm1 = vmmov (!%p7433_p3), 0  }
 0x69e   : > { %2537 = vmatpush1.bf16.msra.mxu0 (!%p7433_p3), %v8769_v32  ;;  %v8773_v35 = vld [vmem:[#allocation12 + $0x44] ss:$16 sps:$4 sm:$0xff] (!%p7433_p3)   ;;  %v8781_v37 = vld [vmem:[#allocation12 + $0x8] ss:$16 sps:$4 sm:$0xff] (!%p7433_p3)   ;;  %v8775_v39 = vld [vmem:[#allocation12 + $0x40] ss:$16 sps:$4 sm:$0xff] (!%p7433_p3)  }
 0x69f   : > { %2538 = vmatprep.subr.bf16.mxu0 (!%p7433_p3), %v8770_v33  ;;  %v8776_v40 = vld [vmem:[#allocation12 + $0x64] ss:$16 sps:$4 sm:$0xff] (!%p7433_p3)   ;;  %2578 = vmatpush1.bf16.msra.mxu1 (!%p7433_p3), %v8781_v37  ;;  %v8784_v41 = vld [vmem:[#allocation12 + $0x2c] ss:$16 sps:$4 sm:$0xff] (!%p7433_p3)   ;;  %v8787_v42 = vld [vmem:[#allocation12 + $0x28] ss:$16 sps:$4 sm:$0xff] (!%p7433_p3)  }
 0x6a0   : > { %2579 = vmatprep.subr.bf16.mxu1 (!%p7433_p3), %v8784_v41  ;;  %v8780_v43 = vld [vmem:[#allocation12 + $0x60] ss:$16 sps:$4 sm:$0xff] (!%p7433_p3)   ;;  %v8782_v44 = vld [vmem:[#allocation12 + $0x84] ss:$16 sps:$4 sm:$0xff] (!%p7433_p3)   ;;  %v8790_v45 = vld [vmem:[#allocation12 + $0x4c] ss:$16 sps:$4 sm:$0xff] (!%p7433_p3)  }
 0x6a1   : > { %v8793_v46 = vld [vmem:[#allocation12 + $0x48] ss:$16 sps:$4 sm:$0xff] (!%p7433_p3)   ;;  %v8796_v47 = vld [vmem:[#allocation12 + $0x6c] ss:$16 sps:$4 sm:$0xff] (!%p7433_p3)   ;;  %v8786_v48 = vld [vmem:[#allocation12 + $0x80] ss:$16 sps:$4 sm:$0xff] (!%p7433_p3)  }
 0x6a2   : > { %2539 = vmatpush1.bf16.msra.mxu0 (!%p7433_p3), %v8772_v34  ;;  %v8788_v49 = vld [vmem:[#allocation12 + $0xa4] ss:$16 sps:$4 sm:$0xff] (!%p7433_p3)   ;;  %v8799_v50 = vld [vmem:[#allocation12 + $0x68] ss:$16 sps:$4 sm:$0xff] (!%p7433_p3)   ;;  %v8802_v51 = vld [vmem:[#allocation12 + $0x8c] ss:$16 sps:$4 sm:$0xff] (!%p7433_p3)  }
 0x6a3   : > { %2540 = vmatprep.subr.bf16.mxu0 (!%p7433_p3), %v8773_v35  ;;  %2580 = vmatpush1.bf16.msra.mxu1 (!%p7433_p3), %v8787_v42  ;;  %v8792_v52 = vld [vmem:[#allocation12 + $0xa0] ss:$16 sps:$4 sm:$0xff] (!%p7433_p3)   ;;  %v8794_v53 = vld [vmem:[#allocation12 + $0xc4] ss:$16 sps:$4 sm:$0xff] (!%p7433_p3)   ;;  %v8805_v54 = vld [vmem:[#allocation12 + $0x88] ss:$16 sps:$4 sm:$0xff] (!%p7433_p3)  }
 0x6a4   : > { %2581 = vmatprep.subr.bf16.mxu1 %v8790_v45  ;;  %v8808_v55 = vld [vmem:[#allocation12 + $0xac] ss:$16 sps:$4 sm:$0xff]   ;;  %v8798_v56 = vld [vmem:[#allocation12 + $0xc0] ss:$16 sps:$4 sm:$0xff]   ;;  %v8800_v57 = vld [vmem:[#allocation12 + $0xe4] ss:$16 sps:$4 sm:$0xff]  }
 0x6a5   : > { %v8811_v58 = vld [vmem:[#allocation12 + $0xa8] ss:$16 sps:$4 sm:$0xff]   ;;  %v8814_v59 = vld [vmem:[#allocation12 + $0xcc] ss:$16 sps:$4 sm:$0xff]   ;;  %v8804_v60 = vld [vmem:[#allocation12 + $0xe0] ss:$16 sps:$4 sm:$0xff]  }
 0x6a6   : > { %2541 = vmatpush1.bf16.msra.mxu0 %v8775_v39  ;;  %v8806_v61 = vld [vmem:[#allocation12 + $0x104] ss:$16 sps:$4 sm:$0xff]   ;;  %v8817_v22 = vld [vmem:[#allocation12 + $0xc8] ss:$16 sps:$4 sm:$0xff]   ;;  %v8820_v28 = vld [vmem:[#allocation12 + $0xec] ss:$16 sps:$4 sm:$0xff]  }
 0x6a7   : > { %2542 = vmatprep.subr.bf16.mxu0 %v8776_v40  ;;  %2582 = vmatpush1.bf16.msra.mxu1 %v8793_v46  ;;  %v8810_v62 = vld [vmem:[#allocation12 + $0x100] ss:$16 sps:$4 sm:$0xff]   ;;  %v8812_v63 = vld [vmem:[#allocation12 + $0x124] ss:$16 sps:$4 sm:$0xff]   ;;  %v8823_v4 = vld [vmem:[#allocation12 + $0xe8] ss:$16 sps:$4 sm:$0xff]  }
 0x6a8   : > { %2583 = vmatprep.subr.bf16.mxu1 %v8796_v47  ;;  %v8826_v5 = vld [vmem:[#allocation12 + $0x10c] ss:$16 sps:$4 sm:$0xff]   ;;  %v8816_v6 = vld [vmem:[#allocation12 + $0x120] ss:$16 sps:$4 sm:$0xff]   ;;  %v8818_v8 = vld [vmem:[#allocation12 + $0x144] ss:$16 sps:$4 sm:$0xff]  }
 0x6a9   : > { %v8829_v9 = vld [vmem:[#allocation12 + $0x108] ss:$16 sps:$4 sm:$0xff]   ;;  %v8832_v7 = vld [vmem:[#allocation12 + $0x12c] ss:$16 sps:$4 sm:$0xff]   ;;  %v8822_v11 = vld [vmem:[#allocation12 + $0x140] ss:$16 sps:$4 sm:$0xff]  }
 0x6aa   : > { %2543 = vmatpush1.bf16.msra.mxu0 %v8780_v43  ;;  %v2127_v10 = vld [vmem:[#allocation2] sm:$0xff]  ;;  %v8824_v13 = vld [vmem:[#allocation12 + $0x164] ss:$16 sps:$4 sm:$0xff]   ;;  %v8835_v14 = vld [vmem:[#allocation12 + $0x128] ss:$16 sps:$4 sm:$0xff]   ;;  %vm3429_vm2 = vcmp.lt.s32.totalorder %v10251_v3, 322 }
 0x6ab   : > { %2544 = vmatprep.subr.bf16.mxu0 %v8782_v44  ;;  %2584 = vmatpush1.bf16.msra.mxu1 %v8799_v50  ;;  %v2129_v12 = vpack.c.bf16 %v2127_v10, %v2127_v10  ;;  %v8838_v15 = vld [vmem:[#allocation12 + $0x14c] ss:$16 sps:$4 sm:$0xff]   ;;  %v8828_v16 = vld [vmem:[#allocation12 + $0x160] ss:$16 sps:$4 sm:$0xff]   ;;  %v8830_v17 = vld [vmem:[#allocation12 + $0x184] ss:$16 sps:$4 sm:$0xff]  }
 0x6ac   : > { %2585 = vmatprep.subr.bf16.mxu1 %v8802_v51  ;;  %v8841_v18 = vld [vmem:[#allocation12 + $0x148] ss:$16 sps:$4 sm:$0xff]   ;;  %v8844_v19 = vld [vmem:[#allocation12 + $0x16c] ss:$16 sps:$4 sm:$0xff]   ;;  %v8834_v20 = vld [vmem:[#allocation12 + $0x180] ss:$16 sps:$4 sm:$0xff]  }
 0x6ad   : > { %2568 = vmatprep.mubr.bf16.mxu0 %v2129_v12  ;;  %2609 = vmatprep.mubr.bf16.mxu1 %v2129_v12  ;;  %v8836_v21 = vld [vmem:[#allocation12 + $0x1a4] ss:$16 sps:$4 sm:$0xff]   ;;  %v8847_v24 = vld [vmem:[#allocation12 + $0x168] ss:$16 sps:$4 sm:$0xff]   ;;  %v8850_v26 = vld [vmem:[#allocation12 + $0x18c] ss:$16 sps:$4 sm:$0xff]  }
 0x6ae   : > { %2545 = vmatpush1.bf16.msra.mxu0 %v8786_v48  ;;  %v8840_v27 = vld [vmem:[#allocation12 + $0x1a0] ss:$16 sps:$4 sm:$0xff]   ;;  %v8842_v23 = vld [vmem:[#allocation12 + $0x1c4] ss:$16 sps:$4 sm:$0xff]   ;;  %v8853_v38 = vld [vmem:[#allocation12 + $0x188] ss:$16 sps:$4 sm:$0xff]  }
 0x6af   : > { %2546 = vmatprep.subr.bf16.mxu0 %v8788_v49  ;;  %2586 = vmatpush1.bf16.msra.mxu1 %v8805_v54  ;;  %v8846_v29 = vld [vmem:[#allocation12 + $0x1c0] ss:$16 sps:$4 sm:$0xff]   ;;  %v8854_v30 = vld [vmem:[#allocation12 + $0x1ac] ss:$16 sps:$4 sm:$0xff]   ;;  %v8848_v25 = vld [vmem:[#allocation12 + $0x1e4] ss:$16 sps:$4 sm:$0xff]  }
 0x6b0   : > { %2587 = vmatprep.subr.bf16.mxu1 %v8808_v55  ;;  %v8856_v31 = vld [vmem:[#allocation12 + $0x1a8] ss:$16 sps:$4 sm:$0xff]   ;;  %v8857_v32 = vld [vmem:[#allocation12 + $0x1cc] ss:$16 sps:$4 sm:$0xff]   ;;  %v8852_v33 = vld [vmem:[#allocation12 + $0x1e0] ss:$16 sps:$4 sm:$0xff]  }
 0x6b1   : > { %v8859_v34 = vld [vmem:[#allocation12 + $0x1c8] ss:$16 sps:$4 sm:$0xff]   ;;  %v8865_v35 = vld [vmem:[#allocation13 + $0x4] ss:$16 sps:$4 sm:$0xff]   ;;  %v8860_v36 = vld [vmem:[#allocation12 + $0x1ec] ss:$16 sps:$4 sm:$0xff]  }
 0x6b2   : > { %2547 = vmatpush1.bf16.msra.mxu0 %v8792_v52  ;;  %v2126_v37 = vld [vmem:[#allocation4] sm:$0xf]  ;;  %v8863_v39 = vld [vmem:[#allocation13] ss:$16 sps:$4 sm:$0xff]   ;;  %v8862_v40 = vld [vmem:[#allocation12 + $0x1e8] ss:$16 sps:$4 sm:$0xff]  }
 0x6b3   : > { %2548 = vmatprep.subr.bf16.mxu0 %v8794_v53  ;;  %2588 = vmatpush1.bf16.msra.mxu1 %v8811_v58  ;;  %v8871_v41 = vld [vmem:[#allocation13 + $0x24] ss:$16 sps:$4 sm:$0xff]   ;;  %v8868_v42 = vld [vmem:[#allocation13 + $0xc] ss:$16 sps:$4 sm:$0xff]   ;;  %v8869_v43 = vld [vmem:[#allocation13 + $0x20] ss:$16 sps:$4 sm:$0xff]  }
 0x6b4   : > { %2589 = vmatprep.subr.bf16.mxu1 %v8814_v59  ;;  %v8866_v44 = vld [vmem:[#allocation13 + $0x8] ss:$16 sps:$4 sm:$0xff]   ;;  %v8877_v45 = vld [vmem:[#allocation13 + $0x44] ss:$16 sps:$4 sm:$0xff]   ;;  %v8874_v46 = vld [vmem:[#allocation13 + $0x2c] ss:$16 sps:$4 sm:$0xff]  }
 0x6b5   : > { %v8875_v47 = vld [vmem:[#allocation13 + $0x40] ss:$16 sps:$4 sm:$0xff]   ;;  %v8872_v48 = vld [vmem:[#allocation13 + $0x28] ss:$16 sps:$4 sm:$0xff]   ;;  %v8883_v49 = vld [vmem:[#allocation13 + $0x64] ss:$16 sps:$4 sm:$0xff]  }
 0x6b6   : > { %2549 = vmatpush1.bf16.msra.mxu0 %v8798_v56  ;;  %v8880_v50 = vld [vmem:[#allocation13 + $0x4c] ss:$16 sps:$4 sm:$0xff]   ;;  %v8881_v51 = vld [vmem:[#allocation13 + $0x60] ss:$16 sps:$4 sm:$0xff]   ;;  %v8878_v52 = vld [vmem:[#allocation13 + $0x48] ss:$16 sps:$4 sm:$0xff]  }
 0x6b7   : > { %2550 = vmatprep.subr.bf16.mxu0 %v8800_v57  ;;  %2590 = vmatpush1.bf16.msra.mxu1 %v8817_v22  ;;  %v8886_v53 = vld [vmem:[#allocation13 + $0x6c] ss:$16 sps:$4 sm:$0xff]   ;;  %v8884_v54 = vld [vmem:[#allocation13 + $0x68] ss:$16 sps:$4 sm:$0xff]   ;;  %v8889_v55 = vld [vmem:[#allocation13 + $0x84] ss:$16 sps:$4 sm:$0xff]  }
 0x6b8   : > { %2591 = vmatprep.subr.bf16.mxu1 %v8820_v28  ;;  %v8892_v56 = vld [vmem:[#allocation13 + $0x8c] ss:$16 sps:$4 sm:$0xff]   ;;  %v8887_v57 = vld [vmem:[#allocation13 + $0x80] ss:$16 sps:$4 sm:$0xff]   ;;  %v8890_v58 = vld [vmem:[#allocation13 + $0x88] ss:$16 sps:$4 sm:$0xff]  }
 0x6b9   : > { %v8895_v59 = vld [vmem:[#allocation13 + $0xa4] ss:$16 sps:$4 sm:$0xff]   ;;  %v8896_v22 = vld [vmem:[#allocation13 + $0xa8] ss:$16 sps:$4 sm:$0xff]   ;;  %v8916_v10 = vld [vmem:[#allocation13 + $0x10c] ss:$16 sps:$4 sm:$0xff]  }
 0x6ba   : > { %2551 = vmatpush1.bf16.msra.mxu0 %v8804_v60  ;;  %v8898_v60 = vld [vmem:[#allocation13 + $0xac] ss:$16 sps:$4 sm:$0xff]   ;;  %v8901_v28 = vld [vmem:[#allocation13 + $0xc4] ss:$16 sps:$4 sm:$0xff]   ;;  %v8914_v12 = vld [vmem:[#allocation13 + $0x108] ss:$16 sps:$4 sm:$0xff]  }
 0x6bb   : > { %2552 = vmatprep.subr.bf16.mxu0 %v8806_v61  ;;  %2592 = vmatpush1.bf16.msra.mxu1 %v8823_v4  ;;  %v8893_v61 = vld [vmem:[#allocation13 + $0xa0] ss:$16 sps:$4 sm:$0xff]   ;;  %v8902_v4 = vld [vmem:[#allocation13 + $0xc8] ss:$16 sps:$4 sm:$0xff]   ;;  %s3746_s20 = sld [smem:[#allocation6 + %s10330_s12]] }
 0x6bc   : > { %2593 = vmatprep.subr.bf16.mxu1 %v8826_v5  ;;  %v8907_v5 = vld [vmem:[#allocation13 + $0xe4] ss:$16 sps:$4 sm:$0xff]  }
 0x6be   : > { %2553 = vmatpush1.bf16.msra.mxu0 %v8810_v62  ;;  %v8904_v62 = vld [vmem:[#allocation13 + $0xcc] ss:$16 sps:$4 sm:$0xff]  }
 0x6bf   : > { %2554 = vmatprep.subr.bf16.mxu0 %v8812_v63  ;;  %2594 = vmatpush1.bf16.msra.mxu1 %v8829_v9  ;;  %v8899_v63 = vld [vmem:[#allocation13 + $0xc0] ss:$16 sps:$4 sm:$0xff]   ;;  %v8908_v9 = vld [vmem:[#allocation13 + $0xe8] ss:$16 sps:$4 sm:$0xff]  }
 0x6c0   : > { %2595 = vmatprep.subr.bf16.mxu1 %v8832_v7  ;;  %v8913_v7 = vld [vmem:[#allocation13 + $0x104] ss:$16 sps:$4 sm:$0xff]  }
 0x6c1   : > { %p3747_p7 = scmp.eq.s32.totalorder %s3746_s20, 1 }
 0x6c2   : > { %2555 = vmatpush1.bf16.msra.mxu0 %v8816_v6  ;;  %v8910_v6 = vld [vmem:[#allocation13 + $0xec] ss:$16 sps:$4 sm:$0xff]  }
 0x6c3   : > { %2556 = vmatprep.subr.bf16.mxu0 %v8818_v8  ;;  %2596 = vmatpush1.bf16.msra.mxu1 %v8835_v14  ;;  %v8905_v8 = vld [vmem:[#allocation13 + $0xe0] ss:$16 sps:$4 sm:$0xff]   ;;  %v8922_v14 = vld [vmem:[#allocation13 + $0x12c] ss:$16 sps:$4 sm:$0xff]   ;;  %s3750_s16 = scalar_select %p3747_p7, 1, 0 }
 0x6c4   : > { %2597 = vmatprep.subr.bf16.mxu1 %v8838_v15  ;;  %v8917_v15 = vld [vmem:[#allocation13 + $0x120] ss:$16 sps:$4 sm:$0xff]  }
 0x6c6   : > { %2557 = vmatpush1.bf16.msra.mxu0 %v8822_v11  ;;  %v8911_v11 = vld [vmem:[#allocation13 + $0x100] ss:$16 sps:$4 sm:$0xff]  }
 0x6c7   : > { %2558 = vmatprep.subr.bf16.mxu0 %v8824_v13  ;;  %2598 = vmatpush1.bf16.msra.mxu1 %v8841_v18  ;;  %v8919_v13 = vld [vmem:[#allocation13 + $0x124] ss:$16 sps:$4 sm:$0xff]   ;;  %v8928_v18 = vld [vmem:[#allocation13 + $0x14c] ss:$16 sps:$4 sm:$0xff]  }
 0x6c8   : > { %2599 = vmatprep.subr.bf16.mxu1 %v8844_v19  ;;  %v8923_v19 = vld [vmem:[#allocation13 + $0x140] ss:$16 sps:$4 sm:$0xff]  }
 0x6ca   : > { %2559 = vmatpush1.bf16.msra.mxu0 %v8828_v16  ;;  %v8920_v16 = vld [vmem:[#allocation13 + $0x128] ss:$16 sps:$4 sm:$0xff]  }
 0x6cb   : > { %2560 = vmatprep.subr.bf16.mxu0 %v8830_v17  ;;  %2600 = vmatpush1.bf16.msra.mxu1 %v8847_v24  ;;  %v8925_v17 = vld [vmem:[#allocation13 + $0x144] ss:$16 sps:$4 sm:$0xff]   ;;  %v8934_v24 = vld [vmem:[#allocation13 + $0x16c] ss:$16 sps:$4 sm:$0xff]  }
 0x6cc   : > { %2601 = vmatprep.subr.bf16.mxu1 %v8850_v26  ;;  %v8929_v26 = vld [vmem:[#allocation13 + $0x160] ss:$16 sps:$4 sm:$0xff]  }
 0x6ce   : > { %2561 = vmatpush1.bf16.msra.mxu0 %v8834_v20  ;;  %v8926_v20 = vld [vmem:[#allocation13 + $0x148] ss:$16 sps:$4 sm:$0xff]  }
 0x6cf   : > { %2562 = vmatprep.subr.bf16.mxu0 %v8836_v21  ;;  %2602 = vmatpush1.bf16.msra.mxu1 %v8853_v38  ;;  %v8931_v21 = vld [vmem:[#allocation13 + $0x164] ss:$16 sps:$4 sm:$0xff]   ;;  %v8940_v38 = vld [vmem:[#allocation13 + $0x18c] ss:$16 sps:$4 sm:$0xff]  }
 0x6d0   : > { %2603 = vmatprep.subr.bf16.mxu1 %v8854_v30  ;;  %v8938_v30 = vld [vmem:[#allocation13 + $0x188] ss:$16 sps:$4 sm:$0xff]  }
 0x6d2   : > { %2563 = vmatpush1.bf16.msra.mxu0 %v8840_v27  ;;  %v8932_v27 = vld [vmem:[#allocation13 + $0x168] ss:$16 sps:$4 sm:$0xff]  }
 0x6d3   : > { %2564 = vmatprep.subr.bf16.mxu0 %v8842_v23  ;;  %2604 = vmatpush1.bf16.msra.mxu1 %v8856_v31  ;;  %v8937_v23 = vld [vmem:[#allocation13 + $0x184] ss:$16 sps:$4 sm:$0xff]  }
 0x6d4   : > { %2605 = vmatprep.subr.bf16.mxu1 %v8857_v32  ;;  %v8943_v31 = vld [vmem:[#allocation13 + $0x1a4] ss:$16 sps:$4 sm:$0xff]   ;;  %v8944_v32 = vld [vmem:[#allocation13 + $0x1a8] ss:$16 sps:$4 sm:$0xff]  }
 0x6d6   : > { %2565 = vmatpush1.bf16.msra.mxu0 %v8846_v29  ;;  %v8935_v29 = vld [vmem:[#allocation13 + $0x180] ss:$16 sps:$4 sm:$0xff]  }
 0x6d7   : > { %2566 = vmatprep.subr.bf16.mxu0 %v8848_v25  ;;  %2606 = vmatpush1.bf16.msra.mxu1 %v8859_v34  ;;  %v8941_v25 = vld [vmem:[#allocation13 + $0x1a0] ss:$16 sps:$4 sm:$0xff]   ;;  %v8949_v34 = vld [vmem:[#allocation13 + $0x1c4] ss:$16 sps:$4 sm:$0xff]  }
 0x6d8   : > { %2607 = vmatprep.subr.bf16.mxu1 %v8860_v36  ;;  %v8947_v36 = vld [vmem:[#allocation13 + $0x1c0] ss:$16 sps:$4 sm:$0xff]  }
 0x6da   : > { %2567 = vmatpush1.bf16.msra.mxu0 %v8852_v33  ;;  %v8946_v33 = vld [vmem:[#allocation13 + $0x1ac] ss:$16 sps:$4 sm:$0xff]  }
 0x6db   : > { %3054 = vmatprep.subr.bf16.mxu0 %v8865_v35  ;;  %2608 = vmatpush1.bf16.msra.mxu1 %v8862_v40  ;;  %v8952_v35 = vld [vmem:[#allocation13 + $0x1cc] ss:$16 sps:$4 sm:$0xff]   ;;  %v8955_v40 = vld [vmem:[#allocation13 + $0x1e4] ss:$16 sps:$4 sm:$0xff]  }
 0x6dc   : > { %3095 = vmatprep.subr.bf16.mxu1 %v8868_v42 }
 0x6dd   : > { %2569 = vmatmul.mubr.bf16.vlgmr.msra.gmra.mrb[0].mxu0 %v2126_v37 }
 0x6de   : > { %3055 = vmatpush1.bf16.msra.mxu0 %v8863_v39  ;;  %2610 = vmatmul.mubr.bf16.vlgmr.msra.gmra.mrb[0].mxu1 %v2126_v37  ;;  %v8950_v37 = vld [vmem:[#allocation13 + $0x1c8] ss:$16 sps:$4 sm:$0xff]  }
 0x6df   : > { %3056 = vmatprep.subr.bf16.mxu0 %v8871_v41  ;;  %3096 = vmatpush1.bf16.msra.mxu1 %v8866_v44  ;;  %v2644_v39 = vld [vmem:[#allocation2 + $0x8] sm:$0xff]  ;;  %v8958_v41 = vld [vmem:[#allocation13 + $0x1ec] ss:$16 sps:$4 sm:$0xff]  }
 0x6e0   : > { %3097 = vmatprep.subr.bf16.mxu1 %v8874_v46  ;;  %v2647_v42 = vpack.c.bf16 %v2644_v39, %v2644_v39  ;;  %v8956_v44 = vld [vmem:[#allocation13 + $0x1e8] ss:$16 sps:$4 sm:$0xff]   ;;  %v8974_v39 = vld [vmem:[#allocation15 + $0x50] ss:$12 sps:$4 sm:$0xff]  }
 0x6e2   : > { %3057 = vmatpush1.bf16.msra.mxu0 %v8869_v43  ;;  %3086 = vmatprep.mubr.bf16.mxu0 %v2647_v42  ;;  %v8953_v43 = vld [vmem:[#allocation13 + $0x1e0] ss:$16 sps:$4 sm:$0xff]  }
 0x6e3   : > { %3058 = vmatprep.subr.bf16.mxu0 %v8877_v45  ;;  %3098 = vmatpush1.bf16.msra.mxu1 %v8872_v48  ;;  %v10340_v45 = vshrl.u32 %v432_v0, 7 }
 0x6e4   : > { %3099 = vmatprep.subr.bf16.mxu1 %v8880_v50  ;;  %3127 = vmatprep.mubr.bf16.mxu1 %v2647_v42  ;;  %v8978_v42 = vld [vmem:[#allocation15 + $0x68] ss:$12 sps:$4 sm:$0xff]  }
 0x6e5   : > { %v10343_v46 = vsub.s32 0, %v10340_v45  ;;  %v10349_v48 = vsub.s32 1, %v10340_v45 }
 0x6e6   : > { %3059 = vmatpush1.bf16.msra.mxu0 %v8875_v47  ;;  %v2194_v47 = vld [vmem:[%s10615_s4] sm:$0xf] }
 0x6e7   : > { %3060 = vmatprep.subr.bf16.mxu0 %v8883_v49  ;;  %3100 = vmatpush1.bf16.msra.mxu1 %v8878_v52  ;;  %v2199_v49 = vrot.slane %v2194_v47, %v10343_v46  ;;  %v2203_v50 = vrot.slane %v2194_v47, %v10349_v48 }
 0x6e8   : > { %3101 = vmatprep.subr.bf16.mxu1 %v8886_v53 }
 0x6ea   : > { %3061 = vmatpush1.bf16.msra.mxu0 %v8881_v51  ;;  %v2210_v51 = vsub.s32 3, %v10340_v45 }
 0x6eb   : > { %3102 = vmatpush1.bf16.msra.mxu1 %v8884_v54  ;;  %3062 = vmatprep.subr.bf16.mxu0 %v8889_v55 }
 0x6ec   : > { %3103 = vmatprep.subr.bf16.mxu1 %v8892_v56 }
 0x6ee   : > { %3063 = vmatpush1.bf16.msra.mxu0 %v8887_v57 }
 0x6ef   : > { %3104 = vmatpush1.bf16.msra.mxu1 %v8890_v58  ;;  %3064 = vmatprep.subr.bf16.mxu0 %v8895_v59  ;;  %v2211_v59 = vrot.slane %v2194_v47, %v2210_v51 }
 0x6f0   : > { %3105 = vmatprep.subr.bf16.mxu1 %v8898_v60 }
 0x6f2   : > { %3065 = vmatpush1.bf16.msra.mxu0 %v8893_v61  ;;  %v10357_v61 = vsub.s32 2, %v10340_v45 }
 0x6f3   : > { %3106 = vmatpush1.bf16.msra.mxu1 %v8896_v22  ;;  %3066 = vmatprep.subr.bf16.mxu0 %v8901_v28 }
 0x6f4   : > { %3107 = vmatprep.subr.bf16.mxu1 %v8904_v62 }
 0x6f6   : > { %3067 = vmatpush1.bf16.msra.mxu0 %v8899_v63 }
 0x6f7   : > { %3108 = vmatpush1.bf16.msra.mxu1 %v8902_v4  ;;  %3068 = vmatprep.subr.bf16.mxu0 %v8907_v5  ;;  %v2207_v4 = vrot.slane %v2194_v47, %v10357_v61  ;;  %v8982_v47 = vld [vmem:[#allocation15 + $0x80] ss:$12 sps:$4 sm:$0xff]  }
 0x6f8   : > { %3109 = vmatprep.subr.bf16.mxu1 %v8910_v6 }
 0x6fa   : > { %3069 = vmatpush1.bf16.msra.mxu0 %v8905_v8 }
 0x6fb   : > { %3110 = vmatpush1.bf16.msra.mxu1 %v8908_v9  ;;  %3070 = vmatprep.subr.bf16.mxu0 %v8913_v7 }
 0x6fc   : > { %3111 = vmatprep.subr.bf16.mxu1 %v8916_v10 }
 0x6fe   : > { %3071 = vmatpush1.bf16.msra.mxu0 %v8911_v11 }
 0x6ff   : > { %3112 = vmatpush1.bf16.msra.mxu1 %v8914_v12  ;;  %3072 = vmatprep.subr.bf16.mxu0 %v8919_v13 }
 0x700   : > { %3113 = vmatprep.subr.bf16.mxu1 %v8922_v14  ;;  %v2128_v14 = vld [vmem:[#allocation3] sm:$0xff] }
 0x702   : > { %3073 = vmatpush1.bf16.msra.mxu0 %v8917_v15 }
 0x703   : > { %3114 = vmatpush1.bf16.msra.mxu1 %v8920_v16  ;;  %3074 = vmatprep.subr.bf16.mxu0 %v8925_v17 }
 0x704   : > { %3115 = vmatprep.subr.bf16.mxu1 %v8928_v18 }
 0x706   : > { %3075 = vmatpush1.bf16.msra.mxu0 %v8923_v19 }
 0x707   : > { %3116 = vmatpush1.bf16.msra.mxu1 %v8926_v20  ;;  %3076 = vmatprep.subr.bf16.mxu0 %v8931_v21 }
 0x708   : > { %3117 = vmatprep.subr.bf16.mxu1 %v8934_v24 }
 0x70a   : > { %3077 = vmatpush1.bf16.msra.mxu0 %v8929_v26 }
 0x70b   : > { %3118 = vmatpush1.bf16.msra.mxu1 %v8932_v27  ;;  %3078 = vmatprep.subr.bf16.mxu0 %v8937_v23  ;;  %v8961_v23 = vld [vmem:[#allocation15 + $0x4] ss:$12 sps:$4 sm:$0xff]  }
 0x70c   : > { %3119 = vmatprep.subr.bf16.mxu1 %v8940_v38  ;;  %v8959_v38 = vld [vmem:[#allocation15] ss:$12 sps:$4 sm:$0xff]  }
 0x70e   : > { %3079 = vmatpush1.bf16.msra.mxu0 %v8935_v29  ;;  %v8962_v29 = vld [vmem:[#allocation15 + $0x8] ss:$12 sps:$4 sm:$0xff]  }
 0x70f   : > { %3120 = vmatpush1.bf16.msra.mxu1 %v8938_v30  ;;  %3080 = vmatprep.subr.bf16.mxu0 %v8943_v31  ;;  %v9894_v30 = vmov 0.0   ;;  %v8963_v31 = vld [vmem:[#allocation15 + $0x18] ss:$12 sps:$4 sm:$0xff]  }
 0x710   : > { %3121 = vmatprep.subr.bf16.mxu1 %v8946_v33  ;;  %v8969_v33 = vld [vmem:[#allocation15 + $0x34] ss:$12 sps:$4 sm:$0xff]  }
 0x712   : > { %3081 = vmatpush1.bf16.msra.mxu0 %v8941_v25  ;;  %v8965_v25 = vld [vmem:[#allocation15 + $0x1c] ss:$12 sps:$4 sm:$0xff]  }
 0x713   : > { %3122 = vmatpush1.bf16.msra.mxu1 %v8944_v32  ;;  %3082 = vmatprep.subr.bf16.mxu0 %v8949_v34  ;;  %v8966_v32 = vld [vmem:[#allocation15 + $0x20] ss:$12 sps:$4 sm:$0xff]   ;;  %v8967_v34 = vld [vmem:[#allocation15 + $0x30] ss:$12 sps:$4 sm:$0xff]  }
 0x714   : > { %3123 = vmatprep.subr.bf16.mxu1 %v8952_v35  ;;  %v8970_v35 = vld [vmem:[#allocation15 + $0x38] ss:$12 sps:$4 sm:$0xff]  }
 0x716   : > { %3083 = vmatpush1.bf16.msra.mxu0 %v8947_v36  ;;  %v8973_v36 = vld [vmem:[#allocation15 + $0x4c] ss:$12 sps:$4 sm:$0xff]  }
 0x717   : > { %3124 = vmatpush1.bf16.msra.mxu1 %v8950_v37  ;;  %3084 = vmatprep.subr.bf16.mxu0 %v8955_v40  ;;  %v8971_v37 = vld [vmem:[#allocation15 + $0x48] ss:$12 sps:$4 sm:$0xff]   ;;  %v8977_v40 = vld [vmem:[#allocation15 + $0x64] ss:$12 sps:$4 sm:$0xff]  }
 0x718   : > { %3125 = vmatprep.subr.bf16.mxu1 %v8958_v41  ;;  %v8975_v41 = vld [vmem:[#allocation15 + $0x60] ss:$12 sps:$4 sm:$0xff]  }
 0x71a   : > { %3085 = vmatpush1.bf16.msra.mxu0 %v8953_v43  ;;  %v8981_v43 = vld [vmem:[#allocation15 + $0x7c] ss:$12 sps:$4 sm:$0xff]  }
 0x71b   : > { %3126 = vmatpush1.bf16.msra.mxu1 %v8956_v44  ;;  %3342 = vmatprep.subr.bf16.mxu0 %v8961_v23  ;;  %v8979_v44 = vld [vmem:[#allocation15 + $0x78] ss:$12 sps:$4 sm:$0xff]  }
 0x71c   : > { %8237 = vmatprep.subr.bf16.mxu1 %v9894_v30 }
 0x7b0   : > { %v2570_v52 = vpop.f32.mrb[0].mxu0 }
 0x7b1   : > { %v2571_v53 = vadd.f32 %v2570_v52, %v2199_v49  ;;  %v2572_v54 = vpop.f32.mrb[1].mxu0  ;;  %v2611_v22 = vpop.f32.mrb[0].mxu1  ;;  %v8985_v49 = vld [vmem:[#allocation15 + $0x94] ss:$12 sps:$4 sm:$0xff]   ;;  %v8983_v52 = vld [vmem:[#allocation15 + $0x90] ss:$12 sps:$4 sm:$0xff]  }
 0x7b2   : > { %v2573_v55 = vadd.f32 %v2572_v54, %v2203_v50  ;;  %v2574_v56 = vpop.f32.mrb[2].mxu0  ;;  %v2613_v28 = vpop.f32.mrb[1].mxu1  ;;  %v2612_v8 = vadd.f32 %v2611_v22, %v2207_v4  ;;  %v9895_v50 = vmov 0   ;;  %v8989_v54 = vld [vmem:[#allocation15 + $0xac] ss:$12 sps:$4 sm:$0xff]  }
 0x7b3   : > { %v7498_v57 = vmul.f32 -1.442695, %v2571_v53  ;;  %v2575_v58 = vpop.f32.mrb[3].mxu0  ;;  %v2614_v62 = vadd.f32 %v2613_v28, %v2211_v59  ;;  %v2615_v63 = vpop.f32.mrb[2].mxu1  ;;  %v8986_v53 = vld [vmem:[#allocation15 + $0x98] ss:$12 sps:$4 sm:$0xff]  }
 0x7b4   : > { %v7499_v60 = vmul.f32 -1.442695, %v2573_v55  ;;  %v2616_v5 = vpop.f32.mrb[3].mxu1  ;;  %v8987_v55 = vld [vmem:[#allocation15 + $0xa8] ss:$12 sps:$4 sm:$0xff]  }
 0x7b5   : > { %9015 = vpow2.f32 %v7498_v57  ;;  %v7500_v6 = vmul.f32 -1.442695, %v2614_v62  ;;  %v8990_v56 = vld [vmem:[#allocation15 + $0xb0] ss:$12 sps:$4 sm:$0xff]   ;;  %v2712_v57 = vld [vmem:[%s10617_s6] sm:$0xf] }
 0x7b6   : > { %9017 = vpow2.f32 %v7499_v60  ;;  %v2717_v58 = vrot.slane %v2712_v57, %v10343_v46  ;;  %v2721_v59 = vrot.slane %v2712_v57, %v10349_v48 }
 0x7b7   : > { %9019 = vpow2.f32 %v7500_v6 }
 0x7b8   : > { %9021 = vtanh.f32 %v2612_v8 }
 0x7bf   : > { %v9016_v9 = vpop.eup %9015 }
 0x7c0   : > { %v9018_v7 = vpop.eup %9017  ;;  %v2621_v10 = vadd.f32 1.0, %v9016_v9 }
 0x7c1   : > { %v2627_v11 = vadd.f32 1.0, %v9018_v7  ;;  %v9020_v12 = vpop.eup %9019 }
 0x7c2   : > { %9023 = vrcp.f32 %v2621_v10  ;;  %v9022_v13 = vpop.eup %9021  ;;  %v2634_v16 = vadd.f32 1.0, %v9020_v12 }
 0x7c3   : > { %9025 = vrcp.f32 %v2627_v11  ;;  %v2729_v11 = vrot.slane %v2712_v57, %v2210_v51 }
 0x7c4   : > { %9027 = vrcp.f32 %v2634_v16 }
 0x7cc   : > { %v9024_v15 = vpop.eup %9023 }
 0x7cd   : > { %v9026_v17 = vpop.eup %9025  ;;  %v2638_v18 = vmul.f32 %v9024_v15, %v9022_v13  ;;  %v2725_v13 = vrot.slane %v2712_v57, %v10357_v61 }
 0x7ce   : > { %v2637_v19 = vmul.f32 %v9026_v17, %v2128_v14  ;;  %v9028_v21 = vpop.eup %9027 }
 0x7d0   : > { %v2639_v20 = vadd.f32 %v2638_v18, %v2637_v19 }
 0x7d2   : > { %9029 = vtanh.f32 %v2639_v20  ;;  %3161 = vst [vmem:[#allocation3] sm:$0xff] %v2639_v20 }
 0x7dc   : > { %v9030_v24 = vpop.eup %9029 }
 0x7dd   : > { %v2641_v26 = vmul.f32 %v9030_v24, %v9028_v21  ;;  %v2646_v24 = vld [vmem:[#allocation3 + $0x8] sm:$0xff] }
 0x7df   : > { %v2642_v27 = vpack.c.bf16 %v2641_v26, %v2641_v26  ;;  %3160 = vst [vmem:[#allocation2] sm:$0xff] %v2641_v26 }
 0x7e1   : > { %3087 = vmatmul.mubr.bf16.vlgmr.msra.gmra.mrb[4].mxu0 %v2642_v27  ;;  %3128 = vmatmul.mubr.bf16.vlgmr.msra.gmra.mrb[4].mxu1 %v2642_v27 }
 0x7e2   : > { %3343 = vmatpush1.bf16.msra.mxu0 %v8959_v38  ;;  %8238 = vmatpush3.bf16.msra.mxu1 %v8962_v29 }
 0x7e3   : > { %8239 = vmatprep.subr.bf16.mxu1 %v9894_v30  ;;  %3344 = vmatprep.subr.bf16.mxu0 %v8965_v25 }
 0x7e4   : > { %3374 = vmatprep.mubr.bf16.mxu0 %v9895_v50  ;;  %8253 = vmatprep.mubr.msk.bf16.mxu1 %vm9896_vm1, %v9894_v30 }
 0x7e6   : > { %3345 = vmatpush1.bf16.msra.mxu0 %v8963_v31  ;;  %8240 = vmatpush3.bf16.msra.mxu1 %v8966_v32 }
 0x7e7   : > { %8241 = vmatprep.subr.bf16.mxu1 %v9894_v30  ;;  %3346 = vmatprep.subr.bf16.mxu0 %v8969_v33  ;;  %v3197_v33 = vld [vmem:[%s10619_s8] sm:$0x7] }
 0x7ea   : > { %3347 = vmatpush1.bf16.msra.mxu0 %v8967_v34  ;;  %8242 = vmatpush3.bf16.msra.mxu1 %v8970_v35  ;;  %v3202_v34 = vrot.slane %v3197_v33, %v10343_v46  ;;  %v3210_v35 = vrot.slane %v3197_v33, %v10357_v61 }
 0x7eb   : > { %8243 = vmatprep.subr.bf16.mxu1 %v9894_v30  ;;  %3348 = vmatprep.subr.bf16.mxu0 %v8973_v36  ;;  %v3206_v36 = vrot.slane %v3197_v33, %v10349_v48 }
 0x7ee   : > { %3349 = vmatpush1.bf16.msra.mxu0 %v8971_v37  ;;  %8244 = vmatpush3.bf16.msra.mxu1 %v8974_v39 }
 0x7ef   : > { %8245 = vmatprep.subr.bf16.mxu1 %v9894_v30  ;;  %3350 = vmatprep.subr.bf16.mxu0 %v8977_v40 }
 0x7f2   : > { %3351 = vmatpush1.bf16.msra.mxu0 %v8975_v41  ;;  %8246 = vmatpush3.bf16.msra.mxu1 %v8978_v42 }
 0x7f3   : > { %3352 = vmatprep.subr.bf16.mxu0 %v8981_v43  ;;  %8247 = vmatprep.subr.bf16.mxu1 %v9894_v30 }
 0x7f6   : > { %3353 = vmatpush1.bf16.msra.mxu0 %v8979_v44  ;;  %8248 = vmatpush3.bf16.msra.mxu1 %v8982_v47 }
 0x7f7   : > { %3354 = vmatprep.subr.bf16.mxu0 %v8985_v49  ;;  %8249 = vmatprep.subr.bf16.mxu1 %v9894_v30 }
 0x7fa   : > { %3355 = vmatpush1.bf16.msra.mxu0 %v8983_v52  ;;  %8250 = vmatpush3.bf16.msra.mxu1 %v8986_v53 }
 0x7fb   : > { %3356 = vmatprep.subr.bf16.mxu0 %v8989_v54  ;;  %8251 = vmatprep.subr.bf16.mxu1 %v9894_v30 }
 0x7fe   : > { %3357 = vmatpush1.bf16.msra.mxu0 %v8987_v55  ;;  %8252 = vmatpush3.bf16.msra.mxu1 %v8990_v56 }
 0x7ff   : > { %8257 = vmatprep.subr.bf16.mxu1 %v9894_v30 }
 0x8b4   : > { %v3088_v60 = vpop.f32.mrb[4].mxu0  ;;  %v3129_v22 = vpop.f32.mrb[4].mxu1 }
 0x8b5   : > { %v3089_v28 = vadd.f32 %v3088_v60, %v2717_v58  ;;  %v3090_v62 = vpop.f32.mrb[5].mxu0  ;;  %v3131_v63 = vpop.f32.mrb[5].mxu1  ;;  %v3130_v15 = vadd.f32 %v3129_v22, %v2725_v13  ;;  %v8991_v22 = vld [vmem:[#allocation16 + $0x40] sm:$0xff]  }
 0x8b6   : > { %v3091_v4 = vadd.f32 %v3090_v62, %v2721_v59  ;;  %v3092_v5 = vpop.f32.mrb[6].mxu0  ;;  %v3133_v6 = vpop.f32.mrb[6].mxu1  ;;  %v3132_v12 = vadd.f32 %v3131_v63, %v2729_v11  ;;  %v8993_v62 = vld [vmem:[#allocation16] sm:$0xff]   ;;  %v8994_v63 = vld [vmem:[#allocation16 + $0x48] sm:$0xff]   ;;  %8086 = vmatprep.subr.bf16.mxu0 %v8991_v22  ;;  %v9002_v11 = vld [vmem:[#allocation16 + $0x18] sm:$0xff]  }
 0x8b7   : > { %v7565_v8 = vmul.f32 -1.442695, %v3089_v28  ;;  %v3093_v9 = vpop.f32.mrb[7].mxu0  ;;  %v3134_v7 = vpop.f32.mrb[7].mxu1  ;;  %v8992_v28 = vld [vmem:[#allocation16 + $0x80] sm:$0xff]   ;;  %v8996_v5 = vld [vmem:[#allocation16 + $0x8] sm:$0xff]  }
 0x8b8   : > { %v7566_v10 = vmul.f32 -1.442695, %v3091_v4  ;;  %v7567_v14 = vmul.f32 -1.442695, %v3132_v12  ;;  %v8995_v4 = vld [vmem:[#allocation16 + $0x88] sm:$0xff]   ;;  %v8997_v6 = vld [vmem:[#allocation16 + $0x50] sm:$0xff]  }
 0x8b9   : > { %9031 = vpow2.f32 %v7565_v8  ;;  %v8998_v8 = vld [vmem:[#allocation16 + $0x90] sm:$0xff]   ;;  %v9000_v7 = vld [vmem:[#allocation16 + $0x58] sm:$0xff]   ;;  %v9003_v12 = vld [vmem:[#allocation16 + $0x60] sm:$0xff]  }
 0x8ba   : > { %9033 = vpow2.f32 %v7566_v10  ;;  %v8999_v9 = vld [vmem:[#allocation16 + $0x10] sm:$0xff]   ;;  %v9001_v10 = vld [vmem:[#allocation16 + $0x98] sm:$0xff]   ;;  %v9004_v13 = vld [vmem:[#allocation16 + $0xa0] sm:$0xff]  }
 0x8bb   : > { %9035 = vpow2.f32 %v7567_v14  ;;  %v9005_v14 = vld [vmem:[#allocation16 + $0x20] sm:$0xff]  }
 0x8bc   : > { %9037 = vtanh.f32 %v3130_v15  ;;  %v9006_v15 = vld [vmem:[#allocation16 + $0x68] sm:$0xff]  }
 0x8c3   : > { %v9032_v16 = vpop.eup %9031 }
 0x8c4   : > { %v9034_v17 = vpop.eup %9033  ;;  %v3139_v18 = vadd.f32 1.0, %v9032_v16  ;;  %v9007_v16 = vld [vmem:[#allocation16 + $0xa8] sm:$0xff]  }
 0x8c5   : > { %v3145_v19 = vadd.f32 1.0, %v9034_v17  ;;  %v9036_v20 = vpop.eup %9035  ;;  %v9008_v17 = vld [vmem:[#allocation16 + $0x28] sm:$0xff]  }
 0x8c6   : > { %9039 = vrcp.f32 %v3139_v18  ;;  %v9038_v21 = vpop.eup %9037  ;;  %v3152_v27 = vadd.f32 1.0, %v9036_v20  ;;  %v9009_v18 = vld [vmem:[#allocation16 + $0x70] sm:$0xff]  }
 0x8c7   : > { %9041 = vrcp.f32 %v3145_v19  ;;  %v9010_v19 = vld [vmem:[#allocation16 + $0xb0] sm:$0xff]  }
 0x8c8   : > { %9043 = vrcp.f32 %v3152_v27  ;;  %v9013_v27 = vld [vmem:[#allocation16 + $0xb8] sm:$0xff]  }
 0x8d0   : > { %v9040_v45 = vpop.eup %9039 }
 0x8d1   : > { %v9042_v51 = vpop.eup %9041  ;;  %v3156_v26 = vmul.f32 %v9040_v45, %v9038_v21 }
 0x8d2   : > { %v3155_v23 = vmul.f32 %v9042_v51, %v2646_v24  ;;  %v9044_v29 = vpop.eup %9043  ;;  %v9011_v51 = vld [vmem:[#allocation16 + $0x30] sm:$0xff]  }
 0x8d4   : > { %v3157_v38 = vadd.f32 %v3156_v26, %v3155_v23  ;;  %v9012_v26 = vld [vmem:[#allocation16 + $0x78] sm:$0xff]  }
 0x8d5   : > { %v9014_v23 = vld [vmem:[#allocation16 + $0x38] sm:$0xff]  }
 0x8d6   : > { %9045 = vtanh.f32 %v3157_v38  ;;  %3163 = vst [vmem:[#allocation3 + $0x8] sm:$0xff] %v3157_v38 }
 0x8e0   : > { %v9046_v25 = vpop.eup %9045 }
 0x8e1   : > { %v3159_v31 = vmul.f32 %v9046_v25, %v9044_v29 }
 0x8e3   : > { %3162 = vst [vmem:[#allocation2 + $0x8] sm:$0xff] %v3159_v31  ;;  %v3164_v32 = vpack.c.bf16 %v3159_v31, %v3159_v31 }
 0x8e5   : > { %3375 = vmatmul.mubr.bf16.vlgmr.msra.gmra.mrb[8].mxu0 %v3164_v32  ;;  %8254 = vmatmul.mubr.bf16.vlgmr.msra.gmra.mrb[8].mxu1 %v3164_v32  ;;  %v9897_v32 = vmov 1.0|1.0  }
 0x8e6   : > { %8273 = vmatprep.mubr.msk.bf16.mxu1 %vm9896_vm1, %v9894_v30  ;;  %8258 = vmatpush3.bf16.msra.mxu1 %v8992_v28 }
 0x8e7   : > { %8087 = vmatpush3.bf16.msra.mxu0 %v8993_v62  ;;  %8259 = vmatprep.subr.bf16.mxu1 %v9894_v30 }
 0x8e8   : > { %8088 = vmatprep.subr.bf16.mxu0 %v8994_v63 }
 0x8ea   : > { %8260 = vmatpush3.bf16.msra.mxu1 %v8995_v4 }
 0x8eb   : > { %8089 = vmatpush3.bf16.msra.mxu0 %v8996_v5  ;;  %8261 = vmatprep.subr.bf16.mxu1 %v9894_v30 }
 0x8ec   : > { %8090 = vmatprep.subr.bf16.mxu0 %v8997_v6 }
 0x8ee   : > { %8262 = vmatpush3.bf16.msra.mxu1 %v8998_v8 }
 0x8ef   : > { %8091 = vmatpush3.bf16.msra.mxu0 %v8999_v9  ;;  %8263 = vmatprep.subr.bf16.mxu1 %v9894_v30 }
 0x8f0   : > { %8092 = vmatprep.subr.bf16.mxu0 %v9000_v7 }
 0x8f2   : > { %8264 = vmatpush3.bf16.msra.mxu1 %v9001_v10 }
 0x8f3   : > { %8093 = vmatpush3.bf16.msra.mxu0 %v9002_v11  ;;  %8265 = vmatprep.subr.bf16.mxu1 %v9894_v30 }
 0x8f4   : > { %8094 = vmatprep.subr.bf16.mxu0 %v9003_v12 }
 0x8f6   : > { %8266 = vmatpush3.bf16.msra.mxu1 %v9004_v13 }
 0x8f7   : > { %8095 = vmatpush3.bf16.msra.mxu0 %v9005_v14  ;;  %8267 = vmatprep.subr.bf16.mxu1 %v9894_v30 }
 0x8f8   : > { %8096 = vmatprep.subr.bf16.mxu0 %v9006_v15 }
 0x8fa   : > { %8268 = vmatpush3.bf16.msra.mxu1 %v9007_v16 }
 0x8fb   : > { %8097 = vmatpush3.bf16.msra.mxu0 %v9008_v17  ;;  %8269 = vmatprep.subr.bf16.mxu1 %v9894_v30 }
 0x8fc   : > { %8098 = vmatprep.subr.bf16.mxu0 %v9009_v18 }
 0x8fe   : > { %8270 = vmatpush3.bf16.msra.mxu1 %v9010_v19 }
 0x8ff   : > { %8271 = vmatprep.subr.bf16.mxu1 %v9894_v30  ;;  %8099 = vmatpush3.bf16.msra.mxu0 %v9011_v51 }
 0x900   : > { %8100 = vmatprep.subr.bf16.mxu0 %v9012_v26 }
 0x902   : > { %8272 = vmatpush3.bf16.msra.mxu1 %v9013_v27 }
 0x903   : > { %8101 = vmatpush3.bf16.msra.mxu0 %v9014_v23 }
 0x9b8   : > { %v3376_v37 = vpop.f32.mrb[8].mxu0  ;;  %v3417_v39 = vpop.f32.mrb[8].mxu1 }
 0x9b9   : > { %v3377_v40 = vadd.f32 %v3376_v37, %v3202_v34  ;;  %v3418_v41 = vadd.f32 %v3417_v39, %v3210_v35  ;;  %v3378_v42 = vpop.f32.mrb[9].mxu0  ;;  %v8255_v43 = vpop.f32.mrb[9].mxu1 }
 0x9ba   : > { %v3379_v44 = vadd.f32 %v3378_v42, %v3206_v36  ;;  %v3380_v47 = vpop.f32.mrb[10].mxu0  ;;  %v3420_v49 = vpop.f32.mrb[10].mxu1 }
 0x9bb   : > { %7592 = vst [vmem:[%s10253_s15 + $0x18] sm:$0xff] %v3377_v40  ;;  %7594 = vst [vmem:[%s10253_s15 + $0x28] sm:$0xff] %v3418_v41  ;;  %v3381_v50 = vpop.f32.mrb[11].mxu0  ;;  %v8256_v46 = vpop.f32.mrb[11].mxu1  ;;  %v3432_v52 = vsel %vm3429_vm2, %v3418_v41, -inf }
 0x9bc   : > { %7593 = vst [vmem:[%s10253_s15 + $0x20] sm:$0xff] %v3379_v44  ;;  %v3433_v61 = vmax.f32 %v3377_v40, %v3379_v44  ;;  %v7628_v47 = vld [vmem:[%s10222_s11 + $0x4] sm:$0xf] }
 0x9be   : > { %v3434_v53 = vmax.f32 %v3433_v61, %v3432_v52 }
 0x9c0   : > { %3435 = vmax.xlane.f32.xlu0 %v3434_v53 }
 0xa4d   : > { %v3436_v48 = vpop.xlane.xlu0 %3435 }
 0xa4e   : > { %vm3437_vm3 = vcmp.eq.f32.partialorder %v3377_v40, %v3436_v48  ;;  %vm3438_vm4 = vcmp.eq.f32.partialorder %v3379_v44, %v3436_v48  ;;  %vm3439_vm5 = vcmp.eq.f32.partialorder %v3432_v52, %v3436_v48  ;;  %v3751_v40 = vstv %s3750_s16 }
 0xa4f   : > { %v3440_v54 = vsel %vm3437_vm3, %v10245_v1, 384  ;;  %v3441_v55 = vsel %vm3438_vm4, %v10248_v2, 384  ;;  %v3442_v56 = vsel %vm3439_vm5, %v10251_v3, 384  ;;  %vm3752_vm15 = vcmp.eq.s32.totalorder %v3751_v40, 1 }
 0xa50   : > { %vm3443_vm6 = vcmp.lt.s32.totalorder %v3440_v54, %v3441_v55 }
 0xa51   : > { %v3444_v57 = vsel %vm3443_vm6, %v3440_v54, %v3441_v55 }
 0xa52   : > { %vm3445_vm7 = vcmp.lt.s32.totalorder %v3444_v57, %v3442_v56 }
 0xa53   : > { %v3446_v58 = vsel %vm3445_vm7, %v3444_v57, %v3442_v56 }
 0xa54   : > { %v3448_v59 = vshra.s32 %v3446_v58, 16  ;;  %v3447_v20 = vand.u32 65535, %v3446_v58 }
 0xa56   : > { %v3450_v60 = vcvt.s32.f32 %v3448_v59  ;;  %v3449_v24 = vcvt.s32.f32 %v3447_v20 }
 0xa58   : > { %3451 = vmin.xlane.f32.xlu0 %v3450_v60 }
 0xae5   : > { %v3452_v21 = vpop.xlane.xlu0 %3451 }
 0xae6   : > { %vm3453_vm8 = vcmp.eq.f32.partialorder %v3450_v60, %v3452_v21  ;;  %v3458_v38 = vcvt.f32.s32 %v3452_v21 }
 0xae7   : > { %v3454_v45 = vsel %vm3453_vm8, %v3449_v24, inf }
 0xae8   : > { %3455 = vmin.xlane.f32.xlu1 %v3454_v45  ;;  %v3459_v25 = vshll.u32 %v3458_v38, 16 }
 0xb75   : > { %v3456_v29 = vpop.xlane.xlu1 %3455 }
 0xb76   : > { %v3457_v31 = vcvt.f32.s32 %v3456_v29 }
 0xb78   : > { %v3460_v30 = vadd.s32 %v3459_v25, %v3457_v31 }
 0xb7a   : > { %vm3462_vm9 = vcmp.eq.s32.totalorder %v10248_v2, %v3460_v30  ;;  %vm3463_vm10 = vcmp.eq.s32.totalorder %v10251_v3, %v3460_v30  ;;  %vm3461_vm11 = vcmp.eq.s32.totalorder %v10245_v1, %v3460_v30 }
 0xb7b   : > { %vm7622_vm12 = vmpackc.low %vm3462_vm9, %vm3462_vm9 }
 0xb7c   : > { %7623 = vmatprep.mubr.msk.bf16.mxu0 %vm7622_vm12, %v9897_v32  ;;  %vm7626_vm13 = vmpackc.low %vm3463_vm10, %vm3463_vm10 }
 0xb7d   : > { %8274 = vmatmul.mubr.msk.bf16.vlgmr.msra.gmra.mrb[12].mxu1 %vm7626_vm13, %v9897_v32  ;;  %vm7624_vm14 = vmpackc.low %vm3461_vm11, %vm3461_vm11 }
 0xb7e   : > { %7625 = vmatmul.mubr.msk.bf16.vlgmr.msra.gmra.mrb[12].mxu0 %vm7624_vm14, %v9897_v32 }
 0xc50   : > { %v3739_v33 = vpop.f32.mrb[12].mxu1 }
 0xc51   : > { %v8102_v34 = vpop.f32.mrb[12].mxu0  ;;  %v8275_v35 = vpop.f32.mrb[13].mxu1 }
 0xc52   : > { %v8103_v36 = vpop.f32.mrb[13].mxu0  ;;  %v3742_v37 = vpop.f32.mrb[14].mxu1 }
 0xc53   : > { %v8104_v39 = vadd.f32 %v8103_v36, %v8102_v34  ;;  %v8105_v41 = vpop.f32.mrb[14].mxu0  ;;  %v8276_v42 = vpop.f32.mrb[15].mxu1 }
 0xc54   : > { %v8106_v43 = vpop.f32.mrb[15].mxu0 }
 0xc55   : > { %v3740_v44 = vadd.f32 %v8104_v39, %v3739_v33 }
 0xc57   : > { %v3745_v49 = vpack.c.bf16 %v3740_v44, %v3740_v44 }
 0xc59   : > { %v3753_v50 = vsel %vm3752_vm15, %v7628_v47, %v3745_v49 }
 0xc5a   : > { %3754 = vst [vmem:[#allocation4] sm:$0xf] %v3753_v50 }
 0xc5b PF: > { %s10407_s17 = sadd.s32 2, %s10242_s30 }
 0xc5c   : > { %p7629_p0 = scmp.ne.s32.totalorder %s10407_s17, 0 }
 0xc5d   : > { %v3760_v46 = vld [vmem:[#allocation7] sm:$0xff] (!%p7629_p0)  ;;  %v3761_v61 = vld [vmem:[#allocation7 + $0x8] sm:$0xff] (!%p7629_p0)  ;;  %vm3770_vm0 = vcmp.eq.s32.totalorder (!%p7629_p0), %v10245_v1, 1  ;;  %v9898_v53 = vmov (!%p7629_p0), 0.0  }
 0xc5e   : > { %3759 = sbr.rel (%p7629_p0) target bundleno = 3173 (0xc65), region = 100  ;;  %v3768_v52 = vld [vmem:[%s10222_s11] sm:$0xf] (!%p7629_p0)  ;;  %3762 = vst [vmem:[#allocation2] sm:$0xff] (!%p7629_p0), %v3760_v46  ;;  %3763 = vst [vmem:[#allocation2 + $0x8] sm:$0xff] (!%p7629_p0), %v3761_v61  ;;  %v7630_v48 = vsel (!%p7629_p0), %vm3770_vm0, 1.0, %v9898_v53 }
 0xc5f   : > { %3766 = vst [vmem:[#allocation3] sm:$0xff] (!%p7629_p0), %v3760_v46  ;;  %3767 = vst [vmem:[#allocation3 + $0x8] sm:$0xff] (!%p7629_p0), %v3761_v61 }
 0xc60   : > { %3769 = vst [vmem:[#allocation4] sm:$0xf] (!%p7629_p0), %v3768_v52  ;;  %7632 = vst [vmem:[%s10253_s15 + $0x38] sm:$0xff] (!%p7629_p0), %v9898_v53 }
 0xc61   : > { %7633 = vst [vmem:[%s10253_s15 + $0x40] sm:$0xff] (!%p7629_p0), %v9898_v53  ;;  %7631 = vst [vmem:[%s10253_s15 + $0x30] sm:$0xff] (!%p7629_p0), %v7630_v48 }
 0xc65 PF: > { %p7634_p11 = scmp.le.s32.totalorder %s10407_s17, 0 }
 0xc66   : > { %v9047_v54 = vld [vmem:[#allocation12 + $0x4] ss:$16 sps:$4 sm:$0xff] (!%p7634_p11)   ;;  %v9049_v55 = vld [vmem:[#allocation12] ss:$16 sps:$4 sm:$0xff] (!%p7634_p11)   ;;  %v9058_v59 = vld [vmem:[#allocation12 + $0xc] ss:$16 sps:$4 sm:$0xff] (!%p7634_p11)  }
 0xc67   : > { %3786 = sbr.rel (%p7634_p11) target bundleno = 4645 (0x1225), region = 104  ;;  %4197 = vmatprep.subr.bf16.mxu0 (!%p7634_p11), %v9047_v54  ;;  %v9050_v56 = vld [vmem:[#allocation12 + $0x24] ss:$16 sps:$4 sm:$0xff] (!%p7634_p11)   ;;  %v9052_v57 = vld [vmem:[#allocation12 + $0x20] ss:$16 sps:$4 sm:$0xff] (!%p7634_p11)   ;;  %4238 = vmatprep.subr.bf16.mxu1 (!%p7634_p11), %v9058_v59  ;;  %vm9901_vm1 = vmmov (!%p7634_p11), 0  }
 0xc68   : > { %4198 = vmatpush1.bf16.msra.mxu0 (!%p7634_p11), %v9049_v55  ;;  %v9053_v58 = vld [vmem:[#allocation12 + $0x44] ss:$16 sps:$4 sm:$0xff] (!%p7634_p11)   ;;  %v9061_v60 = vld [vmem:[#allocation12 + $0x8] ss:$16 sps:$4 sm:$0xff] (!%p7634_p11)   ;;  %v9055_v22 = vld [vmem:[#allocation12 + $0x40] ss:$16 sps:$4 sm:$0xff] (!%p7634_p11)  }
 0xc69   : > { %4199 = vmatprep.subr.bf16.mxu0 (!%p7634_p11), %v9050_v56  ;;  %v9056_v28 = vld [vmem:[#allocation12 + $0x64] ss:$16 sps:$4 sm:$0xff] (!%p7634_p11)   ;;  %4239 = vmatpush1.bf16.msra.mxu1 (!%p7634_p11), %v9061_v60  ;;  %v9064_v62 = vld [vmem:[#allocation12 + $0x2c] ss:$16 sps:$4 sm:$0xff] (!%p7634_p11)   ;;  %v9067_v63 = vld [vmem:[#allocation12 + $0x28] ss:$16 sps:$4 sm:$0xff] (!%p7634_p11)  }
 0xc6a   : > { %4240 = vmatprep.subr.bf16.mxu1 (!%p7634_p11), %v9064_v62  ;;  %v9060_v4 = vld [vmem:[#allocation12 + $0x60] ss:$16 sps:$4 sm:$0xff] (!%p7634_p11)   ;;  %v9062_v5 = vld [vmem:[#allocation12 + $0x84] ss:$16 sps:$4 sm:$0xff] (!%p7634_p11)   ;;  %v9070_v6 = vld [vmem:[#allocation12 + $0x4c] ss:$16 sps:$4 sm:$0xff] (!%p7634_p11)  }
 0xc6b   : > { %v9073_v8 = vld [vmem:[#allocation12 + $0x48] ss:$16 sps:$4 sm:$0xff] (!%p7634_p11)   ;;  %v9076_v9 = vld [vmem:[#allocation12 + $0x6c] ss:$16 sps:$4 sm:$0xff] (!%p7634_p11)   ;;  %v9066_v7 = vld [vmem:[#allocation12 + $0x80] ss:$16 sps:$4 sm:$0xff] (!%p7634_p11)  }
 0xc6c   : > { %4200 = vmatpush1.bf16.msra.mxu0 (!%p7634_p11), %v9052_v57  ;;  %v9068_v10 = vld [vmem:[#allocation12 + $0xa4] ss:$16 sps:$4 sm:$0xff] (!%p7634_p11)   ;;  %v9079_v11 = vld [vmem:[#allocation12 + $0x68] ss:$16 sps:$4 sm:$0xff] (!%p7634_p11)   ;;  %v9082_v12 = vld [vmem:[#allocation12 + $0x8c] ss:$16 sps:$4 sm:$0xff] (!%p7634_p11)  }
 0xc6d   : > { %4201 = vmatprep.subr.bf16.mxu0 (!%p7634_p11), %v9053_v58  ;;  %4241 = vmatpush1.bf16.msra.mxu1 (!%p7634_p11), %v9067_v63  ;;  %v9072_v13 = vld [vmem:[#allocation12 + $0xa0] ss:$16 sps:$4 sm:$0xff] (!%p7634_p11)   ;;  %v9074_v14 = vld [vmem:[#allocation12 + $0xc4] ss:$16 sps:$4 sm:$0xff] (!%p7634_p11)   ;;  %v9085_v15 = vld [vmem:[#allocation12 + $0x88] ss:$16 sps:$4 sm:$0xff] (!%p7634_p11)  }
 0xc6e   : > { %4242 = vmatprep.subr.bf16.mxu1 %v9070_v6  ;;  %v9088_v16 = vld [vmem:[#allocation12 + $0xac] ss:$16 sps:$4 sm:$0xff]   ;;  %v9078_v17 = vld [vmem:[#allocation12 + $0xc0] ss:$16 sps:$4 sm:$0xff]   ;;  %v9080_v18 = vld [vmem:[#allocation12 + $0xe4] ss:$16 sps:$4 sm:$0xff]  }
 0xc6f   : > { %v9091_v19 = vld [vmem:[#allocation12 + $0xa8] ss:$16 sps:$4 sm:$0xff]   ;;  %v9094_v20 = vld [vmem:[#allocation12 + $0xcc] ss:$16 sps:$4 sm:$0xff]   ;;  %v9084_v21 = vld [vmem:[#allocation12 + $0xe0] ss:$16 sps:$4 sm:$0xff]  }
 0xc70   : > { %4202 = vmatpush1.bf16.msra.mxu0 %v9055_v22  ;;  %v9086_v24 = vld [vmem:[#allocation12 + $0x104] ss:$16 sps:$4 sm:$0xff]   ;;  %v9097_v45 = vld [vmem:[#allocation12 + $0xc8] ss:$16 sps:$4 sm:$0xff]   ;;  %v9100_v51 = vld [vmem:[#allocation12 + $0xec] ss:$16 sps:$4 sm:$0xff]  }
 0xc71   : > { %4203 = vmatprep.subr.bf16.mxu0 %v9056_v28  ;;  %4243 = vmatpush1.bf16.msra.mxu1 %v9073_v8  ;;  %v9090_v26 = vld [vmem:[#allocation12 + $0x100] ss:$16 sps:$4 sm:$0xff]   ;;  %v9092_v27 = vld [vmem:[#allocation12 + $0x124] ss:$16 sps:$4 sm:$0xff]   ;;  %v9103_v23 = vld [vmem:[#allocation12 + $0xe8] ss:$16 sps:$4 sm:$0xff]  }
 0xc72   : > { %4244 = vmatprep.subr.bf16.mxu1 %v9076_v9  ;;  %v9106_v38 = vld [vmem:[#allocation12 + $0x10c] ss:$16 sps:$4 sm:$0xff]   ;;  %v9096_v29 = vld [vmem:[#allocation12 + $0x120] ss:$16 sps:$4 sm:$0xff]   ;;  %v9098_v25 = vld [vmem:[#allocation12 + $0x144] ss:$16 sps:$4 sm:$0xff]  }
 0xc73   : > { %v9109_v31 = vld [vmem:[#allocation12 + $0x108] ss:$16 sps:$4 sm:$0xff]   ;;  %v9112_v30 = vld [vmem:[#allocation12 + $0x12c] ss:$16 sps:$4 sm:$0xff]   ;;  %v9102_v33 = vld [vmem:[#allocation12 + $0x140] ss:$16 sps:$4 sm:$0xff]  }
 0xc74   : > { %4204 = vmatpush1.bf16.msra.mxu0 %v9060_v4  ;;  %v3788_v32 = vld [vmem:[#allocation2] sm:$0xff]  ;;  %v9104_v35 = vld [vmem:[#allocation12 + $0x164] ss:$16 sps:$4 sm:$0xff]   ;;  %v9115_v36 = vld [vmem:[#allocation12 + $0x128] ss:$16 sps:$4 sm:$0xff]   ;;  %vm5090_vm2 = vcmp.lt.s32.totalorder %v10251_v3, 322 }
 0xc75   : > { %4205 = vmatprep.subr.bf16.mxu0 %v9062_v5  ;;  %4245 = vmatpush1.bf16.msra.mxu1 %v9079_v11  ;;  %v3790_v34 = vpack.c.bf16 %v3788_v32, %v3788_v32  ;;  %v9118_v37 = vld [vmem:[#allocation12 + $0x14c] ss:$16 sps:$4 sm:$0xff]   ;;  %v9108_v39 = vld [vmem:[#allocation12 + $0x160] ss:$16 sps:$4 sm:$0xff]   ;;  %v9110_v40 = vld [vmem:[#allocation12 + $0x184] ss:$16 sps:$4 sm:$0xff]  }
 0xc76   : > { %4246 = vmatprep.subr.bf16.mxu1 %v9082_v12  ;;  %v9121_v41 = vld [vmem:[#allocation12 + $0x148] ss:$16 sps:$4 sm:$0xff]   ;;  %v9124_v42 = vld [vmem:[#allocation12 + $0x16c] ss:$16 sps:$4 sm:$0xff]   ;;  %v9114_v43 = vld [vmem:[#allocation12 + $0x180] ss:$16 sps:$4 sm:$0xff]  }
 0xc77   : > { %4229 = vmatprep.mubr.bf16.mxu0 %v3790_v34  ;;  %4270 = vmatprep.mubr.bf16.mxu1 %v3790_v34  ;;  %v9116_v44 = vld [vmem:[#allocation12 + $0x1a4] ss:$16 sps:$4 sm:$0xff]   ;;  %v9127_v47 = vld [vmem:[#allocation12 + $0x168] ss:$16 sps:$4 sm:$0xff]   ;;  %v9130_v49 = vld [vmem:[#allocation12 + $0x18c] ss:$16 sps:$4 sm:$0xff]  }
 0xc78   : > { %4206 = vmatpush1.bf16.msra.mxu0 %v9066_v7  ;;  %v9120_v50 = vld [vmem:[#allocation12 + $0x1a0] ss:$16 sps:$4 sm:$0xff]   ;;  %v9122_v46 = vld [vmem:[#allocation12 + $0x1c4] ss:$16 sps:$4 sm:$0xff]   ;;  %v9133_v61 = vld [vmem:[#allocation12 + $0x188] ss:$16 sps:$4 sm:$0xff]  }
 0xc79   : > { %4207 = vmatprep.subr.bf16.mxu0 %v9068_v10  ;;  %4247 = vmatpush1.bf16.msra.mxu1 %v9085_v15  ;;  %v9126_v52 = vld [vmem:[#allocation12 + $0x1c0] ss:$16 sps:$4 sm:$0xff]   ;;  %v9134_v53 = vld [vmem:[#allocation12 + $0x1ac] ss:$16 sps:$4 sm:$0xff]   ;;  %v9128_v48 = vld [vmem:[#allocation12 + $0x1e4] ss:$16 sps:$4 sm:$0xff]  }
 0xc7a   : > { %4248 = vmatprep.subr.bf16.mxu1 %v9088_v16  ;;  %v9136_v54 = vld [vmem:[#allocation12 + $0x1a8] ss:$16 sps:$4 sm:$0xff]   ;;  %v9137_v55 = vld [vmem:[#allocation12 + $0x1cc] ss:$16 sps:$4 sm:$0xff]   ;;  %v9132_v56 = vld [vmem:[#allocation12 + $0x1e0] ss:$16 sps:$4 sm:$0xff]  }
 0xc7b   : > { %v9139_v57 = vld [vmem:[#allocation12 + $0x1c8] ss:$16 sps:$4 sm:$0xff]   ;;  %v9145_v58 = vld [vmem:[#allocation13 + $0x4] ss:$16 sps:$4 sm:$0xff]   ;;  %v9140_v59 = vld [vmem:[#allocation12 + $0x1ec] ss:$16 sps:$4 sm:$0xff]  }
 0xc7c   : > { %4208 = vmatpush1.bf16.msra.mxu0 %v9072_v13  ;;  %v3787_v60 = vld [vmem:[#allocation4] sm:$0xf]  ;;  %v9143_v22 = vld [vmem:[#allocation13] ss:$16 sps:$4 sm:$0xff]   ;;  %v9142_v28 = vld [vmem:[#allocation12 + $0x1e8] ss:$16 sps:$4 sm:$0xff]  }
 0xc7d   : > { %4209 = vmatprep.subr.bf16.mxu0 %v9074_v14  ;;  %4249 = vmatpush1.bf16.msra.mxu1 %v9091_v19  ;;  %v9151_v62 = vld [vmem:[#allocation13 + $0x24] ss:$16 sps:$4 sm:$0xff]   ;;  %v9148_v63 = vld [vmem:[#allocation13 + $0xc] ss:$16 sps:$4 sm:$0xff]   ;;  %v9149_v4 = vld [vmem:[#allocation13 + $0x20] ss:$16 sps:$4 sm:$0xff]  }
 0xc7e   : > { %4250 = vmatprep.subr.bf16.mxu1 %v9094_v20  ;;  %v9146_v5 = vld [vmem:[#allocation13 + $0x8] ss:$16 sps:$4 sm:$0xff]   ;;  %v9157_v6 = vld [vmem:[#allocation13 + $0x44] ss:$16 sps:$4 sm:$0xff]   ;;  %v9154_v8 = vld [vmem:[#allocation13 + $0x2c] ss:$16 sps:$4 sm:$0xff]  }
 0xc7f   : > { %v9155_v9 = vld [vmem:[#allocation13 + $0x40] ss:$16 sps:$4 sm:$0xff]   ;;  %v9152_v7 = vld [vmem:[#allocation13 + $0x28] ss:$16 sps:$4 sm:$0xff]   ;;  %v9163_v10 = vld [vmem:[#allocation13 + $0x64] ss:$16 sps:$4 sm:$0xff]  }
 0xc80   : > { %4210 = vmatpush1.bf16.msra.mxu0 %v9078_v17  ;;  %v9160_v11 = vld [vmem:[#allocation13 + $0x4c] ss:$16 sps:$4 sm:$0xff]   ;;  %v9161_v12 = vld [vmem:[#allocation13 + $0x60] ss:$16 sps:$4 sm:$0xff]   ;;  %v9158_v13 = vld [vmem:[#allocation13 + $0x48] ss:$16 sps:$4 sm:$0xff]  }
 0xc81   : > { %4211 = vmatprep.subr.bf16.mxu0 %v9080_v18  ;;  %4251 = vmatpush1.bf16.msra.mxu1 %v9097_v45  ;;  %v9166_v14 = vld [vmem:[#allocation13 + $0x6c] ss:$16 sps:$4 sm:$0xff]   ;;  %v9164_v15 = vld [vmem:[#allocation13 + $0x68] ss:$16 sps:$4 sm:$0xff]   ;;  %v9169_v16 = vld [vmem:[#allocation13 + $0x84] ss:$16 sps:$4 sm:$0xff]  }
 0xc82   : > { %4252 = vmatprep.subr.bf16.mxu1 %v9100_v51  ;;  %v9172_v17 = vld [vmem:[#allocation13 + $0x8c] ss:$16 sps:$4 sm:$0xff]   ;;  %v9167_v18 = vld [vmem:[#allocation13 + $0x80] ss:$16 sps:$4 sm:$0xff]   ;;  %v9170_v19 = vld [vmem:[#allocation13 + $0x88] ss:$16 sps:$4 sm:$0xff]  }
 0xc83   : > { %v9175_v20 = vld [vmem:[#allocation13 + $0xa4] ss:$16 sps:$4 sm:$0xff]   ;;  %v9176_v45 = vld [vmem:[#allocation13 + $0xa8] ss:$16 sps:$4 sm:$0xff]   ;;  %v9196_v32 = vld [vmem:[#allocation13 + $0x10c] ss:$16 sps:$4 sm:$0xff]  }
 0xc84   : > { %4212 = vmatpush1.bf16.msra.mxu0 %v9084_v21  ;;  %v9178_v21 = vld [vmem:[#allocation13 + $0xac] ss:$16 sps:$4 sm:$0xff]   ;;  %v9181_v51 = vld [vmem:[#allocation13 + $0xc4] ss:$16 sps:$4 sm:$0xff]   ;;  %v9194_v34 = vld [vmem:[#allocation13 + $0x108] ss:$16 sps:$4 sm:$0xff]  }
 0xc85   : > { %4213 = vmatprep.subr.bf16.mxu0 %v9086_v24  ;;  %4253 = vmatpush1.bf16.msra.mxu1 %v9103_v23  ;;  %v9173_v24 = vld [vmem:[#allocation13 + $0xa0] ss:$16 sps:$4 sm:$0xff]   ;;  %v9182_v23 = vld [vmem:[#allocation13 + $0xc8] ss:$16 sps:$4 sm:$0xff]   ;;  %s5407_s19 = sld [smem:[#allocation6 + %s10407_s17]] }
 0xc86   : > { %4254 = vmatprep.subr.bf16.mxu1 %v9106_v38  ;;  %v9187_v38 = vld [vmem:[#allocation13 + $0xe4] ss:$16 sps:$4 sm:$0xff]  }
 0xc88   : > { %4214 = vmatpush1.bf16.msra.mxu0 %v9090_v26  ;;  %v9184_v26 = vld [vmem:[#allocation13 + $0xcc] ss:$16 sps:$4 sm:$0xff]  }
 0xc89   : > { %4215 = vmatprep.subr.bf16.mxu0 %v9092_v27  ;;  %4255 = vmatpush1.bf16.msra.mxu1 %v9109_v31  ;;  %v9179_v27 = vld [vmem:[#allocation13 + $0xc0] ss:$16 sps:$4 sm:$0xff]   ;;  %v9188_v31 = vld [vmem:[#allocation13 + $0xe8] ss:$16 sps:$4 sm:$0xff]  }
 0xc8a   : > { %4256 = vmatprep.subr.bf16.mxu1 %v9112_v30  ;;  %v9193_v30 = vld [vmem:[#allocation13 + $0x104] ss:$16 sps:$4 sm:$0xff]  }
 0xc8b   : > { %p5408_p9 = scmp.eq.s32.totalorder %s5407_s19, 1 }
 0xc8c   : > { %4216 = vmatpush1.bf16.msra.mxu0 %v9096_v29  ;;  %v9190_v29 = vld [vmem:[#allocation13 + $0xec] ss:$16 sps:$4 sm:$0xff]  }
 0xc8d   : > { %4217 = vmatprep.subr.bf16.mxu0 %v9098_v25  ;;  %4257 = vmatpush1.bf16.msra.mxu1 %v9115_v36  ;;  %v9185_v25 = vld [vmem:[#allocation13 + $0xe0] ss:$16 sps:$4 sm:$0xff]   ;;  %v9202_v36 = vld [vmem:[#allocation13 + $0x12c] ss:$16 sps:$4 sm:$0xff]   ;;  %s5411_s21 = scalar_select %p5408_p9, 1, 0 }
 0xc8e   : > { %4258 = vmatprep.subr.bf16.mxu1 %v9118_v37  ;;  %v9197_v37 = vld [vmem:[#allocation13 + $0x120] ss:$16 sps:$4 sm:$0xff]  }
 0xc90   : > { %4218 = vmatpush1.bf16.msra.mxu0 %v9102_v33  ;;  %v9191_v33 = vld [vmem:[#allocation13 + $0x100] ss:$16 sps:$4 sm:$0xff]  }
 0xc91   : > { %4219 = vmatprep.subr.bf16.mxu0 %v9104_v35  ;;  %4259 = vmatpush1.bf16.msra.mxu1 %v9121_v41  ;;  %v9199_v35 = vld [vmem:[#allocation13 + $0x124] ss:$16 sps:$4 sm:$0xff]   ;;  %v9208_v41 = vld [vmem:[#allocation13 + $0x14c] ss:$16 sps:$4 sm:$0xff]  }
 0xc92   : > { %4260 = vmatprep.subr.bf16.mxu1 %v9124_v42  ;;  %v9203_v42 = vld [vmem:[#allocation13 + $0x140] ss:$16 sps:$4 sm:$0xff]  }
 0xc94   : > { %4220 = vmatpush1.bf16.msra.mxu0 %v9108_v39  ;;  %v9200_v39 = vld [vmem:[#allocation13 + $0x128] ss:$16 sps:$4 sm:$0xff]  }
 0xc95   : > { %4221 = vmatprep.subr.bf16.mxu0 %v9110_v40  ;;  %4261 = vmatpush1.bf16.msra.mxu1 %v9127_v47  ;;  %v9205_v40 = vld [vmem:[#allocation13 + $0x144] ss:$16 sps:$4 sm:$0xff]   ;;  %v9214_v47 = vld [vmem:[#allocation13 + $0x16c] ss:$16 sps:$4 sm:$0xff]  }
 0xc96   : > { %4262 = vmatprep.subr.bf16.mxu1 %v9130_v49  ;;  %v9209_v49 = vld [vmem:[#allocation13 + $0x160] ss:$16 sps:$4 sm:$0xff]  }
 0xc98   : > { %4222 = vmatpush1.bf16.msra.mxu0 %v9114_v43  ;;  %v9206_v43 = vld [vmem:[#allocation13 + $0x148] ss:$16 sps:$4 sm:$0xff]  }
 0xc99   : > { %4223 = vmatprep.subr.bf16.mxu0 %v9116_v44  ;;  %4263 = vmatpush1.bf16.msra.mxu1 %v9133_v61  ;;  %v9211_v44 = vld [vmem:[#allocation13 + $0x164] ss:$16 sps:$4 sm:$0xff]   ;;  %v9220_v61 = vld [vmem:[#allocation13 + $0x18c] ss:$16 sps:$4 sm:$0xff]  }
 0xc9a   : > { %4264 = vmatprep.subr.bf16.mxu1 %v9134_v53  ;;  %v9218_v53 = vld [vmem:[#allocation13 + $0x188] ss:$16 sps:$4 sm:$0xff]  }
 0xc9c   : > { %4224 = vmatpush1.bf16.msra.mxu0 %v9120_v50  ;;  %v9212_v50 = vld [vmem:[#allocation13 + $0x168] ss:$16 sps:$4 sm:$0xff]  }
 0xc9d   : > { %4225 = vmatprep.subr.bf16.mxu0 %v9122_v46  ;;  %4265 = vmatpush1.bf16.msra.mxu1 %v9136_v54  ;;  %v9217_v46 = vld [vmem:[#allocation13 + $0x184] ss:$16 sps:$4 sm:$0xff]  }
 0xc9e   : > { %4266 = vmatprep.subr.bf16.mxu1 %v9137_v55  ;;  %v9223_v54 = vld [vmem:[#allocation13 + $0x1a4] ss:$16 sps:$4 sm:$0xff]   ;;  %v9224_v55 = vld [vmem:[#allocation13 + $0x1a8] ss:$16 sps:$4 sm:$0xff]  }
 0xca0   : > { %4226 = vmatpush1.bf16.msra.mxu0 %v9126_v52  ;;  %v9215_v52 = vld [vmem:[#allocation13 + $0x180] ss:$16 sps:$4 sm:$0xff]  }
 0xca1   : > { %4227 = vmatprep.subr.bf16.mxu0 %v9128_v48  ;;  %4267 = vmatpush1.bf16.msra.mxu1 %v9139_v57  ;;  %v9221_v48 = vld [vmem:[#allocation13 + $0x1a0] ss:$16 sps:$4 sm:$0xff]   ;;  %v9229_v57 = vld [vmem:[#allocation13 + $0x1c4] ss:$16 sps:$4 sm:$0xff]  }
 0xca2   : > { %4268 = vmatprep.subr.bf16.mxu1 %v9140_v59  ;;  %v9227_v59 = vld [vmem:[#allocation13 + $0x1c0] ss:$16 sps:$4 sm:$0xff]  }
 0xca4   : > { %4228 = vmatpush1.bf16.msra.mxu0 %v9132_v56  ;;  %v9226_v56 = vld [vmem:[#allocation13 + $0x1ac] ss:$16 sps:$4 sm:$0xff]  }
 0xca5   : > { %4715 = vmatprep.subr.bf16.mxu0 %v9145_v58  ;;  %4269 = vmatpush1.bf16.msra.mxu1 %v9142_v28  ;;  %v9232_v58 = vld [vmem:[#allocation13 + $0x1cc] ss:$16 sps:$4 sm:$0xff]   ;;  %v9235_v28 = vld [vmem:[#allocation13 + $0x1e4] ss:$16 sps:$4 sm:$0xff]  }
 0xca6   : > { %4756 = vmatprep.subr.bf16.mxu1 %v9148_v63 }
 0xca7   : > { %4230 = vmatmul.mubr.bf16.vlgmr.msra.gmra.mrb[0].mxu0 %v3787_v60 }
 0xca8   : > { %4716 = vmatpush1.bf16.msra.mxu0 %v9143_v22  ;;  %4271 = vmatmul.mubr.bf16.vlgmr.msra.gmra.mrb[0].mxu1 %v3787_v60  ;;  %v9230_v60 = vld [vmem:[#allocation13 + $0x1c8] ss:$16 sps:$4 sm:$0xff]  }
 0xca9   : > { %4717 = vmatprep.subr.bf16.mxu0 %v9151_v62  ;;  %4757 = vmatpush1.bf16.msra.mxu1 %v9146_v5  ;;  %v4305_v22 = vld [vmem:[#allocation2 + $0x8] sm:$0xff]  ;;  %v9238_v62 = vld [vmem:[#allocation13 + $0x1ec] ss:$16 sps:$4 sm:$0xff]  }
 0xcaa   : > { %4758 = vmatprep.subr.bf16.mxu1 %v9154_v8  ;;  %v4308_v63 = vpack.c.bf16 %v4305_v22, %v4305_v22  ;;  %v9236_v5 = vld [vmem:[#allocation13 + $0x1e8] ss:$16 sps:$4 sm:$0xff]   ;;  %v9254_v22 = vld [vmem:[#allocation15 + $0x50] ss:$12 sps:$4 sm:$0xff]  }
 0xcac   : > { %4718 = vmatpush1.bf16.msra.mxu0 %v9149_v4  ;;  %4747 = vmatprep.mubr.bf16.mxu0 %v4308_v63  ;;  %v9233_v4 = vld [vmem:[#allocation13 + $0x1e0] ss:$16 sps:$4 sm:$0xff]  }
 0xcad   : > { %4719 = vmatprep.subr.bf16.mxu0 %v9157_v6  ;;  %4759 = vmatpush1.bf16.msra.mxu1 %v9152_v7  ;;  %v10417_v6 = vshrl.u32 %v432_v0, 7 }
 0xcae   : > { %4760 = vmatprep.subr.bf16.mxu1 %v9160_v11  ;;  %4788 = vmatprep.mubr.bf16.mxu1 %v4308_v63  ;;  %v9258_v63 = vld [vmem:[#allocation15 + $0x68] ss:$12 sps:$4 sm:$0xff]  }
 0xcaf   : > { %v10420_v8 = vsub.s32 0, %v10417_v6  ;;  %v10426_v7 = vsub.s32 1, %v10417_v6 }
 0xcb0   : > { %4720 = vmatpush1.bf16.msra.mxu0 %v9155_v9  ;;  %v3855_v9 = vld [vmem:[%s10615_s4] sm:$0xf] }
 0xcb1   : > { %4721 = vmatprep.subr.bf16.mxu0 %v9163_v10  ;;  %4761 = vmatpush1.bf16.msra.mxu1 %v9158_v13  ;;  %v3860_v10 = vrot.slane %v3855_v9, %v10420_v8  ;;  %v3864_v11 = vrot.slane %v3855_v9, %v10426_v7 }
 0xcb2   : > { %4762 = vmatprep.subr.bf16.mxu1 %v9166_v14 }
 0xcb4   : > { %4722 = vmatpush1.bf16.msra.mxu0 %v9161_v12  ;;  %v3871_v12 = vsub.s32 3, %v10417_v6 }
 0xcb5   : > { %4763 = vmatpush1.bf16.msra.mxu1 %v9164_v15  ;;  %4723 = vmatprep.subr.bf16.mxu0 %v9169_v16 }
 0xcb6   : > { %4764 = vmatprep.subr.bf16.mxu1 %v9172_v17 }
 0xcb8   : > { %4724 = vmatpush1.bf16.msra.mxu0 %v9167_v18 }
 0xcb9   : > { %4765 = vmatpush1.bf16.msra.mxu1 %v9170_v19  ;;  %4725 = vmatprep.subr.bf16.mxu0 %v9175_v20  ;;  %v3872_v20 = vrot.slane %v3855_v9, %v3871_v12 }
 0xcba   : > { %4766 = vmatprep.subr.bf16.mxu1 %v9178_v21 }
 0xcbc   : > { %4726 = vmatpush1.bf16.msra.mxu0 %v9173_v24  ;;  %v10434_v24 = vsub.s32 2, %v10417_v6 }
 0xcbd   : > { %4767 = vmatpush1.bf16.msra.mxu1 %v9176_v45  ;;  %4727 = vmatprep.subr.bf16.mxu0 %v9181_v51 }
 0xcbe   : > { %4768 = vmatprep.subr.bf16.mxu1 %v9184_v26 }
 0xcc0   : > { %4728 = vmatpush1.bf16.msra.mxu0 %v9179_v27 }
 0xcc1   : > { %4769 = vmatpush1.bf16.msra.mxu1 %v9182_v23  ;;  %4729 = vmatprep.subr.bf16.mxu0 %v9187_v38  ;;  %v3868_v23 = vrot.slane %v3855_v9, %v10434_v24  ;;  %v9262_v9 = vld [vmem:[#allocation15 + $0x80] ss:$12 sps:$4 sm:$0xff]  }
 0xcc2   : > { %4770 = vmatprep.subr.bf16.mxu1 %v9190_v29 }
 0xcc4   : > { %4730 = vmatpush1.bf16.msra.mxu0 %v9185_v25 }
 0xcc5   : > { %4771 = vmatpush1.bf16.msra.mxu1 %v9188_v31  ;;  %4731 = vmatprep.subr.bf16.mxu0 %v9193_v30 }
 0xcc6   : > { %4772 = vmatprep.subr.bf16.mxu1 %v9196_v32 }
 0xcc8   : > { %4732 = vmatpush1.bf16.msra.mxu0 %v9191_v33 }
 0xcc9   : > { %4773 = vmatpush1.bf16.msra.mxu1 %v9194_v34  ;;  %4733 = vmatprep.subr.bf16.mxu0 %v9199_v35 }
 0xcca   : > { %4774 = vmatprep.subr.bf16.mxu1 %v9202_v36  ;;  %v3789_v36 = vld [vmem:[#allocation3] sm:$0xff] }
 0xccc   : > { %4734 = vmatpush1.bf16.msra.mxu0 %v9197_v37 }
 0xccd   : > { %4775 = vmatpush1.bf16.msra.mxu1 %v9200_v39  ;;  %4735 = vmatprep.subr.bf16.mxu0 %v9205_v40 }
 0xcce   : > { %4776 = vmatprep.subr.bf16.mxu1 %v9208_v41 }
 0xcd0   : > { %4736 = vmatpush1.bf16.msra.mxu0 %v9203_v42 }
 0xcd1   : > { %4777 = vmatpush1.bf16.msra.mxu1 %v9206_v43  ;;  %4737 = vmatprep.subr.bf16.mxu0 %v9211_v44 }
 0xcd2   : > { %4778 = vmatprep.subr.bf16.mxu1 %v9214_v47 }
 0xcd4   : > { %4738 = vmatpush1.bf16.msra.mxu0 %v9209_v49 }
 0xcd5   : > { %4779 = vmatpush1.bf16.msra.mxu1 %v9212_v50  ;;  %4739 = vmatprep.subr.bf16.mxu0 %v9217_v46  ;;  %v9241_v46 = vld [vmem:[#allocation15 + $0x4] ss:$12 sps:$4 sm:$0xff]  }
 0xcd6   : > { %4780 = vmatprep.subr.bf16.mxu1 %v9220_v61  ;;  %v9239_v61 = vld [vmem:[#allocation15] ss:$12 sps:$4 sm:$0xff]  }
 0xcd8   : > { %4740 = vmatpush1.bf16.msra.mxu0 %v9215_v52  ;;  %v9242_v52 = vld [vmem:[#allocation15 + $0x8] ss:$12 sps:$4 sm:$0xff]  }
 0xcd9   : > { %4781 = vmatpush1.bf16.msra.mxu1 %v9218_v53  ;;  %4741 = vmatprep.subr.bf16.mxu0 %v9223_v54  ;;  %v9899_v53 = vmov 0.0   ;;  %v9243_v54 = vld [vmem:[#allocation15 + $0x18] ss:$12 sps:$4 sm:$0xff]  }
 0xcda   : > { %4782 = vmatprep.subr.bf16.mxu1 %v9226_v56  ;;  %v9249_v56 = vld [vmem:[#allocation15 + $0x34] ss:$12 sps:$4 sm:$0xff]  }
 0xcdc   : > { %4742 = vmatpush1.bf16.msra.mxu0 %v9221_v48  ;;  %v9245_v48 = vld [vmem:[#allocation15 + $0x1c] ss:$12 sps:$4 sm:$0xff]  }
 0xcdd   : > { %4783 = vmatpush1.bf16.msra.mxu1 %v9224_v55  ;;  %4743 = vmatprep.subr.bf16.mxu0 %v9229_v57  ;;  %v9246_v55 = vld [vmem:[#allocation15 + $0x20] ss:$12 sps:$4 sm:$0xff]   ;;  %v9247_v57 = vld [vmem:[#allocation15 + $0x30] ss:$12 sps:$4 sm:$0xff]  }
 0xcde   : > { %4784 = vmatprep.subr.bf16.mxu1 %v9232_v58  ;;  %v9250_v58 = vld [vmem:[#allocation15 + $0x38] ss:$12 sps:$4 sm:$0xff]  }
 0xce0   : > { %4744 = vmatpush1.bf16.msra.mxu0 %v9227_v59  ;;  %v9253_v59 = vld [vmem:[#allocation15 + $0x4c] ss:$12 sps:$4 sm:$0xff]  }
 0xce1   : > { %4785 = vmatpush1.bf16.msra.mxu1 %v9230_v60  ;;  %4745 = vmatprep.subr.bf16.mxu0 %v9235_v28  ;;  %v9251_v60 = vld [vmem:[#allocation15 + $0x48] ss:$12 sps:$4 sm:$0xff]   ;;  %v9257_v28 = vld [vmem:[#allocation15 + $0x64] ss:$12 sps:$4 sm:$0xff]  }
 0xce2   : > { %4786 = vmatprep.subr.bf16.mxu1 %v9238_v62  ;;  %v9255_v62 = vld [vmem:[#allocation15 + $0x60] ss:$12 sps:$4 sm:$0xff]  }
 0xce4   : > { %4746 = vmatpush1.bf16.msra.mxu0 %v9233_v4  ;;  %v9261_v4 = vld [vmem:[#allocation15 + $0x7c] ss:$12 sps:$4 sm:$0xff]  }
 0xce5   : > { %4787 = vmatpush1.bf16.msra.mxu1 %v9236_v5  ;;  %5003 = vmatprep.subr.bf16.mxu0 %v9241_v46  ;;  %v9259_v5 = vld [vmem:[#allocation15 + $0x78] ss:$12 sps:$4 sm:$0xff]  }
 0xce6   : > { %8277 = vmatprep.subr.bf16.mxu1 %v9899_v53 }
 0xd7a   : > { %v4231_v13 = vpop.f32.mrb[0].mxu0 }
 0xd7b   : > { %v4232_v14 = vadd.f32 %v4231_v13, %v3860_v10  ;;  %v4233_v15 = vpop.f32.mrb[1].mxu0  ;;  %v4272_v45 = vpop.f32.mrb[0].mxu1  ;;  %v9265_v10 = vld [vmem:[#allocation15 + $0x94] ss:$12 sps:$4 sm:$0xff]   ;;  %v9263_v13 = vld [vmem:[#allocation15 + $0x90] ss:$12 sps:$4 sm:$0xff]  }
 0xd7c   : > { %v4234_v16 = vadd.f32 %v4233_v15, %v3864_v11  ;;  %v4235_v17 = vpop.f32.mrb[2].mxu0  ;;  %v4274_v51 = vpop.f32.mrb[1].mxu1  ;;  %v4273_v25 = vadd.f32 %v4272_v45, %v3868_v23  ;;  %v9900_v11 = vmov 0   ;;  %v9269_v15 = vld [vmem:[#allocation15 + $0xac] ss:$12 sps:$4 sm:$0xff]  }
 0xd7d   : > { %v7699_v18 = vmul.f32 -1.442695, %v4232_v14  ;;  %v4236_v19 = vpop.f32.mrb[3].mxu0  ;;  %v4275_v26 = vadd.f32 %v4274_v51, %v3872_v20  ;;  %v4276_v27 = vpop.f32.mrb[2].mxu1  ;;  %v9266_v14 = vld [vmem:[#allocation15 + $0x98] ss:$12 sps:$4 sm:$0xff]  }
 0xd7e   : > { %v7700_v21 = vmul.f32 -1.442695, %v4234_v16  ;;  %v4277_v38 = vpop.f32.mrb[3].mxu1  ;;  %v9267_v16 = vld [vmem:[#allocation15 + $0xa8] ss:$12 sps:$4 sm:$0xff]  }
 0xd7f   : > { %9295 = vpow2.f32 %v7699_v18  ;;  %v7701_v29 = vmul.f32 -1.442695, %v4275_v26  ;;  %v9270_v17 = vld [vmem:[#allocation15 + $0xb0] ss:$12 sps:$4 sm:$0xff]   ;;  %v4373_v18 = vld [vmem:[%s10617_s6] sm:$0xf] }
 0xd80   : > { %9297 = vpow2.f32 %v7700_v21  ;;  %v4378_v19 = vrot.slane %v4373_v18, %v10420_v8  ;;  %v4382_v20 = vrot.slane %v4373_v18, %v10426_v7 }
 0xd81   : > { %9299 = vpow2.f32 %v7701_v29 }
 0xd82   : > { %9301 = vtanh.f32 %v4273_v25 }
 0xd89   : > { %v9296_v31 = vpop.eup %9295 }
 0xd8a   : > { %v9298_v30 = vpop.eup %9297  ;;  %v4282_v32 = vadd.f32 1.0, %v9296_v31 }
 0xd8b   : > { %v4288_v33 = vadd.f32 1.0, %v9298_v30  ;;  %v9300_v34 = vpop.eup %9299 }
 0xd8c   : > { %9303 = vrcp.f32 %v4282_v32  ;;  %v9302_v35 = vpop.eup %9301  ;;  %v4295_v39 = vadd.f32 1.0, %v9300_v34 }
 0xd8d   : > { %9305 = vrcp.f32 %v4288_v33  ;;  %v4390_v33 = vrot.slane %v4373_v18, %v3871_v12 }
 0xd8e   : > { %9307 = vrcp.f32 %v4295_v39 }
 0xd96   : > { %v9304_v37 = vpop.eup %9303 }
 0xd97   : > { %v9306_v40 = vpop.eup %9305  ;;  %v4299_v41 = vmul.f32 %v9304_v37, %v9302_v35  ;;  %v4386_v35 = vrot.slane %v4373_v18, %v10434_v24 }
 0xd98   : > { %v4298_v42 = vmul.f32 %v9306_v40, %v3789_v36  ;;  %v9308_v44 = vpop.eup %9307 }
 0xd9a   : > { %v4300_v43 = vadd.f32 %v4299_v41, %v4298_v42 }
 0xd9c   : > { %9309 = vtanh.f32 %v4300_v43  ;;  %4822 = vst [vmem:[#allocation3] sm:$0xff] %v4300_v43 }
 0xda6   : > { %v9310_v47 = vpop.eup %9309 }
 0xda7   : > { %v4302_v49 = vmul.f32 %v9310_v47, %v9308_v44  ;;  %v4307_v47 = vld [vmem:[#allocation3 + $0x8] sm:$0xff] }
 0xda9   : > { %v4303_v50 = vpack.c.bf16 %v4302_v49, %v4302_v49  ;;  %4821 = vst [vmem:[#allocation2] sm:$0xff] %v4302_v49 }
 0xdab   : > { %4748 = vmatmul.mubr.bf16.vlgmr.msra.gmra.mrb[4].mxu0 %v4303_v50  ;;  %4789 = vmatmul.mubr.bf16.vlgmr.msra.gmra.mrb[4].mxu1 %v4303_v50 }
 0xdac   : > { %5004 = vmatpush1.bf16.msra.mxu0 %v9239_v61  ;;  %8278 = vmatpush3.bf16.msra.mxu1 %v9242_v52 }
 0xdad   : > { %8279 = vmatprep.subr.bf16.mxu1 %v9899_v53  ;;  %5005 = vmatprep.subr.bf16.mxu0 %v9245_v48 }
 0xdae   : > { %5035 = vmatprep.mubr.bf16.mxu0 %v9900_v11  ;;  %8293 = vmatprep.mubr.msk.bf16.mxu1 %vm9901_vm1, %v9899_v53 }
 0xdb0   : > { %5006 = vmatpush1.bf16.msra.mxu0 %v9243_v54  ;;  %8280 = vmatpush3.bf16.msra.mxu1 %v9246_v55 }
 0xdb1   : > { %8281 = vmatprep.subr.bf16.mxu1 %v9899_v53  ;;  %5007 = vmatprep.subr.bf16.mxu0 %v9249_v56  ;;  %v4858_v56 = vld [vmem:[%s10619_s8] sm:$0x7] }
 0xdb4   : > { %5008 = vmatpush1.bf16.msra.mxu0 %v9247_v57  ;;  %8282 = vmatpush3.bf16.msra.mxu1 %v9250_v58  ;;  %v4863_v57 = vrot.slane %v4858_v56, %v10420_v8  ;;  %v4871_v58 = vrot.slane %v4858_v56, %v10434_v24 }
 0xdb5   : > { %8283 = vmatprep.subr.bf16.mxu1 %v9899_v53  ;;  %5009 = vmatprep.subr.bf16.mxu0 %v9253_v59  ;;  %v4867_v59 = vrot.slane %v4858_v56, %v10426_v7 }
 0xdb8   : > { %5010 = vmatpush1.bf16.msra.mxu0 %v9251_v60  ;;  %8284 = vmatpush3.bf16.msra.mxu1 %v9254_v22 }
 0xdb9   : > { %8285 = vmatprep.subr.bf16.mxu1 %v9899_v53  ;;  %5011 = vmatprep.subr.bf16.mxu0 %v9257_v28 }
 0xdbc   : > { %5012 = vmatpush1.bf16.msra.mxu0 %v9255_v62  ;;  %8286 = vmatpush3.bf16.msra.mxu1 %v9258_v63 }
 0xdbd   : > { %5013 = vmatprep.subr.bf16.mxu0 %v9261_v4  ;;  %8287 = vmatprep.subr.bf16.mxu1 %v9899_v53 }
 0xdc0   : > { %5014 = vmatpush1.bf16.msra.mxu0 %v9259_v5  ;;  %8288 = vmatpush3.bf16.msra.mxu1 %v9262_v9 }
 0xdc1   : > { %5015 = vmatprep.subr.bf16.mxu0 %v9265_v10  ;;  %8289 = vmatprep.subr.bf16.mxu1 %v9899_v53 }
 0xdc4   : > { %5016 = vmatpush1.bf16.msra.mxu0 %v9263_v13  ;;  %8290 = vmatpush3.bf16.msra.mxu1 %v9266_v14 }
 0xdc5   : > { %5017 = vmatprep.subr.bf16.mxu0 %v9269_v15  ;;  %8291 = vmatprep.subr.bf16.mxu1 %v9899_v53 }
 0xdc8   : > { %5018 = vmatpush1.bf16.msra.mxu0 %v9267_v16  ;;  %8292 = vmatpush3.bf16.msra.mxu1 %v9270_v17 }
 0xdc9   : > { %8297 = vmatprep.subr.bf16.mxu1 %v9899_v53 }
 0xe7e   : > { %v4749_v21 = vpop.f32.mrb[4].mxu0  ;;  %v4790_v45 = vpop.f32.mrb[4].mxu1 }
 0xe7f   : > { %v4750_v51 = vadd.f32 %v4749_v21, %v4378_v19  ;;  %v4751_v26 = vpop.f32.mrb[5].mxu0  ;;  %v4792_v27 = vpop.f32.mrb[5].mxu1  ;;  %v4791_v37 = vadd.f32 %v4790_v45, %v4386_v35  ;;  %v9271_v45 = vld [vmem:[#allocation16 + $0x40] sm:$0xff]  }
 0xe80   : > { %v4752_v23 = vadd.f32 %v4751_v26, %v4382_v20  ;;  %v4753_v38 = vpop.f32.mrb[6].mxu0  ;;  %v4794_v29 = vpop.f32.mrb[6].mxu1  ;;  %v4793_v34 = vadd.f32 %v4792_v27, %v4390_v33  ;;  %v9273_v26 = vld [vmem:[#allocation16] sm:$0xff]   ;;  %v9274_v27 = vld [vmem:[#allocation16 + $0x48] sm:$0xff]   ;;  %8126 = vmatprep.subr.bf16.mxu0 %v9271_v45  ;;  %v9282_v33 = vld [vmem:[#allocation16 + $0x18] sm:$0xff]  }
 0xe81   : > { %v7766_v25 = vmul.f32 -1.442695, %v4750_v51  ;;  %v4754_v31 = vpop.f32.mrb[7].mxu0  ;;  %v4795_v30 = vpop.f32.mrb[7].mxu1  ;;  %v9272_v51 = vld [vmem:[#allocation16 + $0x80] sm:$0xff]   ;;  %v9276_v38 = vld [vmem:[#allocation16 + $0x8] sm:$0xff]  }
 0xe82   : > { %v7767_v32 = vmul.f32 -1.442695, %v4752_v23  ;;  %v7768_v36 = vmul.f32 -1.442695, %v4793_v34  ;;  %v9275_v23 = vld [vmem:[#allocation16 + $0x88] sm:$0xff]   ;;  %v9277_v29 = vld [vmem:[#allocation16 + $0x50] sm:$0xff]  }
 0xe83   : > { %9311 = vpow2.f32 %v7766_v25  ;;  %v9278_v25 = vld [vmem:[#allocation16 + $0x90] sm:$0xff]   ;;  %v9280_v30 = vld [vmem:[#allocation16 + $0x58] sm:$0xff]   ;;  %v9283_v34 = vld [vmem:[#allocation16 + $0x60] sm:$0xff]  }
 0xe84   : > { %9313 = vpow2.f32 %v7767_v32  ;;  %v9279_v31 = vld [vmem:[#allocation16 + $0x10] sm:$0xff]   ;;  %v9281_v32 = vld [vmem:[#allocation16 + $0x98] sm:$0xff]   ;;  %v9284_v35 = vld [vmem:[#allocation16 + $0xa0] sm:$0xff]  }
 0xe85   : > { %9315 = vpow2.f32 %v7768_v36  ;;  %v9285_v36 = vld [vmem:[#allocation16 + $0x20] sm:$0xff]  }
 0xe86   : > { %9317 = vtanh.f32 %v4791_v37  ;;  %v9286_v37 = vld [vmem:[#allocation16 + $0x68] sm:$0xff]  }
 0xe8d   : > { %v9312_v39 = vpop.eup %9311 }
 0xe8e   : > { %v9314_v40 = vpop.eup %9313  ;;  %v4800_v41 = vadd.f32 1.0, %v9312_v39  ;;  %v9287_v39 = vld [vmem:[#allocation16 + $0xa8] sm:$0xff]  }
 0xe8f   : > { %v4806_v42 = vadd.f32 1.0, %v9314_v40  ;;  %v9316_v43 = vpop.eup %9315  ;;  %v9288_v40 = vld [vmem:[#allocation16 + $0x28] sm:$0xff]  }
 0xe90   : > { %9319 = vrcp.f32 %v4800_v41  ;;  %v9318_v44 = vpop.eup %9317  ;;  %v4813_v50 = vadd.f32 1.0, %v9316_v43  ;;  %v9289_v41 = vld [vmem:[#allocation16 + $0x70] sm:$0xff]  }
 0xe91   : > { %9321 = vrcp.f32 %v4806_v42  ;;  %v9290_v42 = vld [vmem:[#allocation16 + $0xb0] sm:$0xff]  }
 0xe92   : > { %9323 = vrcp.f32 %v4813_v50  ;;  %v9293_v50 = vld [vmem:[#allocation16 + $0xb8] sm:$0xff]  }
 0xe9a   : > { %v9320_v6 = vpop.eup %9319 }
 0xe9b   : > { %v9322_v12 = vpop.eup %9321  ;;  %v4817_v49 = vmul.f32 %v9320_v6, %v9318_v44 }
 0xe9c   : > { %v4816_v46 = vmul.f32 %v9322_v12, %v4307_v47  ;;  %v9324_v52 = vpop.eup %9323  ;;  %v9291_v12 = vld [vmem:[#allocation16 + $0x30] sm:$0xff]  }
 0xe9e   : > { %v4818_v61 = vadd.f32 %v4817_v49, %v4816_v46  ;;  %v9292_v49 = vld [vmem:[#allocation16 + $0x78] sm:$0xff]  }
 0xe9f   : > { %v9294_v46 = vld [vmem:[#allocation16 + $0x38] sm:$0xff]  }
 0xea0   : > { %9325 = vtanh.f32 %v4818_v61  ;;  %4824 = vst [vmem:[#allocation3 + $0x8] sm:$0xff] %v4818_v61 }
 0xeaa   : > { %v9326_v48 = vpop.eup %9325 }
 0xeab   : > { %v4820_v54 = vmul.f32 %v9326_v48, %v9324_v52 }
 0xead   : > { %4823 = vst [vmem:[#allocation2 + $0x8] sm:$0xff] %v4820_v54  ;;  %v4825_v55 = vpack.c.bf16 %v4820_v54, %v4820_v54 }
 0xeaf   : > { %5036 = vmatmul.mubr.bf16.vlgmr.msra.gmra.mrb[8].mxu0 %v4825_v55  ;;  %8294 = vmatmul.mubr.bf16.vlgmr.msra.gmra.mrb[8].mxu1 %v4825_v55  ;;  %v9902_v55 = vmov 1.0|1.0  }
 0xeb0   : > { %8313 = vmatprep.mubr.msk.bf16.mxu1 %vm9901_vm1, %v9899_v53  ;;  %8298 = vmatpush3.bf16.msra.mxu1 %v9272_v51 }
 0xeb1   : > { %8127 = vmatpush3.bf16.msra.mxu0 %v9273_v26  ;;  %8299 = vmatprep.subr.bf16.mxu1 %v9899_v53 }
 0xeb2   : > { %8128 = vmatprep.subr.bf16.mxu0 %v9274_v27 }
 0xeb4   : > { %8300 = vmatpush3.bf16.msra.mxu1 %v9275_v23 }
 0xeb5   : > { %8129 = vmatpush3.bf16.msra.mxu0 %v9276_v38  ;;  %8301 = vmatprep.subr.bf16.mxu1 %v9899_v53 }
 0xeb6   : > { %8130 = vmatprep.subr.bf16.mxu0 %v9277_v29 }
 0xeb8   : > { %8302 = vmatpush3.bf16.msra.mxu1 %v9278_v25 }
 0xeb9   : > { %8131 = vmatpush3.bf16.msra.mxu0 %v9279_v31  ;;  %8303 = vmatprep.subr.bf16.mxu1 %v9899_v53 }
 0xeba   : > { %8132 = vmatprep.subr.bf16.mxu0 %v9280_v30 }
 0xebc   : > { %8304 = vmatpush3.bf16.msra.mxu1 %v9281_v32 }
 0xebd   : > { %8133 = vmatpush3.bf16.msra.mxu0 %v9282_v33  ;;  %8305 = vmatprep.subr.bf16.mxu1 %v9899_v53 }
 0xebe   : > { %8134 = vmatprep.subr.bf16.mxu0 %v9283_v34 }
 0xec0   : > { %8306 = vmatpush3.bf16.msra.mxu1 %v9284_v35 }
 0xec1   : > { %8135 = vmatpush3.bf16.msra.mxu0 %v9285_v36  ;;  %8307 = vmatprep.subr.bf16.mxu1 %v9899_v53 }
 0xec2   : > { %8136 = vmatprep.subr.bf16.mxu0 %v9286_v37 }
 0xec4   : > { %8308 = vmatpush3.bf16.msra.mxu1 %v9287_v39 }
 0xec5   : > { %8137 = vmatpush3.bf16.msra.mxu0 %v9288_v40  ;;  %8309 = vmatprep.subr.bf16.mxu1 %v9899_v53 }
 0xec6   : > { %8138 = vmatprep.subr.bf16.mxu0 %v9289_v41 }
 0xec8   : > { %8310 = vmatpush3.bf16.msra.mxu1 %v9290_v42 }
 0xec9   : > { %8311 = vmatprep.subr.bf16.mxu1 %v9899_v53  ;;  %8139 = vmatpush3.bf16.msra.mxu0 %v9291_v12 }
 0xeca   : > { %8140 = vmatprep.subr.bf16.mxu0 %v9292_v49 }
 0xecc   : > { %8312 = vmatpush3.bf16.msra.mxu1 %v9293_v50 }
 0xecd   : > { %8141 = vmatpush3.bf16.msra.mxu0 %v9294_v46 }
 0xf82   : > { %v5037_v60 = vpop.f32.mrb[8].mxu0  ;;  %v5078_v22 = vpop.f32.mrb[8].mxu1 }
 0xf83   : > { %v5038_v28 = vadd.f32 %v5037_v60, %v4863_v57  ;;  %v5079_v62 = vadd.f32 %v5078_v22, %v4871_v58  ;;  %v5039_v63 = vpop.f32.mrb[9].mxu0  ;;  %v8295_v4 = vpop.f32.mrb[9].mxu1 }
 0xf84   : > { %v5040_v5 = vadd.f32 %v5039_v63, %v4867_v59  ;;  %v5041_v9 = vpop.f32.mrb[10].mxu0  ;;  %v5081_v10 = vpop.f32.mrb[10].mxu1 }
 0xf85   : > { %7793 = vst [vmem:[%s10253_s15 + $0x30] sm:$0xff] %v5038_v28  ;;  %7795 = vst [vmem:[%s10253_s15 + $0x40] sm:$0xff] %v5079_v62  ;;  %v5042_v11 = vpop.f32.mrb[11].mxu0  ;;  %v8296_v8 = vpop.f32.mrb[11].mxu1  ;;  %v5093_v13 = vsel %vm5090_vm2, %v5079_v62, -inf }
 0xf86   : > { %7794 = vst [vmem:[%s10253_s15 + $0x38] sm:$0xff] %v5040_v5  ;;  %v5094_v24 = vmax.f32 %v5038_v28, %v5040_v5  ;;  %v7829_v9 = vld [vmem:[%s10222_s11 + $0x8] sm:$0xf] }
 0xf88   : > { %v5095_v14 = vmax.f32 %v5094_v24, %v5093_v13 }
 0xf8a   : > { %5096 = vmax.xlane.f32.xlu0 %v5095_v14 }
0x1017   : > { %v5097_v7 = vpop.xlane.xlu0 %5096 }
0x1018   : > { %vm5098_vm3 = vcmp.eq.f32.partialorder %v5038_v28, %v5097_v7  ;;  %vm5099_vm4 = vcmp.eq.f32.partialorder %v5040_v5, %v5097_v7  ;;  %vm5100_vm5 = vcmp.eq.f32.partialorder %v5093_v13, %v5097_v7  ;;  %v5412_v28 = vstv %s5411_s21 }
0x1019   : > { %v5101_v15 = vsel %vm5098_vm3, %v10245_v1, 384  ;;  %v5102_v16 = vsel %vm5099_vm4, %v10248_v2, 384  ;;  %v5103_v17 = vsel %vm5100_vm5, %v10251_v3, 384  ;;  %vm5413_vm15 = vcmp.eq.s32.totalorder %v5412_v28, 1 }
0x101a   : > { %vm5104_vm6 = vcmp.lt.s32.totalorder %v5101_v15, %v5102_v16 }
0x101b   : > { %v5105_v18 = vsel %vm5104_vm6, %v5101_v15, %v5102_v16 }
0x101c   : > { %vm5106_vm7 = vcmp.lt.s32.totalorder %v5105_v18, %v5103_v17 }
0x101d   : > { %v5107_v19 = vsel %vm5106_vm7, %v5105_v18, %v5103_v17 }
0x101e   : > { %v5109_v20 = vshra.s32 %v5107_v19, 16  ;;  %v5108_v43 = vand.u32 65535, %v5107_v19 }
0x1020   : > { %v5111_v21 = vcvt.s32.f32 %v5109_v20  ;;  %v5110_v47 = vcvt.s32.f32 %v5108_v43 }
0x1022   : > { %5112 = vmin.xlane.f32.xlu0 %v5111_v21 }
0x10af   : > { %v5113_v44 = vpop.xlane.xlu0 %5112 }
0x10b0   : > { %vm5114_vm8 = vcmp.eq.f32.partialorder %v5111_v21, %v5113_v44  ;;  %v5119_v61 = vcvt.f32.s32 %v5113_v44 }
0x10b1   : > { %v5115_v6 = vsel %vm5114_vm8, %v5110_v47, inf }
0x10b2   : > { %5116 = vmin.xlane.f32.xlu1 %v5115_v6  ;;  %v5120_v48 = vshll.u32 %v5119_v61, 16 }
0x113f   : > { %v5117_v52 = vpop.xlane.xlu1 %5116 }
0x1140   : > { %v5118_v54 = vcvt.f32.s32 %v5117_v52 }
0x1142   : > { %v5121_v53 = vadd.s32 %v5120_v48, %v5118_v54 }
0x1144   : > { %vm5123_vm9 = vcmp.eq.s32.totalorder %v10248_v2, %v5121_v53  ;;  %vm5124_vm10 = vcmp.eq.s32.totalorder %v10251_v3, %v5121_v53  ;;  %vm5122_vm11 = vcmp.eq.s32.totalorder %v10245_v1, %v5121_v53 }
0x1145   : > { %vm7823_vm12 = vmpackc.low %vm5123_vm9, %vm5123_vm9 }
0x1146   : > { %7824 = vmatprep.mubr.msk.bf16.mxu0 %vm7823_vm12, %v9902_v55  ;;  %vm7827_vm13 = vmpackc.low %vm5124_vm10, %vm5124_vm10 }
0x1147   : > { %8314 = vmatmul.mubr.msk.bf16.vlgmr.msra.gmra.mrb[12].mxu1 %vm7827_vm13, %v9902_v55  ;;  %vm7825_vm14 = vmpackc.low %vm5122_vm11, %vm5122_vm11 }
0x1148   : > { %7826 = vmatmul.mubr.msk.bf16.vlgmr.msra.gmra.mrb[12].mxu0 %vm7825_vm14, %v9902_v55 }
0x121a   : > { %v5400_v56 = vpop.f32.mrb[12].mxu1 }
0x121b   : > { %v8142_v57 = vpop.f32.mrb[12].mxu0  ;;  %v8315_v58 = vpop.f32.mrb[13].mxu1 }
0x121c   : > { %v8143_v59 = vpop.f32.mrb[13].mxu0  ;;  %v5403_v60 = vpop.f32.mrb[14].mxu1 }
0x121d   : > { %v8144_v22 = vadd.f32 %v8143_v59, %v8142_v57  ;;  %v8145_v62 = vpop.f32.mrb[14].mxu0  ;;  %v8316_v63 = vpop.f32.mrb[15].mxu1 }
0x121e   : > { %v8146_v4 = vpop.f32.mrb[15].mxu0 }
0x121f   : > { %v5401_v5 = vadd.f32 %v8144_v22, %v5400_v56 }
0x1221   : > { %v5406_v10 = vpack.c.bf16 %v5401_v5, %v5401_v5 }
0x1223   : > { %v5414_v11 = vsel %vm5413_vm15, %v7829_v9, %v5406_v10 }
0x1224   : > { %5415 = vst [vmem:[#allocation4] sm:$0xf] %v5414_v11 }
0x1225 PF: > { %s10484_s20 = sadd.s32 3, %s10242_s30 }
0x1226   : > { %p7830_p13 = scmp.ne.s32.totalorder %s10484_s20, 0 }
0x1227   : > { %v5421_v8 = vld [vmem:[#allocation7] sm:$0xff] (!%p7830_p13)  ;;  %v5422_v24 = vld [vmem:[#allocation7 + $0x8] sm:$0xff] (!%p7830_p13)  ;;  %vm5431_vm0 = vcmp.eq.s32.totalorder (!%p7830_p13), %v10245_v1, 1  ;;  %v9903_v14 = vmov (!%p7830_p13), 0.0  }
0x1228   : > { %5420 = sbr.rel (%p7830_p13) target bundleno = 4655 (0x122f), region = 108  ;;  %v5429_v13 = vld [vmem:[%s10222_s11] sm:$0xf] (!%p7830_p13)  ;;  %5423 = vst [vmem:[#allocation2] sm:$0xff] (!%p7830_p13), %v5421_v8  ;;  %5424 = vst [vmem:[#allocation2 + $0x8] sm:$0xff] (!%p7830_p13), %v5422_v24  ;;  %v7831_v7 = vsel (!%p7830_p13), %vm5431_vm0, 1.0, %v9903_v14 }
0x1229   : > { %5427 = vst [vmem:[#allocation3] sm:$0xff] (!%p7830_p13), %v5421_v8  ;;  %5428 = vst [vmem:[#allocation3 + $0x8] sm:$0xff] (!%p7830_p13), %v5422_v24 }
0x122a   : > { %5430 = vst [vmem:[#allocation4] sm:$0xf] (!%p7830_p13), %v5429_v13  ;;  %7833 = vst [vmem:[%s10253_s15 + $0x50] sm:$0xff] (!%p7830_p13), %v9903_v14 }
0x122b   : > { %7834 = vst [vmem:[%s10253_s15 + $0x58] sm:$0xff] (!%p7830_p13), %v9903_v14  ;;  %7832 = vst [vmem:[%s10253_s15 + $0x48] sm:$0xff] (!%p7830_p13), %v7831_v7 }
0x122f PF: > { %p7835_p6 = scmp.le.s32.totalorder %s10484_s20, 0 }
0x1230   : > { %v9327_v15 = vld [vmem:[#allocation12 + $0x4] ss:$16 sps:$4 sm:$0xff] (!%p7835_p6)   ;;  %v9329_v16 = vld [vmem:[#allocation12] ss:$16 sps:$4 sm:$0xff] (!%p7835_p6)   ;;  %v9338_v20 = vld [vmem:[#allocation12 + $0xc] ss:$16 sps:$4 sm:$0xff] (!%p7835_p6)  }
0x1231   : > { %5447 = sbr.rel (%p7835_p6) target bundleno = 6127 (0x17ef), region = 112  ;;  %5858 = vmatprep.subr.bf16.mxu0 (!%p7835_p6), %v9327_v15  ;;  %v9330_v17 = vld [vmem:[#allocation12 + $0x24] ss:$16 sps:$4 sm:$0xff] (!%p7835_p6)   ;;  %v9332_v18 = vld [vmem:[#allocation12 + $0x20] ss:$16 sps:$4 sm:$0xff] (!%p7835_p6)   ;;  %5899 = vmatprep.subr.bf16.mxu1 (!%p7835_p6), %v9338_v20  ;;  %vm9906_vm1 = vmmov (!%p7835_p6), 0  }
0x1232   : > { %5859 = vmatpush1.bf16.msra.mxu0 (!%p7835_p6), %v9329_v16  ;;  %v9333_v19 = vld [vmem:[#allocation12 + $0x44] ss:$16 sps:$4 sm:$0xff] (!%p7835_p6)   ;;  %v9341_v21 = vld [vmem:[#allocation12 + $0x8] ss:$16 sps:$4 sm:$0xff] (!%p7835_p6)   ;;  %v9335_v45 = vld [vmem:[#allocation12 + $0x40] ss:$16 sps:$4 sm:$0xff] (!%p7835_p6)  }
0x1233   : > { %5860 = vmatprep.subr.bf16.mxu0 (!%p7835_p6), %v9330_v17  ;;  %v9336_v51 = vld [vmem:[#allocation12 + $0x64] ss:$16 sps:$4 sm:$0xff] (!%p7835_p6)   ;;  %5900 = vmatpush1.bf16.msra.mxu1 (!%p7835_p6), %v9341_v21  ;;  %v9344_v26 = vld [vmem:[#allocation12 + $0x2c] ss:$16 sps:$4 sm:$0xff] (!%p7835_p6)   ;;  %v9347_v27 = vld [vmem:[#allocation12 + $0x28] ss:$16 sps:$4 sm:$0xff] (!%p7835_p6)  }
0x1234   : > { %5901 = vmatprep.subr.bf16.mxu1 (!%p7835_p6), %v9344_v26  ;;  %v9340_v23 = vld [vmem:[#allocation12 + $0x60] ss:$16 sps:$4 sm:$0xff] (!%p7835_p6)   ;;  %v9342_v38 = vld [vmem:[#allocation12 + $0x84] ss:$16 sps:$4 sm:$0xff] (!%p7835_p6)   ;;  %v9350_v29 = vld [vmem:[#allocation12 + $0x4c] ss:$16 sps:$4 sm:$0xff] (!%p7835_p6)  }
0x1235   : > { %v9353_v25 = vld [vmem:[#allocation12 + $0x48] ss:$16 sps:$4 sm:$0xff] (!%p7835_p6)   ;;  %v9356_v31 = vld [vmem:[#allocation12 + $0x6c] ss:$16 sps:$4 sm:$0xff] (!%p7835_p6)   ;;  %v9346_v30 = vld [vmem:[#allocation12 + $0x80] ss:$16 sps:$4 sm:$0xff] (!%p7835_p6)  }
0x1236   : > { %5861 = vmatpush1.bf16.msra.mxu0 (!%p7835_p6), %v9332_v18  ;;  %v9348_v32 = vld [vmem:[#allocation12 + $0xa4] ss:$16 sps:$4 sm:$0xff] (!%p7835_p6)   ;;  %v9359_v33 = vld [vmem:[#allocation12 + $0x68] ss:$16 sps:$4 sm:$0xff] (!%p7835_p6)   ;;  %v9362_v34 = vld [vmem:[#allocation12 + $0x8c] ss:$16 sps:$4 sm:$0xff] (!%p7835_p6)  }
0x1237   : > { %5862 = vmatprep.subr.bf16.mxu0 (!%p7835_p6), %v9333_v19  ;;  %5902 = vmatpush1.bf16.msra.mxu1 (!%p7835_p6), %v9347_v27  ;;  %v9352_v35 = vld [vmem:[#allocation12 + $0xa0] ss:$16 sps:$4 sm:$0xff] (!%p7835_p6)   ;;  %v9354_v36 = vld [vmem:[#allocation12 + $0xc4] ss:$16 sps:$4 sm:$0xff] (!%p7835_p6)   ;;  %v9365_v37 = vld [vmem:[#allocation12 + $0x88] ss:$16 sps:$4 sm:$0xff] (!%p7835_p6)  }
0x1238   : > { %5903 = vmatprep.subr.bf16.mxu1 %v9350_v29  ;;  %v9368_v39 = vld [vmem:[#allocation12 + $0xac] ss:$16 sps:$4 sm:$0xff]   ;;  %v9358_v40 = vld [vmem:[#allocation12 + $0xc0] ss:$16 sps:$4 sm:$0xff]   ;;  %v9360_v41 = vld [vmem:[#allocation12 + $0xe4] ss:$16 sps:$4 sm:$0xff]  }
0x1239   : > { %v9371_v42 = vld [vmem:[#allocation12 + $0xa8] ss:$16 sps:$4 sm:$0xff]   ;;  %v9374_v43 = vld [vmem:[#allocation12 + $0xcc] ss:$16 sps:$4 sm:$0xff]   ;;  %v9364_v44 = vld [vmem:[#allocation12 + $0xe0] ss:$16 sps:$4 sm:$0xff]  }
0x123a   : > { %5863 = vmatpush1.bf16.msra.mxu0 %v9335_v45  ;;  %v9366_v47 = vld [vmem:[#allocation12 + $0x104] ss:$16 sps:$4 sm:$0xff]   ;;  %v9377_v6 = vld [vmem:[#allocation12 + $0xc8] ss:$16 sps:$4 sm:$0xff]   ;;  %v9380_v12 = vld [vmem:[#allocation12 + $0xec] ss:$16 sps:$4 sm:$0xff]  }
0x123b   : > { %5864 = vmatprep.subr.bf16.mxu0 %v9336_v51  ;;  %5904 = vmatpush1.bf16.msra.mxu1 %v9353_v25  ;;  %v9370_v49 = vld [vmem:[#allocation12 + $0x100] ss:$16 sps:$4 sm:$0xff]   ;;  %v9372_v50 = vld [vmem:[#allocation12 + $0x124] ss:$16 sps:$4 sm:$0xff]   ;;  %v9383_v46 = vld [vmem:[#allocation12 + $0xe8] ss:$16 sps:$4 sm:$0xff]  }
0x123c   : > { %5905 = vmatprep.subr.bf16.mxu1 %v9356_v31  ;;  %v9386_v61 = vld [vmem:[#allocation12 + $0x10c] ss:$16 sps:$4 sm:$0xff]   ;;  %v9376_v52 = vld [vmem:[#allocation12 + $0x120] ss:$16 sps:$4 sm:$0xff]   ;;  %v9378_v48 = vld [vmem:[#allocation12 + $0x144] ss:$16 sps:$4 sm:$0xff]  }
0x123d   : > { %v9389_v54 = vld [vmem:[#allocation12 + $0x108] ss:$16 sps:$4 sm:$0xff]   ;;  %v9392_v53 = vld [vmem:[#allocation12 + $0x12c] ss:$16 sps:$4 sm:$0xff]   ;;  %v9382_v56 = vld [vmem:[#allocation12 + $0x140] ss:$16 sps:$4 sm:$0xff]  }
0x123e   : > { %5865 = vmatpush1.bf16.msra.mxu0 %v9340_v23  ;;  %v5449_v55 = vld [vmem:[#allocation2] sm:$0xff]  ;;  %v9384_v58 = vld [vmem:[#allocation12 + $0x164] ss:$16 sps:$4 sm:$0xff]   ;;  %v9395_v59 = vld [vmem:[#allocation12 + $0x128] ss:$16 sps:$4 sm:$0xff]   ;;  %vm6751_vm2 = vcmp.lt.s32.totalorder %v10251_v3, 322 }
0x123f   : > { %5866 = vmatprep.subr.bf16.mxu0 %v9342_v38  ;;  %5906 = vmatpush1.bf16.msra.mxu1 %v9359_v33  ;;  %v5451_v57 = vpack.c.bf16 %v5449_v55, %v5449_v55  ;;  %v9398_v60 = vld [vmem:[#allocation12 + $0x14c] ss:$16 sps:$4 sm:$0xff]   ;;  %v9388_v22 = vld [vmem:[#allocation12 + $0x160] ss:$16 sps:$4 sm:$0xff]   ;;  %v9390_v28 = vld [vmem:[#allocation12 + $0x184] ss:$16 sps:$4 sm:$0xff]  }
0x1240   : > { %5907 = vmatprep.subr.bf16.mxu1 %v9362_v34  ;;  %v9401_v62 = vld [vmem:[#allocation12 + $0x148] ss:$16 sps:$4 sm:$0xff]   ;;  %v9404_v63 = vld [vmem:[#allocation12 + $0x16c] ss:$16 sps:$4 sm:$0xff]   ;;  %v9394_v4 = vld [vmem:[#allocation12 + $0x180] ss:$16 sps:$4 sm:$0xff]  }
0x1241   : > { %5890 = vmatprep.mubr.bf16.mxu0 %v5451_v57  ;;  %5931 = vmatprep.mubr.bf16.mxu1 %v5451_v57  ;;  %v9396_v5 = vld [vmem:[#allocation12 + $0x1a4] ss:$16 sps:$4 sm:$0xff]   ;;  %v9407_v9 = vld [vmem:[#allocation12 + $0x168] ss:$16 sps:$4 sm:$0xff]   ;;  %v9410_v10 = vld [vmem:[#allocation12 + $0x18c] ss:$16 sps:$4 sm:$0xff]  }
0x1242   : > { %5867 = vmatpush1.bf16.msra.mxu0 %v9346_v30  ;;  %v9400_v11 = vld [vmem:[#allocation12 + $0x1a0] ss:$16 sps:$4 sm:$0xff]   ;;  %v9402_v8 = vld [vmem:[#allocation12 + $0x1c4] ss:$16 sps:$4 sm:$0xff]   ;;  %v9413_v24 = vld [vmem:[#allocation12 + $0x188] ss:$16 sps:$4 sm:$0xff]  }
0x1243   : > { %5868 = vmatprep.subr.bf16.mxu0 %v9348_v32  ;;  %5908 = vmatpush1.bf16.msra.mxu1 %v9365_v37  ;;  %v9406_v13 = vld [vmem:[#allocation12 + $0x1c0] ss:$16 sps:$4 sm:$0xff]   ;;  %v9414_v14 = vld [vmem:[#allocation12 + $0x1ac] ss:$16 sps:$4 sm:$0xff]   ;;  %v9408_v7 = vld [vmem:[#allocation12 + $0x1e4] ss:$16 sps:$4 sm:$0xff]  }
0x1244   : > { %5909 = vmatprep.subr.bf16.mxu1 %v9368_v39  ;;  %v9416_v15 = vld [vmem:[#allocation12 + $0x1a8] ss:$16 sps:$4 sm:$0xff]   ;;  %v9417_v16 = vld [vmem:[#allocation12 + $0x1cc] ss:$16 sps:$4 sm:$0xff]   ;;  %v9412_v17 = vld [vmem:[#allocation12 + $0x1e0] ss:$16 sps:$4 sm:$0xff]  }
0x1245   : > { %v9419_v18 = vld [vmem:[#allocation12 + $0x1c8] ss:$16 sps:$4 sm:$0xff]   ;;  %v9425_v19 = vld [vmem:[#allocation13 + $0x4] ss:$16 sps:$4 sm:$0xff]   ;;  %v9420_v20 = vld [vmem:[#allocation12 + $0x1ec] ss:$16 sps:$4 sm:$0xff]  }
0x1246   : > { %5869 = vmatpush1.bf16.msra.mxu0 %v9352_v35  ;;  %v5448_v21 = vld [vmem:[#allocation4] sm:$0xf]  ;;  %v9423_v45 = vld [vmem:[#allocation13] ss:$16 sps:$4 sm:$0xff]   ;;  %v9422_v51 = vld [vmem:[#allocation12 + $0x1e8] ss:$16 sps:$4 sm:$0xff]  }
0x1247   : > { %5870 = vmatprep.subr.bf16.mxu0 %v9354_v36  ;;  %5910 = vmatpush1.bf16.msra.mxu1 %v9371_v42  ;;  %v9431_v26 = vld [vmem:[#allocation13 + $0x24] ss:$16 sps:$4 sm:$0xff]   ;;  %v9428_v27 = vld [vmem:[#allocation13 + $0xc] ss:$16 sps:$4 sm:$0xff]   ;;  %v9429_v23 = vld [vmem:[#allocation13 + $0x20] ss:$16 sps:$4 sm:$0xff]  }
0x1248   : > { %5911 = vmatprep.subr.bf16.mxu1 %v9374_v43  ;;  %v9426_v38 = vld [vmem:[#allocation13 + $0x8] ss:$16 sps:$4 sm:$0xff]   ;;  %v9437_v29 = vld [vmem:[#allocation13 + $0x44] ss:$16 sps:$4 sm:$0xff]   ;;  %v9434_v25 = vld [vmem:[#allocation13 + $0x2c] ss:$16 sps:$4 sm:$0xff]  }
0x1249   : > { %v9435_v31 = vld [vmem:[#allocation13 + $0x40] ss:$16 sps:$4 sm:$0xff]   ;;  %v9432_v30 = vld [vmem:[#allocation13 + $0x28] ss:$16 sps:$4 sm:$0xff]   ;;  %v9443_v32 = vld [vmem:[#allocation13 + $0x64] ss:$16 sps:$4 sm:$0xff]  }
0x124a   : > { %5871 = vmatpush1.bf16.msra.mxu0 %v9358_v40  ;;  %v9440_v33 = vld [vmem:[#allocation13 + $0x4c] ss:$16 sps:$4 sm:$0xff]   ;;  %v9441_v34 = vld [vmem:[#allocation13 + $0x60] ss:$16 sps:$4 sm:$0xff]   ;;  %v9438_v35 = vld [vmem:[#allocation13 + $0x48] ss:$16 sps:$4 sm:$0xff]  }
0x124b   : > { %5872 = vmatprep.subr.bf16.mxu0 %v9360_v41  ;;  %5912 = vmatpush1.bf16.msra.mxu1 %v9377_v6  ;;  %v9446_v36 = vld [vmem:[#allocation13 + $0x6c] ss:$16 sps:$4 sm:$0xff]   ;;  %v9444_v37 = vld [vmem:[#allocation13 + $0x68] ss:$16 sps:$4 sm:$0xff]   ;;  %v9449_v39 = vld [vmem:[#allocation13 + $0x84] ss:$16 sps:$4 sm:$0xff]  }
0x124c   : > { %5913 = vmatprep.subr.bf16.mxu1 %v9380_v12  ;;  %v9452_v40 = vld [vmem:[#allocation13 + $0x8c] ss:$16 sps:$4 sm:$0xff]   ;;  %v9447_v41 = vld [vmem:[#allocation13 + $0x80] ss:$16 sps:$4 sm:$0xff]   ;;  %v9450_v42 = vld [vmem:[#allocation13 + $0x88] ss:$16 sps:$4 sm:$0xff]  }
0x124d   : > { %v9455_v43 = vld [vmem:[#allocation13 + $0xa4] ss:$16 sps:$4 sm:$0xff]   ;;  %v9456_v6 = vld [vmem:[#allocation13 + $0xa8] ss:$16 sps:$4 sm:$0xff]   ;;  %v9476_v55 = vld [vmem:[#allocation13 + $0x10c] ss:$16 sps:$4 sm:$0xff]  }
0x124e   : > { %5873 = vmatpush1.bf16.msra.mxu0 %v9364_v44  ;;  %v9458_v44 = vld [vmem:[#allocation13 + $0xac] ss:$16 sps:$4 sm:$0xff]   ;;  %v9461_v12 = vld [vmem:[#allocation13 + $0xc4] ss:$16 sps:$4 sm:$0xff]   ;;  %v9474_v57 = vld [vmem:[#allocation13 + $0x108] ss:$16 sps:$4 sm:$0xff]  }
0x124f   : > { %5874 = vmatprep.subr.bf16.mxu0 %v9366_v47  ;;  %5914 = vmatpush1.bf16.msra.mxu1 %v9383_v46  ;;  %v9453_v47 = vld [vmem:[#allocation13 + $0xa0] ss:$16 sps:$4 sm:$0xff]   ;;  %v9462_v46 = vld [vmem:[#allocation13 + $0xc8] ss:$16 sps:$4 sm:$0xff]   ;;  %s7068_s28 = sld [smem:[#allocation6 + %s10484_s20]] }
0x1250   : > { %5915 = vmatprep.subr.bf16.mxu1 %v9386_v61  ;;  %v9467_v61 = vld [vmem:[#allocation13 + $0xe4] ss:$16 sps:$4 sm:$0xff]  }
0x1252   : > { %5875 = vmatpush1.bf16.msra.mxu0 %v9370_v49  ;;  %v9464_v49 = vld [vmem:[#allocation13 + $0xcc] ss:$16 sps:$4 sm:$0xff]  }
0x1253   : > { %5876 = vmatprep.subr.bf16.mxu0 %v9372_v50  ;;  %5916 = vmatpush1.bf16.msra.mxu1 %v9389_v54  ;;  %v9459_v50 = vld [vmem:[#allocation13 + $0xc0] ss:$16 sps:$4 sm:$0xff]   ;;  %v9468_v54 = vld [vmem:[#allocation13 + $0xe8] ss:$16 sps:$4 sm:$0xff]  }
0x1254   : > { %5917 = vmatprep.subr.bf16.mxu1 %v9392_v53  ;;  %v9473_v53 = vld [vmem:[#allocation13 + $0x104] ss:$16 sps:$4 sm:$0xff]  }
0x1255   : > { %p7069_p10 = scmp.eq.s32.totalorder %s7068_s28, 1 }
0x1256   : > { %5877 = vmatpush1.bf16.msra.mxu0 %v9376_v52  ;;  %v9470_v52 = vld [vmem:[#allocation13 + $0xec] ss:$16 sps:$4 sm:$0xff]  }
0x1257   : > { %5878 = vmatprep.subr.bf16.mxu0 %v9378_v48  ;;  %5918 = vmatpush1.bf16.msra.mxu1 %v9395_v59  ;;  %v9465_v48 = vld [vmem:[#allocation13 + $0xe0] ss:$16 sps:$4 sm:$0xff]   ;;  %v9482_v59 = vld [vmem:[#allocation13 + $0x12c] ss:$16 sps:$4 sm:$0xff]   ;;  %s7072_s27 = scalar_select %p7069_p10, 1, 0 }
0x1258   : > { %5919 = vmatprep.subr.bf16.mxu1 %v9398_v60  ;;  %v9477_v60 = vld [vmem:[#allocation13 + $0x120] ss:$16 sps:$4 sm:$0xff]  }
0x125a   : > { %5879 = vmatpush1.bf16.msra.mxu0 %v9382_v56  ;;  %v9471_v56 = vld [vmem:[#allocation13 + $0x100] ss:$16 sps:$4 sm:$0xff]  }
0x125b   : > { %5880 = vmatprep.subr.bf16.mxu0 %v9384_v58  ;;  %5920 = vmatpush1.bf16.msra.mxu1 %v9401_v62  ;;  %v9479_v58 = vld [vmem:[#allocation13 + $0x124] ss:$16 sps:$4 sm:$0xff]   ;;  %v9488_v62 = vld [vmem:[#allocation13 + $0x14c] ss:$16 sps:$4 sm:$0xff]  }
0x125c   : > { %5921 = vmatprep.subr.bf16.mxu1 %v9404_v63  ;;  %v9483_v63 = vld [vmem:[#allocation13 + $0x140] ss:$16 sps:$4 sm:$0xff]  }
0x125e   : > { %5881 = vmatpush1.bf16.msra.mxu0 %v9388_v22  ;;  %v9480_v22 = vld [vmem:[#allocation13 + $0x128] ss:$16 sps:$4 sm:$0xff]  }
0x125f   : > { %5882 = vmatprep.subr.bf16.mxu0 %v9390_v28  ;;  %5922 = vmatpush1.bf16.msra.mxu1 %v9407_v9  ;;  %v9485_v28 = vld [vmem:[#allocation13 + $0x144] ss:$16 sps:$4 sm:$0xff]   ;;  %v9494_v9 = vld [vmem:[#allocation13 + $0x16c] ss:$16 sps:$4 sm:$0xff]  }
0x1260   : > { %5923 = vmatprep.subr.bf16.mxu1 %v9410_v10  ;;  %v9489_v10 = vld [vmem:[#allocation13 + $0x160] ss:$16 sps:$4 sm:$0xff]  }
0x1262   : > { %5883 = vmatpush1.bf16.msra.mxu0 %v9394_v4  ;;  %v9486_v4 = vld [vmem:[#allocation13 + $0x148] ss:$16 sps:$4 sm:$0xff]  }
0x1263   : > { %5884 = vmatprep.subr.bf16.mxu0 %v9396_v5  ;;  %5924 = vmatpush1.bf16.msra.mxu1 %v9413_v24  ;;  %v9491_v5 = vld [vmem:[#allocation13 + $0x164] ss:$16 sps:$4 sm:$0xff]   ;;  %v9500_v24 = vld [vmem:[#allocation13 + $0x18c] ss:$16 sps:$4 sm:$0xff]  }
0x1264   : > { %5925 = vmatprep.subr.bf16.mxu1 %v9414_v14  ;;  %v9498_v14 = vld [vmem:[#allocation13 + $0x188] ss:$16 sps:$4 sm:$0xff]  }
0x1266   : > { %5885 = vmatpush1.bf16.msra.mxu0 %v9400_v11  ;;  %v9492_v11 = vld [vmem:[#allocation13 + $0x168] ss:$16 sps:$4 sm:$0xff]  }
0x1267   : > { %5886 = vmatprep.subr.bf16.mxu0 %v9402_v8  ;;  %5926 = vmatpush1.bf16.msra.mxu1 %v9416_v15  ;;  %v9497_v8 = vld [vmem:[#allocation13 + $0x184] ss:$16 sps:$4 sm:$0xff]  }
0x1268   : > { %5927 = vmatprep.subr.bf16.mxu1 %v9417_v16  ;;  %v9503_v15 = vld [vmem:[#allocation13 + $0x1a4] ss:$16 sps:$4 sm:$0xff]   ;;  %v9504_v16 = vld [vmem:[#allocation13 + $0x1a8] ss:$16 sps:$4 sm:$0xff]  }
0x126a   : > { %5887 = vmatpush1.bf16.msra.mxu0 %v9406_v13  ;;  %v9495_v13 = vld [vmem:[#allocation13 + $0x180] ss:$16 sps:$4 sm:$0xff]  }
0x126b   : > { %5888 = vmatprep.subr.bf16.mxu0 %v9408_v7  ;;  %5928 = vmatpush1.bf16.msra.mxu1 %v9419_v18  ;;  %v9501_v7 = vld [vmem:[#allocation13 + $0x1a0] ss:$16 sps:$4 sm:$0xff]   ;;  %v9509_v18 = vld [vmem:[#allocation13 + $0x1c4] ss:$16 sps:$4 sm:$0xff]  }
0x126c   : > { %5929 = vmatprep.subr.bf16.mxu1 %v9420_v20  ;;  %v9507_v20 = vld [vmem:[#allocation13 + $0x1c0] ss:$16 sps:$4 sm:$0xff]  }
0x126e   : > { %5889 = vmatpush1.bf16.msra.mxu0 %v9412_v17  ;;  %v9506_v17 = vld [vmem:[#allocation13 + $0x1ac] ss:$16 sps:$4 sm:$0xff]  }
0x126f   : > { %6376 = vmatprep.subr.bf16.mxu0 %v9425_v19  ;;  %5930 = vmatpush1.bf16.msra.mxu1 %v9422_v51  ;;  %v9512_v19 = vld [vmem:[#allocation13 + $0x1cc] ss:$16 sps:$4 sm:$0xff]   ;;  %v9515_v51 = vld [vmem:[#allocation13 + $0x1e4] ss:$16 sps:$4 sm:$0xff]  }
0x1270   : > { %6417 = vmatprep.subr.bf16.mxu1 %v9428_v27 }
0x1271   : > { %5891 = vmatmul.mubr.bf16.vlgmr.msra.gmra.mrb[0].mxu0 %v5448_v21 }
0x1272   : > { %6377 = vmatpush1.bf16.msra.mxu0 %v9423_v45  ;;  %5932 = vmatmul.mubr.bf16.vlgmr.msra.gmra.mrb[0].mxu1 %v5448_v21  ;;  %v9510_v21 = vld [vmem:[#allocation13 + $0x1c8] ss:$16 sps:$4 sm:$0xff]  }
0x1273   : > { %6378 = vmatprep.subr.bf16.mxu0 %v9431_v26  ;;  %6418 = vmatpush1.bf16.msra.mxu1 %v9426_v38  ;;  %v5966_v45 = vld [vmem:[#allocation2 + $0x8] sm:$0xff]  ;;  %v9518_v26 = vld [vmem:[#allocation13 + $0x1ec] ss:$16 sps:$4 sm:$0xff]  }
0x1274   : > { %6419 = vmatprep.subr.bf16.mxu1 %v9434_v25  ;;  %v5969_v27 = vpack.c.bf16 %v5966_v45, %v5966_v45  ;;  %v9516_v38 = vld [vmem:[#allocation13 + $0x1e8] ss:$16 sps:$4 sm:$0xff]   ;;  %v9537_v45 = vld [vmem:[#allocation15 + $0x64] ss:$12 sps:$4 sm:$0xff]  }
0x1276   : > { %6379 = vmatpush1.bf16.msra.mxu0 %v9429_v23  ;;  %6408 = vmatprep.mubr.bf16.mxu0 %v5969_v27  ;;  %v9513_v23 = vld [vmem:[#allocation13 + $0x1e0] ss:$16 sps:$4 sm:$0xff]  }
0x1277   : > { %6380 = vmatprep.subr.bf16.mxu0 %v9437_v29  ;;  %6420 = vmatpush1.bf16.msra.mxu1 %v9432_v30  ;;  %v10494_v29 = vshrl.u32 %v432_v0, 7 }
0x1278   : > { %6421 = vmatprep.subr.bf16.mxu1 %v9440_v33  ;;  %6449 = vmatprep.mubr.bf16.mxu1 %v5969_v27  ;;  %v9541_v27 = vld [vmem:[#allocation15 + $0x7c] ss:$12 sps:$4 sm:$0xff]  }
0x1279   : > { %v10497_v25 = vsub.s32 0, %v10494_v29  ;;  %v10503_v30 = vsub.s32 1, %v10494_v29 }
0x127a   : > { %6381 = vmatpush1.bf16.msra.mxu0 %v9435_v31  ;;  %v5516_v31 = vld [vmem:[%s10615_s4] sm:$0xf] }
0x127b   : > { %6382 = vmatprep.subr.bf16.mxu0 %v9443_v32  ;;  %6422 = vmatpush1.bf16.msra.mxu1 %v9438_v35  ;;  %v5521_v32 = vrot.slane %v5516_v31, %v10497_v25  ;;  %v5525_v33 = vrot.slane %v5516_v31, %v10503_v30 }
0x127c   : > { %6423 = vmatprep.subr.bf16.mxu1 %v9446_v36 }
0x127e   : > { %6383 = vmatpush1.bf16.msra.mxu0 %v9441_v34  ;;  %v5532_v34 = vsub.s32 3, %v10494_v29 }
0x127f   : > { %6424 = vmatpush1.bf16.msra.mxu1 %v9444_v37  ;;  %6384 = vmatprep.subr.bf16.mxu0 %v9449_v39 }
0x1280   : > { %6425 = vmatprep.subr.bf16.mxu1 %v9452_v40 }
0x1282   : > { %6385 = vmatpush1.bf16.msra.mxu0 %v9447_v41 }
0x1283   : > { %6426 = vmatpush1.bf16.msra.mxu1 %v9450_v42  ;;  %6386 = vmatprep.subr.bf16.mxu0 %v9455_v43  ;;  %v5533_v42 = vrot.slane %v5516_v31, %v5532_v34 }
0x1284   : > { %6427 = vmatprep.subr.bf16.mxu1 %v9458_v44  ;;  %v10511_v44 = vsub.s32 2, %v10494_v29 }
0x1286   : > { %6387 = vmatpush1.bf16.msra.mxu0 %v9453_v47 }
0x1287   : > { %6428 = vmatpush1.bf16.msra.mxu1 %v9456_v6  ;;  %6388 = vmatprep.subr.bf16.mxu0 %v9461_v12 }
0x1288   : > { %6429 = vmatprep.subr.bf16.mxu1 %v9464_v49 }
0x128a   : > { %6389 = vmatpush1.bf16.msra.mxu0 %v9459_v50  ;;  %v5529_v50 = vrot.slane %v5516_v31, %v10511_v44  ;;  %v9545_v31 = vld [vmem:[#allocation15 + $0x94] ss:$12 sps:$4 sm:$0xff]  }
0x128b   : > { %6430 = vmatpush1.bf16.msra.mxu1 %v9462_v46  ;;  %6390 = vmatprep.subr.bf16.mxu0 %v9467_v61 }
0x128c   : > { %6431 = vmatprep.subr.bf16.mxu1 %v9470_v52 }
0x128e   : > { %6391 = vmatpush1.bf16.msra.mxu0 %v9465_v48 }
0x128f   : > { %6432 = vmatpush1.bf16.msra.mxu1 %v9468_v54  ;;  %6392 = vmatprep.subr.bf16.mxu0 %v9473_v53 }
0x1290   : > { %6433 = vmatprep.subr.bf16.mxu1 %v9476_v55 }
0x1292   : > { %6393 = vmatpush1.bf16.msra.mxu0 %v9471_v56 }
0x1293   : > { %6434 = vmatpush1.bf16.msra.mxu1 %v9474_v57  ;;  %6394 = vmatprep.subr.bf16.mxu0 %v9479_v58  ;;  %v5450_v58 = vld [vmem:[#allocation3] sm:$0xff] }
0x1294   : > { %6435 = vmatprep.subr.bf16.mxu1 %v9482_v59 }
0x1296   : > { %6395 = vmatpush1.bf16.msra.mxu0 %v9477_v60 }
0x1297   : > { %6436 = vmatpush1.bf16.msra.mxu1 %v9480_v22  ;;  %6396 = vmatprep.subr.bf16.mxu0 %v9485_v28 }
0x1298   : > { %6437 = vmatprep.subr.bf16.mxu1 %v9488_v62 }
0x129a   : > { %6397 = vmatpush1.bf16.msra.mxu0 %v9483_v63 }
0x129b   : > { %6438 = vmatpush1.bf16.msra.mxu1 %v9486_v4  ;;  %6398 = vmatprep.subr.bf16.mxu0 %v9491_v5 }
0x129c   : > { %6439 = vmatprep.subr.bf16.mxu1 %v9494_v9 }
0x129e   : > { %6399 = vmatpush1.bf16.msra.mxu0 %v9489_v10 }
0x129f   : > { %6440 = vmatpush1.bf16.msra.mxu1 %v9492_v11  ;;  %6400 = vmatprep.subr.bf16.mxu0 %v9497_v8  ;;  %v9521_v11 = vld [vmem:[#allocation15 + $0x4] ss:$12 sps:$4 sm:$0xff]   ;;  %v9519_v8 = vld [vmem:[#allocation15] ss:$12 sps:$4 sm:$0xff]  }
0x12a0   : > { %6441 = vmatprep.subr.bf16.mxu1 %v9500_v24  ;;  %v9522_v24 = vld [vmem:[#allocation15 + $0x8] ss:$12 sps:$4 sm:$0xff]  }
0x12a2   : > { %6401 = vmatpush1.bf16.msra.mxu0 %v9495_v13  ;;  %v9904_v13 = vmov 0.0  }
0x12a3   : > { %6442 = vmatpush1.bf16.msra.mxu1 %v9498_v14  ;;  %6402 = vmatprep.subr.bf16.mxu0 %v9503_v15  ;;  %v9525_v14 = vld [vmem:[#allocation15 + $0x1c] ss:$12 sps:$4 sm:$0xff]   ;;  %v9526_v15 = vld [vmem:[#allocation15 + $0x20] ss:$12 sps:$4 sm:$0xff]  }
0x12a4   : > { %6443 = vmatprep.subr.bf16.mxu1 %v9506_v17  ;;  %v9527_v17 = vld [vmem:[#allocation15 + $0x30] ss:$12 sps:$4 sm:$0xff]  }
0x12a6   : > { %6403 = vmatpush1.bf16.msra.mxu0 %v9501_v7  ;;  %v9523_v7 = vld [vmem:[#allocation15 + $0x18] ss:$12 sps:$4 sm:$0xff]  }
0x12a7   : > { %6444 = vmatpush1.bf16.msra.mxu1 %v9504_v16  ;;  %6404 = vmatprep.subr.bf16.mxu0 %v9509_v18  ;;  %v9529_v16 = vld [vmem:[#allocation15 + $0x34] ss:$12 sps:$4 sm:$0xff]   ;;  %v9530_v18 = vld [vmem:[#allocation15 + $0x38] ss:$12 sps:$4 sm:$0xff]  }
0x12a8   : > { %6445 = vmatprep.subr.bf16.mxu1 %v9512_v19  ;;  %v9533_v19 = vld [vmem:[#allocation15 + $0x4c] ss:$12 sps:$4 sm:$0xff]  }
0x12aa   : > { %6405 = vmatpush1.bf16.msra.mxu0 %v9507_v20  ;;  %v9531_v20 = vld [vmem:[#allocation15 + $0x48] ss:$12 sps:$4 sm:$0xff]  }
0x12ab   : > { %6446 = vmatpush1.bf16.msra.mxu1 %v9510_v21  ;;  %6406 = vmatprep.subr.bf16.mxu0 %v9515_v51  ;;  %v9534_v21 = vld [vmem:[#allocation15 + $0x50] ss:$12 sps:$4 sm:$0xff]   ;;  %v9535_v51 = vld [vmem:[#allocation15 + $0x60] ss:$12 sps:$4 sm:$0xff]  }
0x12ac   : > { %6447 = vmatprep.subr.bf16.mxu1 %v9518_v26  ;;  %v9538_v26 = vld [vmem:[#allocation15 + $0x68] ss:$12 sps:$4 sm:$0xff]  }
0x12ae   : > { %6407 = vmatpush1.bf16.msra.mxu0 %v9513_v23  ;;  %v9539_v23 = vld [vmem:[#allocation15 + $0x78] ss:$12 sps:$4 sm:$0xff]  }
0x12af   : > { %6448 = vmatpush1.bf16.msra.mxu1 %v9516_v38  ;;  %6664 = vmatprep.subr.bf16.mxu0 %v9521_v11  ;;  %v9542_v38 = vld [vmem:[#allocation15 + $0x80] ss:$12 sps:$4 sm:$0xff]  }
0x12b0   : > { %8317 = vmatprep.subr.bf16.mxu1 %v9904_v13 }
0x1344   : > { %v5892_v35 = vpop.f32.mrb[0].mxu0 }
0x1345   : > { %v5893_v36 = vadd.f32 %v5892_v35, %v5521_v32  ;;  %v5894_v0 = vpop.f32.mrb[1].mxu0  ;;  %v5933_v47 = vpop.f32.mrb[0].mxu1  ;;  %v9905_v32 = vmov 0   ;;  %v9546_v35 = vld [vmem:[#allocation15 + $0x98] ss:$12 sps:$4 sm:$0xff]  }
0x1346   : > { %v5895_v37 = vadd.f32 %v5894_v0, %v5525_v33  ;;  %v5896_v39 = vpop.f32.mrb[2].mxu0  ;;  %v5935_v6 = vpop.f32.mrb[1].mxu1  ;;  %v5934_v52 = vadd.f32 %v5933_v47, %v5529_v50  ;;  %v9543_v33 = vld [vmem:[#allocation15 + $0x90] ss:$12 sps:$4 sm:$0xff]   ;;  %v9547_v0 = vld [vmem:[#allocation15 + $0xa8] ss:$12 sps:$4 sm:$0xff]  }
0x1347   : > { %v7900_v40 = vmul.f32 -1.442695, %v5893_v36  ;;  %v5897_v41 = vpop.f32.mrb[3].mxu0  ;;  %v5936_v12 = vadd.f32 %v5935_v6, %v5533_v42  ;;  %v5937_v49 = vpop.f32.mrb[2].mxu1  ;;  %v9549_v36 = vld [vmem:[#allocation15 + $0xac] ss:$12 sps:$4 sm:$0xff]  }
0x1348   : > { %v7901_v43 = vmul.f32 -1.442695, %v5895_v37  ;;  %v5938_v46 = vpop.f32.mrb[3].mxu1  ;;  %v9550_v37 = vld [vmem:[#allocation15 + $0xb0] ss:$12 sps:$4 sm:$0xff]  }
0x1349   : > { %9575 = vpow2.f32 %v7900_v40  ;;  %v7902_v61 = vmul.f32 -1.442695, %v5936_v12  ;;  %v6034_v39 = vld [vmem:[%s10617_s6] sm:$0xf] }
0x134a   : > { %9577 = vpow2.f32 %v7901_v43  ;;  %v6039_v40 = vrot.slane %v6034_v39, %v10497_v25  ;;  %v6043_v41 = vrot.slane %v6034_v39, %v10503_v30 }
0x134b   : > { %9579 = vpow2.f32 %v7902_v61 }
0x134c   : > { %9581 = vtanh.f32 %v5934_v52 }
0x1353   : > { %v9576_v48 = vpop.eup %9575 }
0x1354   : > { %v9578_v54 = vpop.eup %9577  ;;  %v5943_v53 = vadd.f32 1.0, %v9576_v48 }
0x1355   : > { %v5949_v55 = vadd.f32 1.0, %v9578_v54  ;;  %v9580_v56 = vpop.eup %9579 }
0x1356   : > { %9583 = vrcp.f32 %v5943_v53  ;;  %v9582_v57 = vpop.eup %9581  ;;  %v5956_v60 = vadd.f32 1.0, %v9580_v56  ;;  %v6051_v53 = vrot.slane %v6034_v39, %v5532_v34  ;;  %v6047_v56 = vrot.slane %v6034_v39, %v10511_v44 }
0x1357   : > { %9585 = vrcp.f32 %v5949_v55 }
0x1358   : > { %9587 = vrcp.f32 %v5956_v60 }
0x1360   : > { %v9584_v59 = vpop.eup %9583 }
0x1361   : > { %v9586_v22 = vpop.eup %9585  ;;  %v5960_v28 = vmul.f32 %v9584_v59, %v9582_v57 }
0x1362   : > { %v5959_v62 = vmul.f32 %v9586_v22, %v5450_v58  ;;  %v9588_v4 = vpop.eup %9587 }
0x1364   : > { %v5961_v63 = vadd.f32 %v5960_v28, %v5959_v62 }
0x1366   : > { %9589 = vtanh.f32 %v5961_v63  ;;  %6483 = vst [vmem:[#allocation3] sm:$0xff] %v5961_v63 }
0x1370   : > { %v9590_v5 = vpop.eup %9589 }
0x1371   : > { %v5963_v9 = vmul.f32 %v9590_v5, %v9588_v4  ;;  %v5968_v4 = vld [vmem:[#allocation3 + $0x8] sm:$0xff] }
0x1373   : > { %v5964_v10 = vpack.c.bf16 %v5963_v9, %v5963_v9  ;;  %6482 = vst [vmem:[#allocation2] sm:$0xff] %v5963_v9 }
0x1375   : > { %6409 = vmatmul.mubr.bf16.vlgmr.msra.gmra.mrb[4].mxu0 %v5964_v10  ;;  %6450 = vmatmul.mubr.bf16.vlgmr.msra.gmra.mrb[4].mxu1 %v5964_v10 }
0x1376   : > { %6665 = vmatpush1.bf16.msra.mxu0 %v9519_v8  ;;  %8318 = vmatpush3.bf16.msra.mxu1 %v9522_v24 }
0x1377   : > { %8319 = vmatprep.subr.bf16.mxu1 %v9904_v13  ;;  %6666 = vmatprep.subr.bf16.mxu0 %v9525_v14 }
0x1378   : > { %6696 = vmatprep.mubr.bf16.mxu0 %v9905_v32  ;;  %8333 = vmatprep.mubr.msk.bf16.mxu1 %vm9906_vm1, %v9904_v13 }
0x137a   : > { %6667 = vmatpush1.bf16.msra.mxu0 %v9523_v7  ;;  %8320 = vmatpush3.bf16.msra.mxu1 %v9526_v15  ;;  %v6519_v15 = vld [vmem:[%s10619_s8] sm:$0x7] }
0x137b   : > { %8321 = vmatprep.subr.bf16.mxu1 %v9904_v13  ;;  %6668 = vmatprep.subr.bf16.mxu0 %v9529_v16  ;;  %v6524_v16 = vrot.slane %v6519_v15, %v10497_v25 }
0x137e   : > { %6669 = vmatpush1.bf16.msra.mxu0 %v9527_v17  ;;  %8322 = vmatpush3.bf16.msra.mxu1 %v9530_v18  ;;  %v6532_v17 = vrot.slane %v6519_v15, %v10511_v44  ;;  %v6528_v18 = vrot.slane %v6519_v15, %v10503_v30 }
0x137f   : > { %8323 = vmatprep.subr.bf16.mxu1 %v9904_v13  ;;  %6670 = vmatprep.subr.bf16.mxu0 %v9533_v19 }
0x1382   : > { %6671 = vmatpush1.bf16.msra.mxu0 %v9531_v20  ;;  %8324 = vmatpush3.bf16.msra.mxu1 %v9534_v21 }
0x1383   : > { %8325 = vmatprep.subr.bf16.mxu1 %v9904_v13  ;;  %6672 = vmatprep.subr.bf16.mxu0 %v9537_v45 }
0x1386   : > { %6673 = vmatpush1.bf16.msra.mxu0 %v9535_v51  ;;  %8326 = vmatpush3.bf16.msra.mxu1 %v9538_v26 }
0x1387   : > { %6674 = vmatprep.subr.bf16.mxu0 %v9541_v27  ;;  %8327 = vmatprep.subr.bf16.mxu1 %v9904_v13 }
0x138a   : > { %6675 = vmatpush1.bf16.msra.mxu0 %v9539_v23  ;;  %8328 = vmatpush3.bf16.msra.mxu1 %v9542_v38 }
0x138b   : > { %6676 = vmatprep.subr.bf16.mxu0 %v9545_v31  ;;  %8329 = vmatprep.subr.bf16.mxu1 %v9904_v13 }
0x138e   : > { %6677 = vmatpush1.bf16.msra.mxu0 %v9543_v33  ;;  %8330 = vmatpush3.bf16.msra.mxu1 %v9546_v35 }
0x138f   : > { %6678 = vmatprep.subr.bf16.mxu0 %v9549_v36  ;;  %8331 = vmatprep.subr.bf16.mxu1 %v9904_v13 }
0x1392   : > { %6679 = vmatpush1.bf16.msra.mxu0 %v9547_v0  ;;  %8332 = vmatpush3.bf16.msra.mxu1 %v9550_v37 }
0x1393   : > { %8337 = vmatprep.subr.bf16.mxu1 %v9904_v13 }
0x1448   : > { %v6410_v42 = vpop.f32.mrb[4].mxu0  ;;  %v6451_v43 = vpop.f32.mrb[4].mxu1 }
0x1449   : > { %v6411_v47 = vadd.f32 %v6410_v42, %v6039_v40  ;;  %v6412_v6 = vpop.f32.mrb[5].mxu0  ;;  %v6453_v12 = vpop.f32.mrb[5].mxu1  ;;  %v6452_v58 = vadd.f32 %v6451_v43, %v6047_v56  ;;  %v9551_v42 = vld [vmem:[#allocation16 + $0x40] sm:$0xff]  }
0x144a   : > { %v6413_v49 = vadd.f32 %v6412_v6, %v6043_v41  ;;  %v6414_v50 = vpop.f32.mrb[6].mxu0  ;;  %v6455_v46 = vpop.f32.mrb[6].mxu1  ;;  %v6454_v55 = vadd.f32 %v6453_v12, %v6051_v53  ;;  %v9552_v43 = vld [vmem:[#allocation16 + $0x80] sm:$0xff]   ;;  %v9554_v6 = vld [vmem:[#allocation16 + $0x48] sm:$0xff]   ;;  %8166 = vmatprep.subr.bf16.mxu0 %v9551_v42 }
0x144b   : > { %v7967_v61 = vmul.f32 -1.442695, %v6411_v47  ;;  %v6415_v52 = vpop.f32.mrb[7].mxu0  ;;  %v6456_v48 = vpop.f32.mrb[7].mxu1  ;;  %v9553_v47 = vld [vmem:[#allocation16] sm:$0xff]   ;;  %v9555_v12 = vld [vmem:[#allocation16 + $0x88] sm:$0xff]  }
0x144c   : > { %v7968_v54 = vmul.f32 -1.442695, %v6413_v49  ;;  %v7969_v57 = vmul.f32 -1.442695, %v6454_v55  ;;  %v9556_v49 = vld [vmem:[#allocation16 + $0x8] sm:$0xff]   ;;  %v9557_v50 = vld [vmem:[#allocation16 + $0x50] sm:$0xff]  }
0x144d   : > { %9591 = vpow2.f32 %v7967_v61  ;;  %v9558_v46 = vld [vmem:[#allocation16 + $0x90] sm:$0xff]   ;;  %v9560_v52 = vld [vmem:[#allocation16 + $0x58] sm:$0xff]   ;;  %v9563_v53 = vld [vmem:[#allocation16 + $0x60] sm:$0xff]  }
0x144e   : > { %9593 = vpow2.f32 %v7968_v54  ;;  %v9559_v61 = vld [vmem:[#allocation16 + $0x10] sm:$0xff]   ;;  %v9561_v48 = vld [vmem:[#allocation16 + $0x98] sm:$0xff]   ;;  %v9564_v55 = vld [vmem:[#allocation16 + $0xa0] sm:$0xff]  }
0x144f   : > { %9595 = vpow2.f32 %v7969_v57  ;;  %v9562_v54 = vld [vmem:[#allocation16 + $0x18] sm:$0xff]   ;;  %v9565_v56 = vld [vmem:[#allocation16 + $0x20] sm:$0xff]   ;;  %v9566_v57 = vld [vmem:[#allocation16 + $0x68] sm:$0xff]  }
0x1450   : > { %9597 = vtanh.f32 %v6452_v58  ;;  %v9567_v58 = vld [vmem:[#allocation16 + $0xa8] sm:$0xff]  }
0x1457   : > { %v9592_v59 = vpop.eup %9591 }
0x1458   : > { %v9594_v60 = vpop.eup %9593  ;;  %v6461_v22 = vadd.f32 1.0, %v9592_v59  ;;  %v9568_v59 = vld [vmem:[#allocation16 + $0x28] sm:$0xff]  }
0x1459   : > { %v6467_v28 = vadd.f32 1.0, %v9594_v60  ;;  %v9596_v62 = vpop.eup %9595  ;;  %v9569_v60 = vld [vmem:[#allocation16 + $0x70] sm:$0xff]  }
0x145a   : > { %9599 = vrcp.f32 %v6461_v22  ;;  %v9598_v63 = vpop.eup %9597  ;;  %v6474_v9 = vadd.f32 1.0, %v9596_v62  ;;  %v9570_v22 = vld [vmem:[#allocation16 + $0xb0] sm:$0xff]  }
0x145b   : > { %9601 = vrcp.f32 %v6467_v28 }
0x145c   : > { %9603 = vrcp.f32 %v6474_v9  ;;  %v9574_v9 = vld [vmem:[#allocation16 + $0x38] sm:$0xff]  }
0x1464   : > { %v9600_v29 = vpop.eup %9599 }
0x1465   : > { %v9602_v34 = vpop.eup %9601  ;;  %v6478_v5 = vmul.f32 %v9600_v29, %v9598_v63  ;;  %v9571_v29 = vld [vmem:[#allocation16 + $0x30] sm:$0xff]  }
0x1466   : > { %v6477_v10 = vmul.f32 %v9602_v34, %v5968_v4  ;;  %v9604_v8 = vpop.eup %9603  ;;  %v9572_v34 = vld [vmem:[#allocation16 + $0x78] sm:$0xff]  }
0x1468   : > { %v6479_v11 = vadd.f32 %v6478_v5, %v6477_v10  ;;  %v9573_v5 = vld [vmem:[#allocation16 + $0xb8] sm:$0xff]  }
0x146a   : > { %9605 = vtanh.f32 %v6479_v11  ;;  %6485 = vst [vmem:[#allocation3 + $0x8] sm:$0xff] %v6479_v11 }
0x1474   : > { %v9606_v24 = vpop.eup %9605 }
0x1475   : > { %v6481_v14 = vmul.f32 %v9606_v24, %v9604_v8 }
0x1477   : > { %6484 = vst [vmem:[#allocation2 + $0x8] sm:$0xff] %v6481_v14  ;;  %v6486_v7 = vpack.c.bf16 %v6481_v14, %v6481_v14  ;;  %v9907_v14 = vmov 1.0|1.0  }
0x1479   : > { %6697 = vmatmul.mubr.bf16.vlgmr.msra.gmra.mrb[8].mxu0 %v6486_v7  ;;  %8334 = vmatmul.mubr.bf16.vlgmr.msra.gmra.mrb[8].mxu1 %v6486_v7 }
0x147a   : > { %8353 = vmatprep.mubr.msk.bf16.mxu1 %vm9906_vm1, %v9904_v13  ;;  %8338 = vmatpush3.bf16.msra.mxu1 %v9552_v43 }
0x147b   : > { %8167 = vmatpush3.bf16.msra.mxu0 %v9553_v47  ;;  %8339 = vmatprep.subr.bf16.mxu1 %v9904_v13 }
0x147c   : > { %8168 = vmatprep.subr.bf16.mxu0 %v9554_v6 }
0x147e   : > { %8340 = vmatpush3.bf16.msra.mxu1 %v9555_v12 }
0x147f   : > { %8169 = vmatpush3.bf16.msra.mxu0 %v9556_v49  ;;  %8341 = vmatprep.subr.bf16.mxu1 %v9904_v13 }
0x1480   : > { %8170 = vmatprep.subr.bf16.mxu0 %v9557_v50 }
0x1482   : > { %8342 = vmatpush3.bf16.msra.mxu1 %v9558_v46 }
0x1483   : > { %8171 = vmatpush3.bf16.msra.mxu0 %v9559_v61  ;;  %8343 = vmatprep.subr.bf16.mxu1 %v9904_v13 }
0x1484   : > { %8172 = vmatprep.subr.bf16.mxu0 %v9560_v52 }
0x1486   : > { %8344 = vmatpush3.bf16.msra.mxu1 %v9561_v48 }
0x1487   : > { %8173 = vmatpush3.bf16.msra.mxu0 %v9562_v54  ;;  %8345 = vmatprep.subr.bf16.mxu1 %v9904_v13 }
0x1488   : > { %8174 = vmatprep.subr.bf16.mxu0 %v9563_v53 }
0x148a   : > { %8346 = vmatpush3.bf16.msra.mxu1 %v9564_v55 }
0x148b   : > { %8175 = vmatpush3.bf16.msra.mxu0 %v9565_v56  ;;  %8347 = vmatprep.subr.bf16.mxu1 %v9904_v13 }
0x148c   : > { %8176 = vmatprep.subr.bf16.mxu0 %v9566_v57 }
0x148e   : > { %8348 = vmatpush3.bf16.msra.mxu1 %v9567_v58 }
0x148f   : > { %8177 = vmatpush3.bf16.msra.mxu0 %v9568_v59  ;;  %8349 = vmatprep.subr.bf16.mxu1 %v9904_v13 }
0x1490   : > { %8178 = vmatprep.subr.bf16.mxu0 %v9569_v60 }
0x1492   : > { %8350 = vmatpush3.bf16.msra.mxu1 %v9570_v22 }
0x1493   : > { %8351 = vmatprep.subr.bf16.mxu1 %v9904_v13  ;;  %8179 = vmatpush3.bf16.msra.mxu0 %v9571_v29 }
0x1494   : > { %8180 = vmatprep.subr.bf16.mxu0 %v9572_v34 }
0x1496   : > { %8352 = vmatpush3.bf16.msra.mxu1 %v9573_v5 }
0x1497   : > { %8181 = vmatpush3.bf16.msra.mxu0 %v9574_v9 }
0x154c   : > { %v6698_v19 = vpop.f32.mrb[8].mxu0  ;;  %v6739_v20 = vpop.f32.mrb[8].mxu1 }
0x154d   : > { %v6699_v21 = vadd.f32 %v6698_v19, %v6524_v16  ;;  %v6740_v45 = vadd.f32 %v6739_v20, %v6532_v17  ;;  %v6700_v51 = vpop.f32.mrb[9].mxu0  ;;  %v8335_v26 = vpop.f32.mrb[9].mxu1 }
0x154e   : > { %v6701_v27 = vadd.f32 %v6700_v51, %v6528_v18  ;;  %v6702_v23 = vpop.f32.mrb[10].mxu0  ;;  %v6742_v38 = vpop.f32.mrb[10].mxu1 }
0x154f   : > { %7994 = vst [vmem:[%s10253_s15 + $0x48] sm:$0xff] %v6699_v21  ;;  %7996 = vst [vmem:[%s10253_s15 + $0x58] sm:$0xff] %v6740_v45  ;;  %v6703_v31 = vpop.f32.mrb[11].mxu0  ;;  %v8336_v25 = vpop.f32.mrb[11].mxu1  ;;  %v6754_v32 = vsel %vm6751_vm2, %v6740_v45, -inf }
0x1550   : > { %7995 = vst [vmem:[%s10253_s15 + $0x50] sm:$0xff] %v6701_v27  ;;  %v6755_v44 = vmax.f32 %v6699_v21, %v6701_v27  ;;  %v8030_v45 = vld [vmem:[%s10222_s11 + $0xc] sm:$0xf] }
0x1552   : > { %v6756_v33 = vmax.f32 %v6755_v44, %v6754_v32 }
0x1554   : > { %6757 = vmax.xlane.f32.xlu0 %v6756_v33 }
0x15e1   : > { %v6758_v30 = vpop.xlane.xlu0 %6757 }
0x15e2   : > { %vm6759_vm3 = vcmp.eq.f32.partialorder %v6699_v21, %v6758_v30  ;;  %vm6760_vm4 = vcmp.eq.f32.partialorder %v6701_v27, %v6758_v30  ;;  %vm6761_vm5 = vcmp.eq.f32.partialorder %v6754_v32, %v6758_v30 }
0x15e3   : > { %v6762_v35 = vsel %vm6759_vm3, %v10245_v1, 384  ;;  %v6763_v36 = vsel %vm6760_vm4, %v10248_v2, 384  ;;  %v6764_v0 = vsel %vm6761_vm5, %v10251_v3, 384 }
0x15e4   : > { %vm6765_vm6 = vcmp.lt.s32.totalorder %v6762_v35, %v6763_v36 }
0x15e5   : > { %v6766_v37 = vsel %vm6765_vm6, %v6762_v35, %v6763_v36 }
0x15e6   : > { %vm6767_vm7 = vcmp.lt.s32.totalorder %v6766_v37, %v6764_v0 }
0x15e7   : > { %v6768_v39 = vsel %vm6767_vm7, %v6766_v37, %v6764_v0 }
0x15e8   : > { %v6770_v40 = vshra.s32 %v6768_v39, 16  ;;  %v6769_v28 = vand.u32 65535, %v6768_v39 }
0x15ea   : > { %v6772_v41 = vcvt.s32.f32 %v6770_v40  ;;  %v6771_v63 = vcvt.s32.f32 %v6769_v28 }
0x15ec   : > { %6773 = vmin.xlane.f32.xlu0 %v6772_v41 }
0x1679   : > { %v6774_v62 = vpop.xlane.xlu0 %6773 }
0x167a   : > { %vm6775_vm8 = vcmp.eq.f32.partialorder %v6772_v41, %v6774_v62  ;;  %v6780_v10 = vcvt.f32.s32 %v6774_v62 }
0x167b   : > { %v6776_v4 = vsel %vm6775_vm8, %v6771_v63, inf }
0x167c   : > { %6777 = vmin.xlane.f32.xlu1 %v6776_v4  ;;  %v6781_v8 = vshll.u32 %v6780_v10, 16 }
0x1709   : > { %v6778_v11 = vpop.xlane.xlu1 %6777 }
0x170a   : > { %v6779_v24 = vcvt.f32.s32 %v6778_v11 }
0x170c   : > { %v6782_v13 = vadd.s32 %v6781_v8, %v6779_v24 }
0x170e   : > { %vm6784_vm9 = vcmp.eq.s32.totalorder %v10248_v2, %v6782_v13  ;;  %vm6785_vm10 = vcmp.eq.s32.totalorder %v10251_v3, %v6782_v13  ;;  %vm6783_vm11 = vcmp.eq.s32.totalorder %v10245_v1, %v6782_v13  ;;  %v7073_v3 = vstv %s7072_s27 }
0x170f   : > { %vm8024_vm12 = vmpackc.low %vm6784_vm9, %vm6784_vm9  ;;  %vm7074_vm15 = vcmp.eq.s32.totalorder %v7073_v3, 1 }
0x1710   : > { %8025 = vmatprep.mubr.msk.bf16.mxu0 %vm8024_vm12, %v9907_v14  ;;  %vm8028_vm13 = vmpackc.low %vm6785_vm10, %vm6785_vm10 }
0x1711   : > { %8354 = vmatmul.mubr.msk.bf16.vlgmr.msra.gmra.mrb[12].mxu1 %vm8028_vm13, %v9907_v14  ;;  %vm8026_vm14 = vmpackc.low %vm6783_vm11, %vm6783_vm11 }
0x1712   : > { %8027 = vmatmul.mubr.msk.bf16.vlgmr.msra.gmra.mrb[12].mxu0 %vm8026_vm14, %v9907_v14 }
0x17e4   : > { %v7061_v7 = vpop.f32.mrb[12].mxu1 }
0x17e5   : > { %v8182_v15 = vpop.f32.mrb[12].mxu0  ;;  %v8355_v16 = vpop.f32.mrb[13].mxu1 }
0x17e6   : > { %v8183_v17 = vpop.f32.mrb[13].mxu0  ;;  %v7064_v2 = vpop.f32.mrb[14].mxu1 }
0x17e7   : > { %v8184_v18 = vadd.f32 %v8183_v17, %v8182_v15  ;;  %v8185_v19 = vpop.f32.mrb[14].mxu0  ;;  %v8356_v1 = vpop.f32.mrb[15].mxu1 }
0x17e8   : > { %v8186_v20 = vpop.f32.mrb[15].mxu0 }
0x17e9   : > { %v7062_v21 = vadd.f32 %v8184_v18, %v7061_v7 }
0x17eb   : > { %v7067_v51 = vpack.c.bf16 %v7062_v21, %v7062_v21 }
0x17ed   : > { %v7075_v26 = vsel %vm7074_vm15, %v8030_v45, %v7067_v51 }
0x17ee   : > { %7076 = vst [vmem:[#allocation4] sm:$0xf] %v7075_v26 }
0x17ef PF: > { %s8358_s29 = smul.u32 1536, %s9999_s0  ;;  %s7092_s19 = sshll.u32 %s10253_s15, 4  ;;  %s10567_s19 = int_to_ptr.vmem [resolvable:$true] %s7092_s19 }
0x17f0   : > { %s10649_s30 = sld [smem:[#allocation28_spill]]  ;;  %s7078_s11 = scalar_lea.sflag [#allocation9], %s10219_s14 }
0x17f1   : > { %s9787_s17 = scalar_lea.vmem %s10567_s19, 1536  ;;  %s9908_s23 = smov [#allocation18]  }
0x17f2   : > { %p9788_p1 = scmp.ne.s32.totalorder %s10567_s19, %s9787_s17  ;;  %s9791_s12 = sshll.u32 %s9908_s23, 4  ;;  %s9792_s12 = int_to_ptr.vmem [resolvable:$false] %s9791_s12 }
0x17f3   : > { %s9793_s0 = scalar_lea.vmem %s9792_s12, 3072  ;;  %p9794_p2 = scmp.lt.s32.totalorder %s10567_s19, %s9792_s12 }
0x17f4   : > { %p9789_p5 = pnand %p9788_p1, %p10162_p8  ;;  %p9795_p12 = scmp.lt.s32.totalorder %s9793_s0, %s9787_s17 }
0x17f6   : > { %s10565_s16 = scalar_lea.hbm %s10649_s30, %s8358_s29  ;;  %p9790_p4 = pneg %p9789_p5 }
0x17f7   : > { %p9796_p3 = por %p9795_p12, %p9794_p2 }
0x17f9   : > { %p9797_p7 = pnand %p9796_p3, %p9790_p4 }
0x17fb   : > { %9800 = shalt.err (!%p9797_p7)
}
0x17fc   : > { %s9801_s15 = scalar_lea.hbm %s10565_s16, 1536  ;;  %s9805_s27 = scalar_lea.hbm %s10649_s30, 3072 }
0x17fd   : > { %p9802_p0 = scmp.ne.s32.totalorder %s10565_s16, %s9801_s15  ;;  %p9806_p13 = scmp.lt.u32.totalorder %s10565_s16, %s10649_s30 }
0x17fe   : > { %p9807_p6 = scmp.lt.u32.totalorder %s9805_s27, %s9801_s15  ;;  %p9809_p1 = scmp.lt.u32.totalorder %s9801_s15, %s10565_s16 }
0x17ff   : > { %p9803_p11 = pnand %p9802_p0, %p10162_p8 }
0x1800   : > { %p9808_p10 = por %p9807_p6, %p9806_p13 }
0x1801   : > { %p9804_p9 = pneg %p9803_p11 }
0x1802   : > { %p9810_p5 = por %p9809_p1, %p9808_p10 }
0x1804   : > { %p9811_p4 = pnand %p9810_p5, %p9804_p9 }
0x1806   : > { %9814 = shalt.err (!%p9811_p4)
}
0x1807   : > { %s9909_s20 = smov 384   ;;  %s9910_s17 = smov 24  }
0x1808   : > { %8381 = dma.vmem_to_hbm [thread:$0]  (%p10162_p8), %s10567_s19, 1536, %s10565_s16, %s7078_s11, %s9909_s20, %s9909_s20, %s9910_s17  }
0x1809 PF: > { %s10650_s23 = sld [smem:[#allocation26_spill]]  ;;  %s10651_s12 = sld [smem:[#allocation27_spill]] }
0x180a   : > { %p10653_p12 = scmp.ge.s32.totalorder %s9871_s26, 2 }
0x180f   : > { %s7107_s0 = sand.u32 1, %s10650_s23   ;;  %p10652_p2 = scmp.ne.s32.totalorder %s10651_s12, 0 }
0x1810   : > { %s7108_s15 = scalar_lea.sflag [#allocation9], %s7107_s0 }
0x1811   : > { %p8404_p3 = pnand %p10653_p12, %p10652_p2 }
0x1813   : > { %9854 = dma.done.wait (!%p8404_p3), %s7108_s15, 1536  }
0x1814   : > { %9856 = vsyncadd (!%p8404_p3), %s7108_s15, 4294965760  ;;  %p30_p7 = scmp.ge.s32.totalorder %s10148_s10, 4   ;;  %s10654_s23 = smov %s9863_s24 }
0x1815   : > { %s10655_s24 = smov %s9867_s25  ;;  %s10656_s25 = smov %s10158_s22 }
0x1816   : > { %s10657_s26 = smov %s10148_s10  ;;  %32 = sbr.rel (!%p30_p7) target bundleno = 20 (0x14), region = 171 }
0x181d   :  { %7113 = vsyncpa [#allocation8], 1 }
0x181e   :  { %7115 = vsyncpa [#allocation8 + $0x1], 1 }
0x181f   :  { %7116 = vsyncpa [#allocation11], 1 }
0x1820   :  { %7118 = vsyncpa [#allocation11 + $0x1], 1 }
0x1821   :  { %7119 = vsyncpa [#allocation14], 1 }
0x1822   :  { %7120 = vsyncpa [#allocation17], 1 }
0x1823   :  { %7121 = vsyncpa [#allocation9], 1 }
0x1824   :  { %7123 = vsyncpa [#allocation9 + $0x1], 1 }

</bundles_post_ra>
